<compile_context>
chip_gen: v5e
topology: v5e:2x2
jax: 0.10.0
libtpu: 0.0.40
codegen_flags: <defaults>
</compile_context>

<pallas_src>
import jax
import jax.numpy as jnp
from jax import lax
from jax.experimental import pallas as pl
from jax.experimental.pallas import tpu as pltpu

N_CLUSTERS = 5       # logical K (KMeans(n_clusters=5))
K_PAD = 8            # K padded to a sublane multiple; padded rows are masked
KMEANS_ITERS = 20    # Lloyd iterations (converges well before this at these sizes)
BIG = 1e30           # Python float -> jaxpr literal (NOT a captured jnp constant)


def _dot_nt(a, b):
    """a @ b.T (contract last dim of both), f32 accumulation on the MXU."""
    return lax.dot_general(a, b, (((1,), (1,)), ((), ())),
                           preferred_element_type=jnp.float32)


def _dot_nn(a, b):
    """a @ b (standard matmul), f32 accumulation on the MXU."""
    return lax.dot_general(a, b, (((1,), (0,)), ((), ())),
                           preferred_element_type=jnp.float32)


# ---------------------------------------------------------------------------
# Fused kernel: KMeans (Lloyd) + silhouette loss.  Everything in VMEM/vregs.
# ---------------------------------------------------------------------------
def opt_loss_kernel(x_ref, y_ref, loss_ref):
    """x_ref: (N, D) image embeds (VMEM), y_ref: (N, D) caption embeds (VMEM),
    loss_ref: (1, 1) scalar loss (SMEM)."""
    x = x_ref[...]                                      # (N, D) f32
    y = y_ref[...]                                      # (N, D) f32
    n, _ = x.shape
    inv_n = 1.0 / n

    # Hoisted broadcasts (JAX does not CSE broadcast_in_dim inside the loop).
    k_idx_i = lax.broadcasted_iota(jnp.int32, (K_PAD, n), 0)     # (K_PAD, N)
    k_idx = k_idx_i.astype(jnp.float32)
    pad_mask = k_idx_i >= N_CLUSTERS                             # padded cluster rows

    def assign(c):
        """Hard assignment of x to centroids c -> one-hot (K_PAD, N) on sublanes."""
        c2 = jnp.sum(c * c, axis=-1, keepdims=True)              # (K_PAD, 1)
        xc = _dot_nt(c, x)                                       # (K_PAD, N) = c @ x.T
        # ||x_i||^2 omitted: constant per column, irrelevant to the arg-min.
        d = c2 - 2.0 * xc
        d = jnp.where(pad_mask, BIG, d)                          # never pick padded rows
        dmin = jnp.min(d, axis=0, keepdims=True)                 # (1, N)
        cand = jnp.where(d <= dmin, k_idx, float(K_PAD))         # first-min tie-break
        lbl = jnp.min(cand, axis=0, keepdims=True)               # (1, N)
        return (k_idx == lbl).astype(jnp.float32)                # (K_PAD, N)

    def lloyd_body(_, c):
        onehot = assign(c)                                       # (K_PAD, N)
        counts = jnp.sum(onehot, axis=1, keepdims=True)          # (K_PAD, 1)
        sums = _dot_nn(onehot, x)                                # (K_PAD, D)
        inv_cnt = pl.reciprocal(jnp.maximum(counts, 1.0), approx=True)
        # Empty cluster keeps its old centroid (sklearn relocates; acceptable dif).
        return jnp.where(counts > 0.5, sums * inv_cnt, c)

    # TODO(synk): sklearn's k-means++ seeding (random_state=0) has no clean kernel
    # equivalent; deterministic first-K init is used instead.
    c0 = x[:K_PAD]                                               # padded rows masked out
    c_final = lax.fori_loop(0, KMEANS_ITERS, lloyd_body, c0, unroll=True)

    # Final assignment against the final centroids (matches sklearn's last E-step).
    onehot = assign(c_final)                                     # (K_PAD, N)
    counts = jnp.sum(onehot, axis=1, keepdims=True)              # (K_PAD, 1)

    # ----------------- silhouette of caption embeds under the labels --------
    y2 = jnp.sum(y * y, axis=-1, keepdims=True)                  # (N, 1)
    d2y = y2 + y2.T - 2.0 * _dot_nt(y, y)                        # (N, N) f32
    dist = jnp.sqrt(jnp.maximum(d2y, 0.0))
    row_i = lax.broadcasted_iota(jnp.int32, (n, n), 0)
    col_i = lax.broadcasted_iota(jnp.int32, (n, n), 1)
    dist = jnp.where(row_i == col_i, 0.0, dist)                  # exact-zero diagonal

    # csum_t[k, i] = sum_{j in C_k} dist(i, j)   (dist is symmetric)
    csum_t = _dot_nn(onehot, dist)                               # (K_PAD, N)

    # a(i): mean intra-cluster distance (exclude self -> divide by |C|-1)
    own_count = jnp.sum(counts * onehot, axis=0, keepdims=True)  # (1, N)
    a_num = jnp.sum(csum_t * onehot, axis=0, keepdims=True)      # (1, N)
    a = a_num * pl.reciprocal(jnp.maximum(own_count - 1.0, 1.0), approx=True)

    # b(i): min over other non-empty clusters of the mean distance
    inv_counts = pl.reciprocal(jnp.maximum(counts, 1.0), approx=True)   # (K_PAD, 1)
    mean_other = csum_t * inv_counts                                     # (K_PAD, N)
    mean_other = jnp.where((onehot > 0.5) | (counts < 0.5), BIG, mean_other)
    b = jnp.min(mean_other, axis=0, keepdims=True)                       # (1, N)

    s = (b - a) * pl.reciprocal(jnp.maximum(jnp.maximum(a, b), 1e-12), approx=True)
    s = jnp.where(own_count <= 1.0, 0.0, s)                      # singleton clusters -> 0

    # loss = 1 - mean silhouette, scalar epilogue into SMEM.
    loss_ref[0, 0] = 1.0 - jnp.sum(s) * inv_n


@jax.jit
def _opt_loss(image_embeds, captions):
    n, d = image_embeds.shape
    # Working set (f32): x, y, dist (NxN), a handful of (K_PAD, N)/(K_PAD, D) tiles.
    working_set = 4 * (2 * n * d + n * n + 4 * K_PAD * n + 3 * K_PAD * d)
    vmem_limit = min(128 * 1024 * 1024, max(4 * 1024 * 1024, 8 * working_set))
    # TODO(synk): for N beyond a few thousand the NxN silhouette matrix must be
    # row-block tiled with a parallel grid (v7x: 64 MiB VMEM, 2nd TensorCore);
    # this gridless design is sized for small TTA batches.
    loss = pl.pallas_call(
        opt_loss_kernel,
        out_shape=jax.ShapeDtypeStruct((1, 1), jnp.float32),
        in_specs=[pl.BlockSpec(memory_space=pltpu.MemorySpace.VMEM),
                  pl.BlockSpec(memory_space=pltpu.MemorySpace.VMEM)],
        out_specs=pl.BlockSpec(memory_space=pltpu.MemorySpace.SMEM),
        compiler_params=pltpu.CompilerParams(vmem_limit_bytes=vmem_limit),
    )(image_embeds.astype(jnp.float32), captions.astype(jnp.float32))
    return loss[0, 0]


# ---------------------------------------------------------------------------
# OptModel.forward equivalent
# ---------------------------------------------------------------------------
def opt_model_forward(image_embeds, captions, mode="image", steps=1):
    assert steps > 0, "tent requires >= 1 step(s) to forward and update"
    if mode != "image":
        raise ValueError("training mode error: not using image labels")
    assert image_embeds.shape == captions.shape and image_embeds.shape[0] >= K_PAD

    # TODO(synk): optimizer.zero_grad()/loss.backward()/optimizer.step() update an
    # external model between steps; without them every step produces the identical
    # loss, so it is computed once (== the loss returned from the last step).
    # TODO(synk): the Counter-based min_samples>=3 branch only changes optimizer
    # side effects (and prints), not the returned loss, so it is omitted.
    return _opt_loss(image_embeds, captions)


if __name__ == "__main__":
    key = jax.random.PRNGKey(0)
    k1, k2 = jax.random.split(key)
    # small synthetic embeddings: N=64 samples, D=32 embedding dim
    image_embeds = jax.random.normal(k1, (64, 32), dtype=jnp.float32)
    captions = jax.random.normal(k2, (64, 32), dtype=jnp.float32)

    loss = opt_model_forward(image_embeds, captions, mode="image", steps=1)
    jax.block_until_ready(loss)
    assert jnp.isfinite(loss)
    print("KERNEL_OK")
</pallas_src>

<mosaic_0001>
module attributes {stable_mosaic.version = 11 : i64} {
  func.func @opt_loss_kernel(%arg0: memref<64x32xf32, #tpu.memory_space<vmem>>, %arg1: memref<64x32xf32, #tpu.memory_space<vmem>>, %arg2: memref<1x1xf32, #tpu.memory_space<smem>>) attributes {dimension_semantics = [], scalar_prefetch = 0 : i64, scratch_operands = 0 : i64, tpu.core_type = #tpu.core_type<tc>} {
    %c0 = arith.constant 0 : index
    %c0_0 = arith.constant 0 : index
    %0 = vector.load %arg0[%c0, %c0_0] : memref<64x32xf32, #tpu.memory_space<vmem>>, vector<64x32xf32>
    %c0_1 = arith.constant 0 : index
    %c0_2 = arith.constant 0 : index
    %1 = vector.load %arg1[%c0_1, %c0_2] : memref<64x32xf32, #tpu.memory_space<vmem>>, vector<64x32xf32>
    %2 = tpu.iota {dimensions = array<i32: 0>} : vector<8x64xi32>
    %3 = arith.sitofp %2 : vector<8x64xi32> to vector<8x64xf32>
    %c5_i32 = arith.constant 5 : i32
    %4 = vector.broadcast %c5_i32 : i32 to vector<8x64xi32>
    %5 = arith.cmpi sge, %2, %4 : vector<8x64xi32>
    %6 = vector.extract_strided_slice %0 {offsets = [0, 0], sizes = [8, 32], strides = [1, 1]} : vector<64x32xf32> to vector<8x32xf32>
    %c0_i32 = arith.constant 0 : i32
    %7 = arith.mulf %6, %6 : vector<8x32xf32>
    %cst = arith.constant dense<0.000000e+00> : vector<8xf32>
    %8 = vector.multi_reduction <add>, %7, %cst [1] : vector<8x32xf32> to vector<8xf32>
    %9 = vector.shape_cast %8 : vector<8xf32> to vector<8x1xf32>
    %cst_3 = arith.constant dense<0.000000e+00> : vector<8x64xf32>
    %10 = tpu.matmul %6, %0, %cst_3 {dimension_numbers = #tpu.dot_dimension_numbers<[1], [1], [0], [0], [0, 0, 1, 0], [], []>} : vector<8x32xf32>, vector<64x32xf32>, vector<8x64xf32> -> vector<8x64xf32>
    %cst_4 = arith.constant 2.000000e+00 : f32
    %11 = vector.broadcast %cst_4 : f32 to vector<8x64xf32>
    %12 = arith.mulf %11, %10 : vector<8x64xf32>
    %13 = vector.broadcast %9 : vector<8x1xf32> to vector<8x64xf32>
    %14 = arith.subf %13, %12 : vector<8x64xf32>
    %cst_5 = arith.constant 1.000000e+30 : f32
    %15 = vector.broadcast %cst_5 : f32 to vector<8x64xf32>
    %16 = arith.select %5, %15, %14 : vector<8x64xi1>, vector<8x64xf32>
    %cst_6 = arith.constant dense<0x7F800000> : vector<64xf32>
    %17 = vector.multi_reduction <minimumf>, %16, %cst_6 [0] : vector<8x64xf32> to vector<64xf32>
    %18 = vector.shape_cast %17 : vector<64xf32> to vector<1x64xf32>
    %19 = vector.broadcast %18 : vector<1x64xf32> to vector<8x64xf32>
    %20 = arith.cmpf ole, %16, %19 : vector<8x64xf32>
    %cst_7 = arith.constant 8.000000e+00 : f32
    %21 = vector.broadcast %cst_7 : f32 to vector<8x64xf32>
    %22 = arith.select %20, %3, %21 : vector<8x64xi1>, vector<8x64xf32>
    %cst_8 = arith.constant dense<0x7F800000> : vector<64xf32>
    %23 = vector.multi_reduction <minimumf>, %22, %cst_8 [0] : vector<8x64xf32> to vector<64xf32>
    %24 = vector.shape_cast %23 : vector<64xf32> to vector<1x64xf32>
    %25 = vector.broadcast %24 : vector<1x64xf32> to vector<8x64xf32>
    %26 = arith.cmpf oeq, %3, %25 : vector<8x64xf32>
    %27 = arith.extui %26 : vector<8x64xi1> to vector<8x64xi32>
    %28 = arith.sitofp %27 : vector<8x64xi32> to vector<8x64xf32>
    %cst_9 = arith.constant dense<0.000000e+00> : vector<8xf32>
    %29 = vector.multi_reduction <add>, %28, %cst_9 [1] : vector<8x64xf32> to vector<8xf32>
    %30 = vector.shape_cast %29 : vector<8xf32> to vector<8x1xf32>
    %cst_10 = arith.constant dense<0.000000e+00> : vector<8x32xf32>
    %31 = tpu.matmul %28, %0, %cst_10 {dimension_numbers = #tpu.dot_dimension_numbers<[1], [0], [0], [1], [0, 0, 1, 1], [], []>} : vector<8x64xf32>, vector<64x32xf32>, vector<8x32xf32> -> vector<8x32xf32>
    %cst_11 = arith.constant 1.000000e+00 : f32
    %32 = vector.broadcast %cst_11 : f32 to vector<8x1xf32>
    %33 = arith.maximumf %30, %32 : vector<8x1xf32>
    %34 = tpu.reciprocal %33 {approx = true} : vector<8x1xf32> -> vector<8x1xf32>
    %cst_12 = arith.constant 5.000000e-01 : f32
    %35 = vector.broadcast %cst_12 : f32 to vector<8x1xf32>
    %36 = arith.cmpf ogt, %30, %35 : vector<8x1xf32>
    %37 = vector.broadcast %34 : vector<8x1xf32> to vector<8x32xf32>
    %38 = arith.mulf %31, %37 : vector<8x32xf32>
    %39 = vector.shape_cast %36 : vector<8x1xi1> to vector<8x1xi1>
    %40 = vector.broadcast %39 : vector<8x1xi1> to vector<8x32xi1>
    %41 = arith.select %40, %38, %6 : vector<8x32xi1>, vector<8x32xf32>
    %c1_i32 = arith.constant 1 : i32
    %42 = arith.mulf %41, %41 : vector<8x32xf32>
    %cst_13 = arith.constant dense<0.000000e+00> : vector<8xf32>
    %43 = vector.multi_reduction <add>, %42, %cst_13 [1] : vector<8x32xf32> to vector<8xf32>
    %44 = vector.shape_cast %43 : vector<8xf32> to vector<8x1xf32>
    %cst_14 = arith.constant dense<0.000000e+00> : vector<8x64xf32>
    %45 = tpu.matmul %41, %0, %cst_14 {dimension_numbers = #tpu.dot_dimension_numbers<[1], [1], [0], [0], [0, 0, 1, 0], [], []>} : vector<8x32xf32>, vector<64x32xf32>, vector<8x64xf32> -> vector<8x64xf32>
    %cst_15 = arith.constant 2.000000e+00 : f32
    %46 = vector.broadcast %cst_15 : f32 to vector<8x64xf32>
    %47 = arith.mulf %46, %45 : vector<8x64xf32>
    %48 = vector.broadcast %44 : vector<8x1xf32> to vector<8x64xf32>
    %49 = arith.subf %48, %47 : vector<8x64xf32>
    %cst_16 = arith.constant 1.000000e+30 : f32
    %50 = vector.broadcast %cst_16 : f32 to vector<8x64xf32>
    %51 = arith.select %5, %50, %49 : vector<8x64xi1>, vector<8x64xf32>
    %cst_17 = arith.constant dense<0x7F800000> : vector<64xf32>
    %52 = vector.multi_reduction <minimumf>, %51, %cst_17 [0] : vector<8x64xf32> to vector<64xf32>
    %53 = vector.shape_cast %52 : vector<64xf32> to vector<1x64xf32>
    %54 = vector.broadcast %53 : vector<1x64xf32> to vector<8x64xf32>
    %55 = arith.cmpf ole, %51, %54 : vector<8x64xf32>
    %cst_18 = arith.constant 8.000000e+00 : f32
    %56 = vector.broadcast %cst_18 : f32 to vector<8x64xf32>
    %57 = arith.select %55, %3, %56 : vector<8x64xi1>, vector<8x64xf32>
    %cst_19 = arith.constant dense<0x7F800000> : vector<64xf32>
    %58 = vector.multi_reduction <minimumf>, %57, %cst_19 [0] : vector<8x64xf32> to vector<64xf32>
    %59 = vector.shape_cast %58 : vector<64xf32> to vector<1x64xf32>
    %60 = vector.broadcast %59 : vector<1x64xf32> to vector<8x64xf32>
    %61 = arith.cmpf oeq, %3, %60 : vector<8x64xf32>
    %62 = arith.extui %61 : vector<8x64xi1> to vector<8x64xi32>
    %63 = arith.sitofp %62 : vector<8x64xi32> to vector<8x64xf32>
    %cst_20 = arith.constant dense<0.000000e+00> : vector<8xf32>
    %64 = vector.multi_reduction <add>, %63, %cst_20 [1] : vector<8x64xf32> to vector<8xf32>
    %65 = vector.shape_cast %64 : vector<8xf32> to vector<8x1xf32>
    %cst_21 = arith.constant dense<0.000000e+00> : vector<8x32xf32>
    %66 = tpu.matmul %63, %0, %cst_21 {dimension_numbers = #tpu.dot_dimension_numbers<[1], [0], [0], [1], [0, 0, 1, 1], [], []>} : vector<8x64xf32>, vector<64x32xf32>, vector<8x32xf32> -> vector<8x32xf32>
    %cst_22 = arith.constant 1.000000e+00 : f32
    %67 = vector.broadcast %cst_22 : f32 to vector<8x1xf32>
    %68 = arith.maximumf %65, %67 : vector<8x1xf32>
    %69 = tpu.reciprocal %68 {approx = true} : vector<8x1xf32> -> vector<8x1xf32>
    %cst_23 = arith.constant 5.000000e-01 : f32
    %70 = vector.broadcast %cst_23 : f32 to vector<8x1xf32>
    %71 = arith.cmpf ogt, %65, %70 : vector<8x1xf32>
    %72 = vector.broadcast %69 : vector<8x1xf32> to vector<8x32xf32>
    %73 = arith.mulf %66, %72 : vector<8x32xf32>
    %74 = vector.shape_cast %71 : vector<8x1xi1> to vector<8x1xi1>
    %75 = vector.broadcast %74 : vector<8x1xi1> to vector<8x32xi1>
    %76 = arith.select %75, %73, %41 : vector<8x32xi1>, vector<8x32xf32>
    %c2_i32 = arith.constant 2 : i32
    %77 = arith.mulf %76, %76 : vector<8x32xf32>
    %cst_24 = arith.constant dense<0.000000e+00> : vector<8xf32>
    %78 = vector.multi_reduction <add>, %77, %cst_24 [1] : vector<8x32xf32> to vector<8xf32>
    %79 = vector.shape_cast %78 : vector<8xf32> to vector<8x1xf32>
    %cst_25 = arith.constant dense<0.000000e+00> : vector<8x64xf32>
    %80 = tpu.matmul %76, %0, %cst_25 {dimension_numbers = #tpu.dot_dimension_numbers<[1], [1], [0], [0], [0, 0, 1, 0], [], []>} : vector<8x32xf32>, vector<64x32xf32>, vector<8x64xf32> -> vector<8x64xf32>
    %cst_26 = arith.constant 2.000000e+00 : f32
    %81 = vector.broadcast %cst_26 : f32 to vector<8x64xf32>
    %82 = arith.mulf %81, %80 : vector<8x64xf32>
    %83 = vector.broadcast %79 : vector<8x1xf32> to vector<8x64xf32>
    %84 = arith.subf %83, %82 : vector<8x64xf32>
    %cst_27 = arith.constant 1.000000e+30 : f32
    %85 = vector.broadcast %cst_27 : f32 to vector<8x64xf32>
    %86 = arith.select %5, %85, %84 : vector<8x64xi1>, vector<8x64xf32>
    %cst_28 = arith.constant dense<0x7F800000> : vector<64xf32>
    %87 = vector.multi_reduction <minimumf>, %86, %cst_28 [0] : vector<8x64xf32> to vector<64xf32>
    %88 = vector.shape_cast %87 : vector<64xf32> to vector<1x64xf32>
    %89 = vector.broadcast %88 : vector<1x64xf32> to vector<8x64xf32>
    %90 = arith.cmpf ole, %86, %89 : vector<8x64xf32>
    %cst_29 = arith.constant 8.000000e+00 : f32
    %91 = vector.broadcast %cst_29 : f32 to vector<8x64xf32>
    %92 = arith.select %90, %3, %91 : vector<8x64xi1>, vector<8x64xf32>
    %cst_30 = arith.constant dense<0x7F800000> : vector<64xf32>
    %93 = vector.multi_reduction <minimumf>, %92, %cst_30 [0] : vector<8x64xf32> to vector<64xf32>
    %94 = vector.shape_cast %93 : vector<64xf32> to vector<1x64xf32>
    %95 = vector.broadcast %94 : vector<1x64xf32> to vector<8x64xf32>
    %96 = arith.cmpf oeq, %3, %95 : vector<8x64xf32>
    %97 = arith.extui %96 : vector<8x64xi1> to vector<8x64xi32>
    %98 = arith.sitofp %97 : vector<8x64xi32> to vector<8x64xf32>
    %cst_31 = arith.constant dense<0.000000e+00> : vector<8xf32>
    %99 = vector.multi_reduction <add>, %98, %cst_31 [1] : vector<8x64xf32> to vector<8xf32>
    %100 = vector.shape_cast %99 : vector<8xf32> to vector<8x1xf32>
    %cst_32 = arith.constant dense<0.000000e+00> : vector<8x32xf32>
    %101 = tpu.matmul %98, %0, %cst_32 {dimension_numbers = #tpu.dot_dimension_numbers<[1], [0], [0], [1], [0, 0, 1, 1], [], []>} : vector<8x64xf32>, vector<64x32xf32>, vector<8x32xf32> -> vector<8x32xf32>
    %cst_33 = arith.constant 1.000000e+00 : f32
    %102 = vector.broadcast %cst_33 : f32 to vector<8x1xf32>
    %103 = arith.maximumf %100, %102 : vector<8x1xf32>
    %104 = tpu.reciprocal %103 {approx = true} : vector<8x1xf32> -> vector<8x1xf32>
    %cst_34 = arith.constant 5.000000e-01 : f32
    %105 = vector.broadcast %cst_34 : f32 to vector<8x1xf32>
    %106 = arith.cmpf ogt, %100, %105 : vector<8x1xf32>
    %107 = vector.broadcast %104 : vector<8x1xf32> to vector<8x32xf32>
    %108 = arith.mulf %101, %107 : vector<8x32xf32>
    %109 = vector.shape_cast %106 : vector<8x1xi1> to vector<8x1xi1>
    %110 = vector.broadcast %109 : vector<8x1xi1> to vector<8x32xi1>
    %111 = arith.select %110, %108, %76 : vector<8x32xi1>, vector<8x32xf32>
    %c3_i32 = arith.constant 3 : i32
    %112 = arith.mulf %111, %111 : vector<8x32xf32>
    %cst_35 = arith.constant dense<0.000000e+00> : vector<8xf32>
    %113 = vector.multi_reduction <add>, %112, %cst_35 [1] : vector<8x32xf32> to vector<8xf32>
    %114 = vector.shape_cast %113 : vector<8xf32> to vector<8x1xf32>
    %cst_36 = arith.constant dense<0.000000e+00> : vector<8x64xf32>
    %115 = tpu.matmul %111, %0, %cst_36 {dimension_numbers = #tpu.dot_dimension_numbers<[1], [1], [0], [0], [0, 0, 1, 0], [], []>} : vector<8x32xf32>, vector<64x32xf32>, vector<8x64xf32> -> vector<8x64xf32>
    %cst_37 = arith.constant 2.000000e+00 : f32
    %116 = vector.broadcast %cst_37 : f32 to vector<8x64xf32>
    %117 = arith.mulf %116, %115 : vector<8x64xf32>
    %118 = vector.broadcast %114 : vector<8x1xf32> to vector<8x64xf32>
    %119 = arith.subf %118, %117 : vector<8x64xf32>
    %cst_38 = arith.constant 1.000000e+30 : f32
    %120 = vector.broadcast %cst_38 : f32 to vector<8x64xf32>
    %121 = arith.select %5, %120, %119 : vector<8x64xi1>, vector<8x64xf32>
    %cst_39 = arith.constant dense<0x7F800000> : vector<64xf32>
    %122 = vector.multi_reduction <minimumf>, %121, %cst_39 [0] : vector<8x64xf32> to vector<64xf32>
    %123 = vector.shape_cast %122 : vector<64xf32> to vector<1x64xf32>
    %124 = vector.broadcast %123 : vector<1x64xf32> to vector<8x64xf32>
    %125 = arith.cmpf ole, %121, %124 : vector<8x64xf32>
    %cst_40 = arith.constant 8.000000e+00 : f32
    %126 = vector.broadcast %cst_40 : f32 to vector<8x64xf32>
    %127 = arith.select %125, %3, %126 : vector<8x64xi1>, vector<8x64xf32>
    %cst_41 = arith.constant dense<0x7F800000> : vector<64xf32>
    %128 = vector.multi_reduction <minimumf>, %127, %cst_41 [0] : vector<8x64xf32> to vector<64xf32>
    %129 = vector.shape_cast %128 : vector<64xf32> to vector<1x64xf32>
    %130 = vector.broadcast %129 : vector<1x64xf32> to vector<8x64xf32>
    %131 = arith.cmpf oeq, %3, %130 : vector<8x64xf32>
    %132 = arith.extui %131 : vector<8x64xi1> to vector<8x64xi32>
    %133 = arith.sitofp %132 : vector<8x64xi32> to vector<8x64xf32>
    %cst_42 = arith.constant dense<0.000000e+00> : vector<8xf32>
    %134 = vector.multi_reduction <add>, %133, %cst_42 [1] : vector<8x64xf32> to vector<8xf32>
    %135 = vector.shape_cast %134 : vector<8xf32> to vector<8x1xf32>
    %cst_43 = arith.constant dense<0.000000e+00> : vector<8x32xf32>
    %136 = tpu.matmul %133, %0, %cst_43 {dimension_numbers = #tpu.dot_dimension_numbers<[1], [0], [0], [1], [0, 0, 1, 1], [], []>} : vector<8x64xf32>, vector<64x32xf32>, vector<8x32xf32> -> vector<8x32xf32>
    %cst_44 = arith.constant 1.000000e+00 : f32
    %137 = vector.broadcast %cst_44 : f32 to vector<8x1xf32>
    %138 = arith.maximumf %135, %137 : vector<8x1xf32>
    %139 = tpu.reciprocal %138 {approx = true} : vector<8x1xf32> -> vector<8x1xf32>
    %cst_45 = arith.constant 5.000000e-01 : f32
    %140 = vector.broadcast %cst_45 : f32 to vector<8x1xf32>
    %141 = arith.cmpf ogt, %135, %140 : vector<8x1xf32>
    %142 = vector.broadcast %139 : vector<8x1xf32> to vector<8x32xf32>
    %143 = arith.mulf %136, %142 : vector<8x32xf32>
    %144 = vector.shape_cast %141 : vector<8x1xi1> to vector<8x1xi1>
    %145 = vector.broadcast %144 : vector<8x1xi1> to vector<8x32xi1>
    %146 = arith.select %145, %143, %111 : vector<8x32xi1>, vector<8x32xf32>
    %c4_i32 = arith.constant 4 : i32
    %147 = arith.mulf %146, %146 : vector<8x32xf32>
    %cst_46 = arith.constant dense<0.000000e+00> : vector<8xf32>
    %148 = vector.multi_reduction <add>, %147, %cst_46 [1] : vector<8x32xf32> to vector<8xf32>
    %149 = vector.shape_cast %148 : vector<8xf32> to vector<8x1xf32>
    %cst_47 = arith.constant dense<0.000000e+00> : vector<8x64xf32>
    %150 = tpu.matmul %146, %0, %cst_47 {dimension_numbers = #tpu.dot_dimension_numbers<[1], [1], [0], [0], [0, 0, 1, 0], [], []>} : vector<8x32xf32>, vector<64x32xf32>, vector<8x64xf32> -> vector<8x64xf32>
    %cst_48 = arith.constant 2.000000e+00 : f32
    %151 = vector.broadcast %cst_48 : f32 to vector<8x64xf32>
    %152 = arith.mulf %151, %150 : vector<8x64xf32>
    %153 = vector.broadcast %149 : vector<8x1xf32> to vector<8x64xf32>
    %154 = arith.subf %153, %152 : vector<8x64xf32>
    %cst_49 = arith.constant 1.000000e+30 : f32
    %155 = vector.broadcast %cst_49 : f32 to vector<8x64xf32>
    %156 = arith.select %5, %155, %154 : vector<8x64xi1>, vector<8x64xf32>
    %cst_50 = arith.constant dense<0x7F800000> : vector<64xf32>
    %157 = vector.multi_reduction <minimumf>, %156, %cst_50 [0] : vector<8x64xf32> to vector<64xf32>
    %158 = vector.shape_cast %157 : vector<64xf32> to vector<1x64xf32>
    %159 = vector.broadcast %158 : vector<1x64xf32> to vector<8x64xf32>
    %160 = arith.cmpf ole, %156, %159 : vector<8x64xf32>
    %cst_51 = arith.constant 8.000000e+00 : f32
    %161 = vector.broadcast %cst_51 : f32 to vector<8x64xf32>
    %162 = arith.select %160, %3, %161 : vector<8x64xi1>, vector<8x64xf32>
    %cst_52 = arith.constant dense<0x7F800000> : vector<64xf32>
    %163 = vector.multi_reduction <minimumf>, %162, %cst_52 [0] : vector<8x64xf32> to vector<64xf32>
    %164 = vector.shape_cast %163 : vector<64xf32> to vector<1x64xf32>
    %165 = vector.broadcast %164 : vector<1x64xf32> to vector<8x64xf32>
    %166 = arith.cmpf oeq, %3, %165 : vector<8x64xf32>
    %167 = arith.extui %166 : vector<8x64xi1> to vector<8x64xi32>
    %168 = arith.sitofp %167 : vector<8x64xi32> to vector<8x64xf32>
    %cst_53 = arith.constant dense<0.000000e+00> : vector<8xf32>
    %169 = vector.multi_reduction <add>, %168, %cst_53 [1] : vector<8x64xf32> to vector<8xf32>
    %170 = vector.shape_cast %169 : vector<8xf32> to vector<8x1xf32>
    %cst_54 = arith.constant dense<0.000000e+00> : vector<8x32xf32>
    %171 = tpu.matmul %168, %0, %cst_54 {dimension_numbers = #tpu.dot_dimension_numbers<[1], [0], [0], [1], [0, 0, 1, 1], [], []>} : vector<8x64xf32>, vector<64x32xf32>, vector<8x32xf32> -> vector<8x32xf32>
    %cst_55 = arith.constant 1.000000e+00 : f32
    %172 = vector.broadcast %cst_55 : f32 to vector<8x1xf32>
    %173 = arith.maximumf %170, %172 : vector<8x1xf32>
    %174 = tpu.reciprocal %173 {approx = true} : vector<8x1xf32> -> vector<8x1xf32>
    %cst_56 = arith.constant 5.000000e-01 : f32
    %175 = vector.broadcast %cst_56 : f32 to vector<8x1xf32>
    %176 = arith.cmpf ogt, %170, %175 : vector<8x1xf32>
    %177 = vector.broadcast %174 : vector<8x1xf32> to vector<8x32xf32>
    %178 = arith.mulf %171, %177 : vector<8x32xf32>
    %179 = vector.shape_cast %176 : vector<8x1xi1> to vector<8x1xi1>
    %180 = vector.broadcast %179 : vector<8x1xi1> to vector<8x32xi1>
    %181 = arith.select %180, %178, %146 : vector<8x32xi1>, vector<8x32xf32>
    %c5_i32_57 = arith.constant 5 : i32
    %182 = arith.mulf %181, %181 : vector<8x32xf32>
    %cst_58 = arith.constant dense<0.000000e+00> : vector<8xf32>
    %183 = vector.multi_reduction <add>, %182, %cst_58 [1] : vector<8x32xf32> to vector<8xf32>
    %184 = vector.shape_cast %183 : vector<8xf32> to vector<8x1xf32>
    %cst_59 = arith.constant dense<0.000000e+00> : vector<8x64xf32>
    %185 = tpu.matmul %181, %0, %cst_59 {dimension_numbers = #tpu.dot_dimension_numbers<[1], [1], [0], [0], [0, 0, 1, 0], [], []>} : vector<8x32xf32>, vector<64x32xf32>, vector<8x64xf32> -> vector<8x64xf32>
    %cst_60 = arith.constant 2.000000e+00 : f32
    %186 = vector.broadcast %cst_60 : f32 to vector<8x64xf32>
    %187 = arith.mulf %186, %185 : vector<8x64xf32>
    %188 = vector.broadcast %184 : vector<8x1xf32> to vector<8x64xf32>
    %189 = arith.subf %188, %187 : vector<8x64xf32>
    %cst_61 = arith.constant 1.000000e+30 : f32
    %190 = vector.broadcast %cst_61 : f32 to vector<8x64xf32>
    %191 = arith.select %5, %190, %189 : vector<8x64xi1>, vector<8x64xf32>
    %cst_62 = arith.constant dense<0x7F800000> : vector<64xf32>
    %192 = vector.multi_reduction <minimumf>, %191, %cst_62 [0] : vector<8x64xf32> to vector<64xf32>
    %193 = vector.shape_cast %192 : vector<64xf32> to vector<1x64xf32>
    %194 = vector.broadcast %193 : vector<1x64xf32> to vector<8x64xf32>
    %195 = arith.cmpf ole, %191, %194 : vector<8x64xf32>
    %cst_63 = arith.constant 8.000000e+00 : f32
    %196 = vector.broadcast %cst_63 : f32 to vector<8x64xf32>
    %197 = arith.select %195, %3, %196 : vector<8x64xi1>, vector<8x64xf32>
    %cst_64 = arith.constant dense<0x7F800000> : vector<64xf32>
    %198 = vector.multi_reduction <minimumf>, %197, %cst_64 [0] : vector<8x64xf32> to vector<64xf32>
    %199 = vector.shape_cast %198 : vector<64xf32> to vector<1x64xf32>
    %200 = vector.broadcast %199 : vector<1x64xf32> to vector<8x64xf32>
    %201 = arith.cmpf oeq, %3, %200 : vector<8x64xf32>
    %202 = arith.extui %201 : vector<8x64xi1> to vector<8x64xi32>
    %203 = arith.sitofp %202 : vector<8x64xi32> to vector<8x64xf32>
    %cst_65 = arith.constant dense<0.000000e+00> : vector<8xf32>
    %204 = vector.multi_reduction <add>, %203, %cst_65 [1] : vector<8x64xf32> to vector<8xf32>
    %205 = vector.shape_cast %204 : vector<8xf32> to vector<8x1xf32>
    %cst_66 = arith.constant dense<0.000000e+00> : vector<8x32xf32>
    %206 = tpu.matmul %203, %0, %cst_66 {dimension_numbers = #tpu.dot_dimension_numbers<[1], [0], [0], [1], [0, 0, 1, 1], [], []>} : vector<8x64xf32>, vector<64x32xf32>, vector<8x32xf32> -> vector<8x32xf32>
    %cst_67 = arith.constant 1.000000e+00 : f32
    %207 = vector.broadcast %cst_67 : f32 to vector<8x1xf32>
    %208 = arith.maximumf %205, %207 : vector<8x1xf32>
    %209 = tpu.reciprocal %208 {approx = true} : vector<8x1xf32> -> vector<8x1xf32>
    %cst_68 = arith.constant 5.000000e-01 : f32
    %210 = vector.broadcast %cst_68 : f32 to vector<8x1xf32>
    %211 = arith.cmpf ogt, %205, %210 : vector<8x1xf32>
    %212 = vector.broadcast %209 : vector<8x1xf32> to vector<8x32xf32>
    %213 = arith.mulf %206, %212 : vector<8x32xf32>
    %214 = vector.shape_cast %211 : vector<8x1xi1> to vector<8x1xi1>
    %215 = vector.broadcast %214 : vector<8x1xi1> to vector<8x32xi1>
    %216 = arith.select %215, %213, %181 : vector<8x32xi1>, vector<8x32xf32>
    %c6_i32 = arith.constant 6 : i32
    %217 = arith.mulf %216, %216 : vector<8x32xf32>
    %cst_69 = arith.constant dense<0.000000e+00> : vector<8xf32>
    %218 = vector.multi_reduction <add>, %217, %cst_69 [1] : vector<8x32xf32> to vector<8xf32>
    %219 = vector.shape_cast %218 : vector<8xf32> to vector<8x1xf32>
    %cst_70 = arith.constant dense<0.000000e+00> : vector<8x64xf32>
    %220 = tpu.matmul %216, %0, %cst_70 {dimension_numbers = #tpu.dot_dimension_numbers<[1], [1], [0], [0], [0, 0, 1, 0], [], []>} : vector<8x32xf32>, vector<64x32xf32>, vector<8x64xf32> -> vector<8x64xf32>
    %cst_71 = arith.constant 2.000000e+00 : f32
    %221 = vector.broadcast %cst_71 : f32 to vector<8x64xf32>
    %222 = arith.mulf %221, %220 : vector<8x64xf32>
    %223 = vector.broadcast %219 : vector<8x1xf32> to vector<8x64xf32>
    %224 = arith.subf %223, %222 : vector<8x64xf32>
    %cst_72 = arith.constant 1.000000e+30 : f32
    %225 = vector.broadcast %cst_72 : f32 to vector<8x64xf32>
    %226 = arith.select %5, %225, %224 : vector<8x64xi1>, vector<8x64xf32>
    %cst_73 = arith.constant dense<0x7F800000> : vector<64xf32>
    %227 = vector.multi_reduction <minimumf>, %226, %cst_73 [0] : vector<8x64xf32> to vector<64xf32>
    %228 = vector.shape_cast %227 : vector<64xf32> to vector<1x64xf32>
    %229 = vector.broadcast %228 : vector<1x64xf32> to vector<8x64xf32>
    %230 = arith.cmpf ole, %226, %229 : vector<8x64xf32>
    %cst_74 = arith.constant 8.000000e+00 : f32
    %231 = vector.broadcast %cst_74 : f32 to vector<8x64xf32>
    %232 = arith.select %230, %3, %231 : vector<8x64xi1>, vector<8x64xf32>
    %cst_75 = arith.constant dense<0x7F800000> : vector<64xf32>
    %233 = vector.multi_reduction <minimumf>, %232, %cst_75 [0] : vector<8x64xf32> to vector<64xf32>
    %234 = vector.shape_cast %233 : vector<64xf32> to vector<1x64xf32>
    %235 = vector.broadcast %234 : vector<1x64xf32> to vector<8x64xf32>
    %236 = arith.cmpf oeq, %3, %235 : vector<8x64xf32>
    %237 = arith.extui %236 : vector<8x64xi1> to vector<8x64xi32>
    %238 = arith.sitofp %237 : vector<8x64xi32> to vector<8x64xf32>
    %cst_76 = arith.constant dense<0.000000e+00> : vector<8xf32>
    %239 = vector.multi_reduction <add>, %238, %cst_76 [1] : vector<8x64xf32> to vector<8xf32>
    %240 = vector.shape_cast %239 : vector<8xf32> to vector<8x1xf32>
    %cst_77 = arith.constant dense<0.000000e+00> : vector<8x32xf32>
    %241 = tpu.matmul %238, %0, %cst_77 {dimension_numbers = #tpu.dot_dimension_numbers<[1], [0], [0], [1], [0, 0, 1, 1], [], []>} : vector<8x64xf32>, vector<64x32xf32>, vector<8x32xf32> -> vector<8x32xf32>
    %cst_78 = arith.constant 1.000000e+00 : f32
    %242 = vector.broadcast %cst_78 : f32 to vector<8x1xf32>
    %243 = arith.maximumf %240, %242 : vector<8x1xf32>
    %244 = tpu.reciprocal %243 {approx = true} : vector<8x1xf32> -> vector<8x1xf32>
    %cst_79 = arith.constant 5.000000e-01 : f32
    %245 = vector.broadcast %cst_79 : f32 to vector<8x1xf32>
    %246 = arith.cmpf ogt, %240, %245 : vector<8x1xf32>
    %247 = vector.broadcast %244 : vector<8x1xf32> to vector<8x32xf32>
    %248 = arith.mulf %241, %247 : vector<8x32xf32>
    %249 = vector.shape_cast %246 : vector<8x1xi1> to vector<8x1xi1>
    %250 = vector.broadcast %249 : vector<8x1xi1> to vector<8x32xi1>
    %251 = arith.select %250, %248, %216 : vector<8x32xi1>, vector<8x32xf32>
    %c7_i32 = arith.constant 7 : i32
    %252 = arith.mulf %251, %251 : vector<8x32xf32>
    %cst_80 = arith.constant dense<0.000000e+00> : vector<8xf32>
    %253 = vector.multi_reduction <add>, %252, %cst_80 [1] : vector<8x32xf32> to vector<8xf32>
    %254 = vector.shape_cast %253 : vector<8xf32> to vector<8x1xf32>
    %cst_81 = arith.constant dense<0.000000e+00> : vector<8x64xf32>
    %255 = tpu.matmul %251, %0, %cst_81 {dimension_numbers = #tpu.dot_dimension_numbers<[1], [1], [0], [0], [0, 0, 1, 0], [], []>} : vector<8x32xf32>, vector<64x32xf32>, vector<8x64xf32> -> vector<8x64xf32>
    %cst_82 = arith.constant 2.000000e+00 : f32
    %256 = vector.broadcast %cst_82 : f32 to vector<8x64xf32>
    %257 = arith.mulf %256, %255 : vector<8x64xf32>
    %258 = vector.broadcast %254 : vector<8x1xf32> to vector<8x64xf32>
    %259 = arith.subf %258, %257 : vector<8x64xf32>
    %cst_83 = arith.constant 1.000000e+30 : f32
    %260 = vector.broadcast %cst_83 : f32 to vector<8x64xf32>
    %261 = arith.select %5, %260, %259 : vector<8x64xi1>, vector<8x64xf32>
    %cst_84 = arith.constant dense<0x7F800000> : vector<64xf32>
    %262 = vector.multi_reduction <minimumf>, %261, %cst_84 [0] : vector<8x64xf32> to vector<64xf32>
    %263 = vector.shape_cast %262 : vector<64xf32> to vector<1x64xf32>
    %264 = vector.broadcast %263 : vector<1x64xf32> to vector<8x64xf32>
    %265 = arith.cmpf ole, %261, %264 : vector<8x64xf32>
    %cst_85 = arith.constant 8.000000e+00 : f32
    %266 = vector.broadcast %cst_85 : f32 to vector<8x64xf32>
    %267 = arith.select %265, %3, %266 : vector<8x64xi1>, vector<8x64xf32>
    %cst_86 = arith.constant dense<0x7F800000> : vector<64xf32>
    %268 = vector.multi_reduction <minimumf>, %267, %cst_86 [0] : vector<8x64xf32> to vector<64xf32>
    %269 = vector.shape_cast %268 : vector<64xf32> to vector<1x64xf32>
    %270 = vector.broadcast %269 : vector<1x64xf32> to vector<8x64xf32>
    %271 = arith.cmpf oeq, %3, %270 : vector<8x64xf32>
    %272 = arith.extui %271 : vector<8x64xi1> to vector<8x64xi32>
    %273 = arith.sitofp %272 : vector<8x64xi32> to vector<8x64xf32>
    %cst_87 = arith.constant dense<0.000000e+00> : vector<8xf32>
    %274 = vector.multi_reduction <add>, %273, %cst_87 [1] : vector<8x64xf32> to vector<8xf32>
    %275 = vector.shape_cast %274 : vector<8xf32> to vector<8x1xf32>
    %cst_88 = arith.constant dense<0.000000e+00> : vector<8x32xf32>
    %276 = tpu.matmul %273, %0, %cst_88 {dimension_numbers = #tpu.dot_dimension_numbers<[1], [0], [0], [1], [0, 0, 1, 1], [], []>} : vector<8x64xf32>, vector<64x32xf32>, vector<8x32xf32> -> vector<8x32xf32>
    %cst_89 = arith.constant 1.000000e+00 : f32
    %277 = vector.broadcast %cst_89 : f32 to vector<8x1xf32>
    %278 = arith.maximumf %275, %277 : vector<8x1xf32>
    %279 = tpu.reciprocal %278 {approx = true} : vector<8x1xf32> -> vector<8x1xf32>
    %cst_90 = arith.constant 5.000000e-01 : f32
    %280 = vector.broadcast %cst_90 : f32 to vector<8x1xf32>
    %281 = arith.cmpf ogt, %275, %280 : vector<8x1xf32>
    %282 = vector.broadcast %279 : vector<8x1xf32> to vector<8x32xf32>
    %283 = arith.mulf %276, %282 : vector<8x32xf32>
    %284 = vector.shape_cast %281 : vector<8x1xi1> to vector<8x1xi1>
    %285 = vector.broadcast %284 : vector<8x1xi1> to vector<8x32xi1>
    %286 = arith.select %285, %283, %251 : vector<8x32xi1>, vector<8x32xf32>
    %c8_i32 = arith.constant 8 : i32
    %287 = arith.mulf %286, %286 : vector<8x32xf32>
    %cst_91 = arith.constant dense<0.000000e+00> : vector<8xf32>
    %288 = vector.multi_reduction <add>, %287, %cst_91 [1] : vector<8x32xf32> to vector<8xf32>
    %289 = vector.shape_cast %288 : vector<8xf32> to vector<8x1xf32>
    %cst_92 = arith.constant dense<0.000000e+00> : vector<8x64xf32>
    %290 = tpu.matmul %286, %0, %cst_92 {dimension_numbers = #tpu.dot_dimension_numbers<[1], [1], [0], [0], [0, 0, 1, 0], [], []>} : vector<8x32xf32>, vector<64x32xf32>, vector<8x64xf32> -> vector<8x64xf32>
    %cst_93 = arith.constant 2.000000e+00 : f32
    %291 = vector.broadcast %cst_93 : f32 to vector<8x64xf32>
    %292 = arith.mulf %291, %290 : vector<8x64xf32>
    %293 = vector.broadcast %289 : vector<8x1xf32> to vector<8x64xf32>
    %294 = arith.subf %293, %292 : vector<8x64xf32>
    %cst_94 = arith.constant 1.000000e+30 : f32
    %295 = vector.broadcast %cst_94 : f32 to vector<8x64xf32>
    %296 = arith.select %5, %295, %294 : vector<8x64xi1>, vector<8x64xf32>
    %cst_95 = arith.constant dense<0x7F800000> : vector<64xf32>
    %297 = vector.multi_reduction <minimumf>, %296, %cst_95 [0] : vector<8x64xf32> to vector<64xf32>
    %298 = vector.shape_cast %297 : vector<64xf32> to vector<1x64xf32>
    %299 = vector.broadcast %298 : vector<1x64xf32> to vector<8x64xf32>
    %300 = arith.cmpf ole, %296, %299 : vector<8x64xf32>
    %cst_96 = arith.constant 8.000000e+00 : f32
    %301 = vector.broadcast %cst_96 : f32 to vector<8x64xf32>
    %302 = arith.select %300, %3, %301 : vector<8x64xi1>, vector<8x64xf32>
    %cst_97 = arith.constant dense<0x7F800000> : vector<64xf32>
    %303 = vector.multi_reduction <minimumf>, %302, %cst_97 [0] : vector<8x64xf32> to vector<64xf32>
    %304 = vector.shape_cast %303 : vector<64xf32> to vector<1x64xf32>
    %305 = vector.broadcast %304 : vector<1x64xf32> to vector<8x64xf32>
    %306 = arith.cmpf oeq, %3, %305 : vector<8x64xf32>
    %307 = arith.extui %306 : vector<8x64xi1> to vector<8x64xi32>
    %308 = arith.sitofp %307 : vector<8x64xi32> to vector<8x64xf32>
    %cst_98 = arith.constant dense<0.000000e+00> : vector<8xf32>
    %309 = vector.multi_reduction <add>, %308, %cst_98 [1] : vector<8x64xf32> to vector<8xf32>
    %310 = vector.shape_cast %309 : vector<8xf32> to vector<8x1xf32>
    %cst_99 = arith.constant dense<0.000000e+00> : vector<8x32xf32>
    %311 = tpu.matmul %308, %0, %cst_99 {dimension_numbers = #tpu.dot_dimension_numbers<[1], [0], [0], [1], [0, 0, 1, 1], [], []>} : vector<8x64xf32>, vector<64x32xf32>, vector<8x32xf32> -> vector<8x32xf32>
    %cst_100 = arith.constant 1.000000e+00 : f32
    %312 = vector.broadcast %cst_100 : f32 to vector<8x1xf32>
    %313 = arith.maximumf %310, %312 : vector<8x1xf32>
    %314 = tpu.reciprocal %313 {approx = true} : vector<8x1xf32> -> vector<8x1xf32>
    %cst_101 = arith.constant 5.000000e-01 : f32
    %315 = vector.broadcast %cst_101 : f32 to vector<8x1xf32>
    %316 = arith.cmpf ogt, %310, %315 : vector<8x1xf32>
    %317 = vector.broadcast %314 : vector<8x1xf32> to vector<8x32xf32>
    %318 = arith.mulf %311, %317 : vector<8x32xf32>
    %319 = vector.shape_cast %316 : vector<8x1xi1> to vector<8x1xi1>
    %320 = vector.broadcast %319 : vector<8x1xi1> to vector<8x32xi1>
    %321 = arith.select %320, %318, %286 : vector<8x32xi1>, vector<8x32xf32>
    %c9_i32 = arith.constant 9 : i32
    %322 = arith.mulf %321, %321 : vector<8x32xf32>
    %cst_102 = arith.constant dense<0.000000e+00> : vector<8xf32>
    %323 = vector.multi_reduction <add>, %322, %cst_102 [1] : vector<8x32xf32> to vector<8xf32>
    %324 = vector.shape_cast %323 : vector<8xf32> to vector<8x1xf32>
    %cst_103 = arith.constant dense<0.000000e+00> : vector<8x64xf32>
    %325 = tpu.matmul %321, %0, %cst_103 {dimension_numbers = #tpu.dot_dimension_numbers<[1], [1], [0], [0], [0, 0, 1, 0], [], []>} : vector<8x32xf32>, vector<64x32xf32>, vector<8x64xf32> -> vector<8x64xf32>
    %cst_104 = arith.constant 2.000000e+00 : f32
    %326 = vector.broadcast %cst_104 : f32 to vector<8x64xf32>
    %327 = arith.mulf %326, %325 : vector<8x64xf32>
    %328 = vector.broadcast %324 : vector<8x1xf32> to vector<8x64xf32>
    %329 = arith.subf %328, %327 : vector<8x64xf32>
    %cst_105 = arith.constant 1.000000e+30 : f32
    %330 = vector.broadcast %cst_105 : f32 to vector<8x64xf32>
    %331 = arith.select %5, %330, %329 : vector<8x64xi1>, vector<8x64xf32>
    %cst_106 = arith.constant dense<0x7F800000> : vector<64xf32>
    %332 = vector.multi_reduction <minimumf>, %331, %cst_106 [0] : vector<8x64xf32> to vector<64xf32>
    %333 = vector.shape_cast %332 : vector<64xf32> to vector<1x64xf32>
    %334 = vector.broadcast %333 : vector<1x64xf32> to vector<8x64xf32>
    %335 = arith.cmpf ole, %331, %334 : vector<8x64xf32>
    %cst_107 = arith.constant 8.000000e+00 : f32
    %336 = vector.broadcast %cst_107 : f32 to vector<8x64xf32>
    %337 = arith.select %335, %3, %336 : vector<8x64xi1>, vector<8x64xf32>
    %cst_108 = arith.constant dense<0x7F800000> : vector<64xf32>
    %338 = vector.multi_reduction <minimumf>, %337, %cst_108 [0] : vector<8x64xf32> to vector<64xf32>
    %339 = vector.shape_cast %338 : vector<64xf32> to vector<1x64xf32>
    %340 = vector.broadcast %339 : vector<1x64xf32> to vector<8x64xf32>
    %341 = arith.cmpf oeq, %3, %340 : vector<8x64xf32>
    %342 = arith.extui %341 : vector<8x64xi1> to vector<8x64xi32>
    %343 = arith.sitofp %342 : vector<8x64xi32> to vector<8x64xf32>
    %cst_109 = arith.constant dense<0.000000e+00> : vector<8xf32>
    %344 = vector.multi_reduction <add>, %343, %cst_109 [1] : vector<8x64xf32> to vector<8xf32>
    %345 = vector.shape_cast %344 : vector<8xf32> to vector<8x1xf32>
    %cst_110 = arith.constant dense<0.000000e+00> : vector<8x32xf32>
    %346 = tpu.matmul %343, %0, %cst_110 {dimension_numbers = #tpu.dot_dimension_numbers<[1], [0], [0], [1], [0, 0, 1, 1], [], []>} : vector<8x64xf32>, vector<64x32xf32>, vector<8x32xf32> -> vector<8x32xf32>
    %cst_111 = arith.constant 1.000000e+00 : f32
    %347 = vector.broadcast %cst_111 : f32 to vector<8x1xf32>
    %348 = arith.maximumf %345, %347 : vector<8x1xf32>
    %349 = tpu.reciprocal %348 {approx = true} : vector<8x1xf32> -> vector<8x1xf32>
    %cst_112 = arith.constant 5.000000e-01 : f32
    %350 = vector.broadcast %cst_112 : f32 to vector<8x1xf32>
    %351 = arith.cmpf ogt, %345, %350 : vector<8x1xf32>
    %352 = vector.broadcast %349 : vector<8x1xf32> to vector<8x32xf32>
    %353 = arith.mulf %346, %352 : vector<8x32xf32>
    %354 = vector.shape_cast %351 : vector<8x1xi1> to vector<8x1xi1>
    %355 = vector.broadcast %354 : vector<8x1xi1> to vector<8x32xi1>
    %356 = arith.select %355, %353, %321 : vector<8x32xi1>, vector<8x32xf32>
    %c10_i32 = arith.constant 10 : i32
    %357 = arith.mulf %356, %356 : vector<8x32xf32>
    %cst_113 = arith.constant dense<0.000000e+00> : vector<8xf32>
    %358 = vector.multi_reduction <add>, %357, %cst_113 [1] : vector<8x32xf32> to vector<8xf32>
    %359 = vector.shape_cast %358 : vector<8xf32> to vector<8x1xf32>
    %cst_114 = arith.constant dense<0.000000e+00> : vector<8x64xf32>
    %360 = tpu.matmul %356, %0, %cst_114 {dimension_numbers = #tpu.dot_dimension_numbers<[1], [1], [0], [0], [0, 0, 1, 0], [], []>} : vector<8x32xf32>, vector<64x32xf32>, vector<8x64xf32> -> vector<8x64xf32>
    %cst_115 = arith.constant 2.000000e+00 : f32
    %361 = vector.broadcast %cst_115 : f32 to vector<8x64xf32>
    %362 = arith.mulf %361, %360 : vector<8x64xf32>
    %363 = vector.broadcast %359 : vector<8x1xf32> to vector<8x64xf32>
    %364 = arith.subf %363, %362 : vector<8x64xf32>
    %cst_116 = arith.constant 1.000000e+30 : f32
    %365 = vector.broadcast %cst_116 : f32 to vector<8x64xf32>
    %366 = arith.select %5, %365, %364 : vector<8x64xi1>, vector<8x64xf32>
    %cst_117 = arith.constant dense<0x7F800000> : vector<64xf32>
    %367 = vector.multi_reduction <minimumf>, %366, %cst_117 [0] : vector<8x64xf32> to vector<64xf32>
    %368 = vector.shape_cast %367 : vector<64xf32> to vector<1x64xf32>
    %369 = vector.broadcast %368 : vector<1x64xf32> to vector<8x64xf32>
    %370 = arith.cmpf ole, %366, %369 : vector<8x64xf32>
    %cst_118 = arith.constant 8.000000e+00 : f32
    %371 = vector.broadcast %cst_118 : f32 to vector<8x64xf32>
    %372 = arith.select %370, %3, %371 : vector<8x64xi1>, vector<8x64xf32>
    %cst_119 = arith.constant dense<0x7F800000> : vector<64xf32>
    %373 = vector.multi_reduction <minimumf>, %372, %cst_119 [0] : vector<8x64xf32> to vector<64xf32>
    %374 = vector.shape_cast %373 : vector<64xf32> to vector<1x64xf32>
    %375 = vector.broadcast %374 : vector<1x64xf32> to vector<8x64xf32>
    %376 = arith.cmpf oeq, %3, %375 : vector<8x64xf32>
    %377 = arith.extui %376 : vector<8x64xi1> to vector<8x64xi32>
    %378 = arith.sitofp %377 : vector<8x64xi32> to vector<8x64xf32>
    %cst_120 = arith.constant dense<0.000000e+00> : vector<8xf32>
    %379 = vector.multi_reduction <add>, %378, %cst_120 [1] : vector<8x64xf32> to vector<8xf32>
    %380 = vector.shape_cast %379 : vector<8xf32> to vector<8x1xf32>
    %cst_121 = arith.constant dense<0.000000e+00> : vector<8x32xf32>
    %381 = tpu.matmul %378, %0, %cst_121 {dimension_numbers = #tpu.dot_dimension_numbers<[1], [0], [0], [1], [0, 0, 1, 1], [], []>} : vector<8x64xf32>, vector<64x32xf32>, vector<8x32xf32> -> vector<8x32xf32>
    %cst_122 = arith.constant 1.000000e+00 : f32
    %382 = vector.broadcast %cst_122 : f32 to vector<8x1xf32>
    %383 = arith.maximumf %380, %382 : vector<8x1xf32>
    %384 = tpu.reciprocal %383 {approx = true} : vector<8x1xf32> -> vector<8x1xf32>
    %cst_123 = arith.constant 5.000000e-01 : f32
    %385 = vector.broadcast %cst_123 : f32 to vector<8x1xf32>
    %386 = arith.cmpf ogt, %380, %385 : vector<8x1xf32>
    %387 = vector.broadcast %384 : vector<8x1xf32> to vector<8x32xf32>
    %388 = arith.mulf %381, %387 : vector<8x32xf32>
    %389 = vector.shape_cast %386 : vector<8x1xi1> to vector<8x1xi1>
    %390 = vector.broadcast %389 : vector<8x1xi1> to vector<8x32xi1>
    %391 = arith.select %390, %388, %356 : vector<8x32xi1>, vector<8x32xf32>
    %c11_i32 = arith.constant 11 : i32
    %392 = arith.mulf %391, %391 : vector<8x32xf32>
    %cst_124 = arith.constant dense<0.000000e+00> : vector<8xf32>
    %393 = vector.multi_reduction <add>, %392, %cst_124 [1] : vector<8x32xf32> to vector<8xf32>
    %394 = vector.shape_cast %393 : vector<8xf32> to vector<8x1xf32>
    %cst_125 = arith.constant dense<0.000000e+00> : vector<8x64xf32>
    %395 = tpu.matmul %391, %0, %cst_125 {dimension_numbers = #tpu.dot_dimension_numbers<[1], [1], [0], [0], [0, 0, 1, 0], [], []>} : vector<8x32xf32>, vector<64x32xf32>, vector<8x64xf32> -> vector<8x64xf32>
    %cst_126 = arith.constant 2.000000e+00 : f32
    %396 = vector.broadcast %cst_126 : f32 to vector<8x64xf32>
    %397 = arith.mulf %396, %395 : vector<8x64xf32>
    %398 = vector.broadcast %394 : vector<8x1xf32> to vector<8x64xf32>
    %399 = arith.subf %398, %397 : vector<8x64xf32>
    %cst_127 = arith.constant 1.000000e+30 : f32
    %400 = vector.broadcast %cst_127 : f32 to vector<8x64xf32>
    %401 = arith.select %5, %400, %399 : vector<8x64xi1>, vector<8x64xf32>
    %cst_128 = arith.constant dense<0x7F800000> : vector<64xf32>
    %402 = vector.multi_reduction <minimumf>, %401, %cst_128 [0] : vector<8x64xf32> to vector<64xf32>
    %403 = vector.shape_cast %402 : vector<64xf32> to vector<1x64xf32>
    %404 = vector.broadcast %403 : vector<1x64xf32> to vector<8x64xf32>
    %405 = arith.cmpf ole, %401, %404 : vector<8x64xf32>
    %cst_129 = arith.constant 8.000000e+00 : f32
    %406 = vector.broadcast %cst_129 : f32 to vector<8x64xf32>
    %407 = arith.select %405, %3, %406 : vector<8x64xi1>, vector<8x64xf32>
    %cst_130 = arith.constant dense<0x7F800000> : vector<64xf32>
    %408 = vector.multi_reduction <minimumf>, %407, %cst_130 [0] : vector<8x64xf32> to vector<64xf32>
    %409 = vector.shape_cast %408 : vector<64xf32> to vector<1x64xf32>
    %410 = vector.broadcast %409 : vector<1x64xf32> to vector<8x64xf32>
    %411 = arith.cmpf oeq, %3, %410 : vector<8x64xf32>
    %412 = arith.extui %411 : vector<8x64xi1> to vector<8x64xi32>
    %413 = arith.sitofp %412 : vector<8x64xi32> to vector<8x64xf32>
    %cst_131 = arith.constant dense<0.000000e+00> : vector<8xf32>
    %414 = vector.multi_reduction <add>, %413, %cst_131 [1] : vector<8x64xf32> to vector<8xf32>
    %415 = vector.shape_cast %414 : vector<8xf32> to vector<8x1xf32>
    %cst_132 = arith.constant dense<0.000000e+00> : vector<8x32xf32>
    %416 = tpu.matmul %413, %0, %cst_132 {dimension_numbers = #tpu.dot_dimension_numbers<[1], [0], [0], [1], [0, 0, 1, 1], [], []>} : vector<8x64xf32>, vector<64x32xf32>, vector<8x32xf32> -> vector<8x32xf32>
    %cst_133 = arith.constant 1.000000e+00 : f32
    %417 = vector.broadcast %cst_133 : f32 to vector<8x1xf32>
    %418 = arith.maximumf %415, %417 : vector<8x1xf32>
    %419 = tpu.reciprocal %418 {approx = true} : vector<8x1xf32> -> vector<8x1xf32>
    %cst_134 = arith.constant 5.000000e-01 : f32
    %420 = vector.broadcast %cst_134 : f32 to vector<8x1xf32>
    %421 = arith.cmpf ogt, %415, %420 : vector<8x1xf32>
    %422 = vector.broadcast %419 : vector<8x1xf32> to vector<8x32xf32>
    %423 = arith.mulf %416, %422 : vector<8x32xf32>
    %424 = vector.shape_cast %421 : vector<8x1xi1> to vector<8x1xi1>
    %425 = vector.broadcast %424 : vector<8x1xi1> to vector<8x32xi1>
    %426 = arith.select %425, %423, %391 : vector<8x32xi1>, vector<8x32xf32>
    %c12_i32 = arith.constant 12 : i32
    %427 = arith.mulf %426, %426 : vector<8x32xf32>
    %cst_135 = arith.constant dense<0.000000e+00> : vector<8xf32>
    %428 = vector.multi_reduction <add>, %427, %cst_135 [1] : vector<8x32xf32> to vector<8xf32>
    %429 = vector.shape_cast %428 : vector<8xf32> to vector<8x1xf32>
    %cst_136 = arith.constant dense<0.000000e+00> : vector<8x64xf32>
    %430 = tpu.matmul %426, %0, %cst_136 {dimension_numbers = #tpu.dot_dimension_numbers<[1], [1], [0], [0], [0, 0, 1, 0], [], []>} : vector<8x32xf32>, vector<64x32xf32>, vector<8x64xf32> -> vector<8x64xf32>
    %cst_137 = arith.constant 2.000000e+00 : f32
    %431 = vector.broadcast %cst_137 : f32 to vector<8x64xf32>
    %432 = arith.mulf %431, %430 : vector<8x64xf32>
    %433 = vector.broadcast %429 : vector<8x1xf32> to vector<8x64xf32>
    %434 = arith.subf %433, %432 : vector<8x64xf32>
    %cst_138 = arith.constant 1.000000e+30 : f32
    %435 = vector.broadcast %cst_138 : f32 to vector<8x64xf32>
    %436 = arith.select %5, %435, %434 : vector<8x64xi1>, vector<8x64xf32>
    %cst_139 = arith.constant dense<0x7F800000> : vector<64xf32>
    %437 = vector.multi_reduction <minimumf>, %436, %cst_139 [0] : vector<8x64xf32> to vector<64xf32>
    %438 = vector.shape_cast %437 : vector<64xf32> to vector<1x64xf32>
    %439 = vector.broadcast %438 : vector<1x64xf32> to vector<8x64xf32>
    %440 = arith.cmpf ole, %436, %439 : vector<8x64xf32>
    %cst_140 = arith.constant 8.000000e+00 : f32
    %441 = vector.broadcast %cst_140 : f32 to vector<8x64xf32>
    %442 = arith.select %440, %3, %441 : vector<8x64xi1>, vector<8x64xf32>
    %cst_141 = arith.constant dense<0x7F800000> : vector<64xf32>
    %443 = vector.multi_reduction <minimumf>, %442, %cst_141 [0] : vector<8x64xf32> to vector<64xf32>
    %444 = vector.shape_cast %443 : vector<64xf32> to vector<1x64xf32>
    %445 = vector.broadcast %444 : vector<1x64xf32> to vector<8x64xf32>
    %446 = arith.cmpf oeq, %3, %445 : vector<8x64xf32>
    %447 = arith.extui %446 : vector<8x64xi1> to vector<8x64xi32>
    %448 = arith.sitofp %447 : vector<8x64xi32> to vector<8x64xf32>
    %cst_142 = arith.constant dense<0.000000e+00> : vector<8xf32>
    %449 = vector.multi_reduction <add>, %448, %cst_142 [1] : vector<8x64xf32> to vector<8xf32>
    %450 = vector.shape_cast %449 : vector<8xf32> to vector<8x1xf32>
    %cst_143 = arith.constant dense<0.000000e+00> : vector<8x32xf32>
    %451 = tpu.matmul %448, %0, %cst_143 {dimension_numbers = #tpu.dot_dimension_numbers<[1], [0], [0], [1], [0, 0, 1, 1], [], []>} : vector<8x64xf32>, vector<64x32xf32>, vector<8x32xf32> -> vector<8x32xf32>
    %cst_144 = arith.constant 1.000000e+00 : f32
    %452 = vector.broadcast %cst_144 : f32 to vector<8x1xf32>
    %453 = arith.maximumf %450, %452 : vector<8x1xf32>
    %454 = tpu.reciprocal %453 {approx = true} : vector<8x1xf32> -> vector<8x1xf32>
    %cst_145 = arith.constant 5.000000e-01 : f32
    %455 = vector.broadcast %cst_145 : f32 to vector<8x1xf32>
    %456 = arith.cmpf ogt, %450, %455 : vector<8x1xf32>
    %457 = vector.broadcast %454 : vector<8x1xf32> to vector<8x32xf32>
    %458 = arith.mulf %451, %457 : vector<8x32xf32>
    %459 = vector.shape_cast %456 : vector<8x1xi1> to vector<8x1xi1>
    %460 = vector.broadcast %459 : vector<8x1xi1> to vector<8x32xi1>
    %461 = arith.select %460, %458, %426 : vector<8x32xi1>, vector<8x32xf32>
    %c13_i32 = arith.constant 13 : i32
    %462 = arith.mulf %461, %461 : vector<8x32xf32>
    %cst_146 = arith.constant dense<0.000000e+00> : vector<8xf32>
    %463 = vector.multi_reduction <add>, %462, %cst_146 [1] : vector<8x32xf32> to vector<8xf32>
    %464 = vector.shape_cast %463 : vector<8xf32> to vector<8x1xf32>
    %cst_147 = arith.constant dense<0.000000e+00> : vector<8x64xf32>
    %465 = tpu.matmul %461, %0, %cst_147 {dimension_numbers = #tpu.dot_dimension_numbers<[1], [1], [0], [0], [0, 0, 1, 0], [], []>} : vector<8x32xf32>, vector<64x32xf32>, vector<8x64xf32> -> vector<8x64xf32>
    %cst_148 = arith.constant 2.000000e+00 : f32
    %466 = vector.broadcast %cst_148 : f32 to vector<8x64xf32>
    %467 = arith.mulf %466, %465 : vector<8x64xf32>
    %468 = vector.broadcast %464 : vector<8x1xf32> to vector<8x64xf32>
    %469 = arith.subf %468, %467 : vector<8x64xf32>
    %cst_149 = arith.constant 1.000000e+30 : f32
    %470 = vector.broadcast %cst_149 : f32 to vector<8x64xf32>
    %471 = arith.select %5, %470, %469 : vector<8x64xi1>, vector<8x64xf32>
    %cst_150 = arith.constant dense<0x7F800000> : vector<64xf32>
    %472 = vector.multi_reduction <minimumf>, %471, %cst_150 [0] : vector<8x64xf32> to vector<64xf32>
    %473 = vector.shape_cast %472 : vector<64xf32> to vector<1x64xf32>
    %474 = vector.broadcast %473 : vector<1x64xf32> to vector<8x64xf32>
    %475 = arith.cmpf ole, %471, %474 : vector<8x64xf32>
    %cst_151 = arith.constant 8.000000e+00 : f32
    %476 = vector.broadcast %cst_151 : f32 to vector<8x64xf32>
    %477 = arith.select %475, %3, %476 : vector<8x64xi1>, vector<8x64xf32>
    %cst_152 = arith.constant dense<0x7F800000> : vector<64xf32>
    %478 = vector.multi_reduction <minimumf>, %477, %cst_152 [0] : vector<8x64xf32> to vector<64xf32>
    %479 = vector.shape_cast %478 : vector<64xf32> to vector<1x64xf32>
    %480 = vector.broadcast %479 : vector<1x64xf32> to vector<8x64xf32>
    %481 = arith.cmpf oeq, %3, %480 : vector<8x64xf32>
    %482 = arith.extui %481 : vector<8x64xi1> to vector<8x64xi32>
    %483 = arith.sitofp %482 : vector<8x64xi32> to vector<8x64xf32>
    %cst_153 = arith.constant dense<0.000000e+00> : vector<8xf32>
    %484 = vector.multi_reduction <add>, %483, %cst_153 [1] : vector<8x64xf32> to vector<8xf32>
    %485 = vector.shape_cast %484 : vector<8xf32> to vector<8x1xf32>
    %cst_154 = arith.constant dense<0.000000e+00> : vector<8x32xf32>
    %486 = tpu.matmul %483, %0, %cst_154 {dimension_numbers = #tpu.dot_dimension_numbers<[1], [0], [0], [1], [0, 0, 1, 1], [], []>} : vector<8x64xf32>, vector<64x32xf32>, vector<8x32xf32> -> vector<8x32xf32>
    %cst_155 = arith.constant 1.000000e+00 : f32
    %487 = vector.broadcast %cst_155 : f32 to vector<8x1xf32>
    %488 = arith.maximumf %485, %487 : vector<8x1xf32>
    %489 = tpu.reciprocal %488 {approx = true} : vector<8x1xf32> -> vector<8x1xf32>
    %cst_156 = arith.constant 5.000000e-01 : f32
    %490 = vector.broadcast %cst_156 : f32 to vector<8x1xf32>
    %491 = arith.cmpf ogt, %485, %490 : vector<8x1xf32>
    %492 = vector.broadcast %489 : vector<8x1xf32> to vector<8x32xf32>
    %493 = arith.mulf %486, %492 : vector<8x32xf32>
    %494 = vector.shape_cast %491 : vector<8x1xi1> to vector<8x1xi1>
    %495 = vector.broadcast %494 : vector<8x1xi1> to vector<8x32xi1>
    %496 = arith.select %495, %493, %461 : vector<8x32xi1>, vector<8x32xf32>
    %c14_i32 = arith.constant 14 : i32
    %497 = arith.mulf %496, %496 : vector<8x32xf32>
    %cst_157 = arith.constant dense<0.000000e+00> : vector<8xf32>
    %498 = vector.multi_reduction <add>, %497, %cst_157 [1] : vector<8x32xf32> to vector<8xf32>
    %499 = vector.shape_cast %498 : vector<8xf32> to vector<8x1xf32>
    %cst_158 = arith.constant dense<0.000000e+00> : vector<8x64xf32>
    %500 = tpu.matmul %496, %0, %cst_158 {dimension_numbers = #tpu.dot_dimension_numbers<[1], [1], [0], [0], [0, 0, 1, 0], [], []>} : vector<8x32xf32>, vector<64x32xf32>, vector<8x64xf32> -> vector<8x64xf32>
    %cst_159 = arith.constant 2.000000e+00 : f32
    %501 = vector.broadcast %cst_159 : f32 to vector<8x64xf32>
    %502 = arith.mulf %501, %500 : vector<8x64xf32>
    %503 = vector.broadcast %499 : vector<8x1xf32> to vector<8x64xf32>
    %504 = arith.subf %503, %502 : vector<8x64xf32>
    %cst_160 = arith.constant 1.000000e+30 : f32
    %505 = vector.broadcast %cst_160 : f32 to vector<8x64xf32>
    %506 = arith.select %5, %505, %504 : vector<8x64xi1>, vector<8x64xf32>
    %cst_161 = arith.constant dense<0x7F800000> : vector<64xf32>
    %507 = vector.multi_reduction <minimumf>, %506, %cst_161 [0] : vector<8x64xf32> to vector<64xf32>
    %508 = vector.shape_cast %507 : vector<64xf32> to vector<1x64xf32>
    %509 = vector.broadcast %508 : vector<1x64xf32> to vector<8x64xf32>
    %510 = arith.cmpf ole, %506, %509 : vector<8x64xf32>
    %cst_162 = arith.constant 8.000000e+00 : f32
    %511 = vector.broadcast %cst_162 : f32 to vector<8x64xf32>
    %512 = arith.select %510, %3, %511 : vector<8x64xi1>, vector<8x64xf32>
    %cst_163 = arith.constant dense<0x7F800000> : vector<64xf32>
    %513 = vector.multi_reduction <minimumf>, %512, %cst_163 [0] : vector<8x64xf32> to vector<64xf32>
    %514 = vector.shape_cast %513 : vector<64xf32> to vector<1x64xf32>
    %515 = vector.broadcast %514 : vector<1x64xf32> to vector<8x64xf32>
    %516 = arith.cmpf oeq, %3, %515 : vector<8x64xf32>
    %517 = arith.extui %516 : vector<8x64xi1> to vector<8x64xi32>
    %518 = arith.sitofp %517 : vector<8x64xi32> to vector<8x64xf32>
    %cst_164 = arith.constant dense<0.000000e+00> : vector<8xf32>
    %519 = vector.multi_reduction <add>, %518, %cst_164 [1] : vector<8x64xf32> to vector<8xf32>
    %520 = vector.shape_cast %519 : vector<8xf32> to vector<8x1xf32>
    %cst_165 = arith.constant dense<0.000000e+00> : vector<8x32xf32>
    %521 = tpu.matmul %518, %0, %cst_165 {dimension_numbers = #tpu.dot_dimension_numbers<[1], [0], [0], [1], [0, 0, 1, 1], [], []>} : vector<8x64xf32>, vector<64x32xf32>, vector<8x32xf32> -> vector<8x32xf32>
    %cst_166 = arith.constant 1.000000e+00 : f32
    %522 = vector.broadcast %cst_166 : f32 to vector<8x1xf32>
    %523 = arith.maximumf %520, %522 : vector<8x1xf32>
    %524 = tpu.reciprocal %523 {approx = true} : vector<8x1xf32> -> vector<8x1xf32>
    %cst_167 = arith.constant 5.000000e-01 : f32
    %525 = vector.broadcast %cst_167 : f32 to vector<8x1xf32>
    %526 = arith.cmpf ogt, %520, %525 : vector<8x1xf32>
    %527 = vector.broadcast %524 : vector<8x1xf32> to vector<8x32xf32>
    %528 = arith.mulf %521, %527 : vector<8x32xf32>
    %529 = vector.shape_cast %526 : vector<8x1xi1> to vector<8x1xi1>
    %530 = vector.broadcast %529 : vector<8x1xi1> to vector<8x32xi1>
    %531 = arith.select %530, %528, %496 : vector<8x32xi1>, vector<8x32xf32>
    %c15_i32 = arith.constant 15 : i32
    %532 = arith.mulf %531, %531 : vector<8x32xf32>
    %cst_168 = arith.constant dense<0.000000e+00> : vector<8xf32>
    %533 = vector.multi_reduction <add>, %532, %cst_168 [1] : vector<8x32xf32> to vector<8xf32>
    %534 = vector.shape_cast %533 : vector<8xf32> to vector<8x1xf32>
    %cst_169 = arith.constant dense<0.000000e+00> : vector<8x64xf32>
    %535 = tpu.matmul %531, %0, %cst_169 {dimension_numbers = #tpu.dot_dimension_numbers<[1], [1], [0], [0], [0, 0, 1, 0], [], []>} : vector<8x32xf32>, vector<64x32xf32>, vector<8x64xf32> -> vector<8x64xf32>
    %cst_170 = arith.constant 2.000000e+00 : f32
    %536 = vector.broadcast %cst_170 : f32 to vector<8x64xf32>
    %537 = arith.mulf %536, %535 : vector<8x64xf32>
    %538 = vector.broadcast %534 : vector<8x1xf32> to vector<8x64xf32>
    %539 = arith.subf %538, %537 : vector<8x64xf32>
    %cst_171 = arith.constant 1.000000e+30 : f32
    %540 = vector.broadcast %cst_171 : f32 to vector<8x64xf32>
    %541 = arith.select %5, %540, %539 : vector<8x64xi1>, vector<8x64xf32>
    %cst_172 = arith.constant dense<0x7F800000> : vector<64xf32>
    %542 = vector.multi_reduction <minimumf>, %541, %cst_172 [0] : vector<8x64xf32> to vector<64xf32>
    %543 = vector.shape_cast %542 : vector<64xf32> to vector<1x64xf32>
    %544 = vector.broadcast %543 : vector<1x64xf32> to vector<8x64xf32>
    %545 = arith.cmpf ole, %541, %544 : vector<8x64xf32>
    %cst_173 = arith.constant 8.000000e+00 : f32
    %546 = vector.broadcast %cst_173 : f32 to vector<8x64xf32>
    %547 = arith.select %545, %3, %546 : vector<8x64xi1>, vector<8x64xf32>
    %cst_174 = arith.constant dense<0x7F800000> : vector<64xf32>
    %548 = vector.multi_reduction <minimumf>, %547, %cst_174 [0] : vector<8x64xf32> to vector<64xf32>
    %549 = vector.shape_cast %548 : vector<64xf32> to vector<1x64xf32>
    %550 = vector.broadcast %549 : vector<1x64xf32> to vector<8x64xf32>
    %551 = arith.cmpf oeq, %3, %550 : vector<8x64xf32>
    %552 = arith.extui %551 : vector<8x64xi1> to vector<8x64xi32>
    %553 = arith.sitofp %552 : vector<8x64xi32> to vector<8x64xf32>
    %cst_175 = arith.constant dense<0.000000e+00> : vector<8xf32>
    %554 = vector.multi_reduction <add>, %553, %cst_175 [1] : vector<8x64xf32> to vector<8xf32>
    %555 = vector.shape_cast %554 : vector<8xf32> to vector<8x1xf32>
    %cst_176 = arith.constant dense<0.000000e+00> : vector<8x32xf32>
    %556 = tpu.matmul %553, %0, %cst_176 {dimension_numbers = #tpu.dot_dimension_numbers<[1], [0], [0], [1], [0, 0, 1, 1], [], []>} : vector<8x64xf32>, vector<64x32xf32>, vector<8x32xf32> -> vector<8x32xf32>
    %cst_177 = arith.constant 1.000000e+00 : f32
    %557 = vector.broadcast %cst_177 : f32 to vector<8x1xf32>
    %558 = arith.maximumf %555, %557 : vector<8x1xf32>
    %559 = tpu.reciprocal %558 {approx = true} : vector<8x1xf32> -> vector<8x1xf32>
    %cst_178 = arith.constant 5.000000e-01 : f32
    %560 = vector.broadcast %cst_178 : f32 to vector<8x1xf32>
    %561 = arith.cmpf ogt, %555, %560 : vector<8x1xf32>
    %562 = vector.broadcast %559 : vector<8x1xf32> to vector<8x32xf32>
    %563 = arith.mulf %556, %562 : vector<8x32xf32>
    %564 = vector.shape_cast %561 : vector<8x1xi1> to vector<8x1xi1>
    %565 = vector.broadcast %564 : vector<8x1xi1> to vector<8x32xi1>
    %566 = arith.select %565, %563, %531 : vector<8x32xi1>, vector<8x32xf32>
    %c16_i32 = arith.constant 16 : i32
    %567 = arith.mulf %566, %566 : vector<8x32xf32>
    %cst_179 = arith.constant dense<0.000000e+00> : vector<8xf32>
    %568 = vector.multi_reduction <add>, %567, %cst_179 [1] : vector<8x32xf32> to vector<8xf32>
    %569 = vector.shape_cast %568 : vector<8xf32> to vector<8x1xf32>
    %cst_180 = arith.constant dense<0.000000e+00> : vector<8x64xf32>
    %570 = tpu.matmul %566, %0, %cst_180 {dimension_numbers = #tpu.dot_dimension_numbers<[1], [1], [0], [0], [0, 0, 1, 0], [], []>} : vector<8x32xf32>, vector<64x32xf32>, vector<8x64xf32> -> vector<8x64xf32>
    %cst_181 = arith.constant 2.000000e+00 : f32
    %571 = vector.broadcast %cst_181 : f32 to vector<8x64xf32>
    %572 = arith.mulf %571, %570 : vector<8x64xf32>
    %573 = vector.broadcast %569 : vector<8x1xf32> to vector<8x64xf32>
    %574 = arith.subf %573, %572 : vector<8x64xf32>
    %cst_182 = arith.constant 1.000000e+30 : f32
    %575 = vector.broadcast %cst_182 : f32 to vector<8x64xf32>
    %576 = arith.select %5, %575, %574 : vector<8x64xi1>, vector<8x64xf32>
    %cst_183 = arith.constant dense<0x7F800000> : vector<64xf32>
    %577 = vector.multi_reduction <minimumf>, %576, %cst_183 [0] : vector<8x64xf32> to vector<64xf32>
    %578 = vector.shape_cast %577 : vector<64xf32> to vector<1x64xf32>
    %579 = vector.broadcast %578 : vector<1x64xf32> to vector<8x64xf32>
    %580 = arith.cmpf ole, %576, %579 : vector<8x64xf32>
    %cst_184 = arith.constant 8.000000e+00 : f32
    %581 = vector.broadcast %cst_184 : f32 to vector<8x64xf32>
    %582 = arith.select %580, %3, %581 : vector<8x64xi1>, vector<8x64xf32>
    %cst_185 = arith.constant dense<0x7F800000> : vector<64xf32>
    %583 = vector.multi_reduction <minimumf>, %582, %cst_185 [0] : vector<8x64xf32> to vector<64xf32>
    %584 = vector.shape_cast %583 : vector<64xf32> to vector<1x64xf32>
    %585 = vector.broadcast %584 : vector<1x64xf32> to vector<8x64xf32>
    %586 = arith.cmpf oeq, %3, %585 : vector<8x64xf32>
    %587 = arith.extui %586 : vector<8x64xi1> to vector<8x64xi32>
    %588 = arith.sitofp %587 : vector<8x64xi32> to vector<8x64xf32>
    %cst_186 = arith.constant dense<0.000000e+00> : vector<8xf32>
    %589 = vector.multi_reduction <add>, %588, %cst_186 [1] : vector<8x64xf32> to vector<8xf32>
    %590 = vector.shape_cast %589 : vector<8xf32> to vector<8x1xf32>
    %cst_187 = arith.constant dense<0.000000e+00> : vector<8x32xf32>
    %591 = tpu.matmul %588, %0, %cst_187 {dimension_numbers = #tpu.dot_dimension_numbers<[1], [0], [0], [1], [0, 0, 1, 1], [], []>} : vector<8x64xf32>, vector<64x32xf32>, vector<8x32xf32> -> vector<8x32xf32>
    %cst_188 = arith.constant 1.000000e+00 : f32
    %592 = vector.broadcast %cst_188 : f32 to vector<8x1xf32>
    %593 = arith.maximumf %590, %592 : vector<8x1xf32>
    %594 = tpu.reciprocal %593 {approx = true} : vector<8x1xf32> -> vector<8x1xf32>
    %cst_189 = arith.constant 5.000000e-01 : f32
    %595 = vector.broadcast %cst_189 : f32 to vector<8x1xf32>
    %596 = arith.cmpf ogt, %590, %595 : vector<8x1xf32>
    %597 = vector.broadcast %594 : vector<8x1xf32> to vector<8x32xf32>
    %598 = arith.mulf %591, %597 : vector<8x32xf32>
    %599 = vector.shape_cast %596 : vector<8x1xi1> to vector<8x1xi1>
    %600 = vector.broadcast %599 : vector<8x1xi1> to vector<8x32xi1>
    %601 = arith.select %600, %598, %566 : vector<8x32xi1>, vector<8x32xf32>
    %c17_i32 = arith.constant 17 : i32
    %602 = arith.mulf %601, %601 : vector<8x32xf32>
    %cst_190 = arith.constant dense<0.000000e+00> : vector<8xf32>
    %603 = vector.multi_reduction <add>, %602, %cst_190 [1] : vector<8x32xf32> to vector<8xf32>
    %604 = vector.shape_cast %603 : vector<8xf32> to vector<8x1xf32>
    %cst_191 = arith.constant dense<0.000000e+00> : vector<8x64xf32>
    %605 = tpu.matmul %601, %0, %cst_191 {dimension_numbers = #tpu.dot_dimension_numbers<[1], [1], [0], [0], [0, 0, 1, 0], [], []>} : vector<8x32xf32>, vector<64x32xf32>, vector<8x64xf32> -> vector<8x64xf32>
    %cst_192 = arith.constant 2.000000e+00 : f32
    %606 = vector.broadcast %cst_192 : f32 to vector<8x64xf32>
    %607 = arith.mulf %606, %605 : vector<8x64xf32>
    %608 = vector.broadcast %604 : vector<8x1xf32> to vector<8x64xf32>
    %609 = arith.subf %608, %607 : vector<8x64xf32>
    %cst_193 = arith.constant 1.000000e+30 : f32
    %610 = vector.broadcast %cst_193 : f32 to vector<8x64xf32>
    %611 = arith.select %5, %610, %609 : vector<8x64xi1>, vector<8x64xf32>
    %cst_194 = arith.constant dense<0x7F800000> : vector<64xf32>
    %612 = vector.multi_reduction <minimumf>, %611, %cst_194 [0] : vector<8x64xf32> to vector<64xf32>
    %613 = vector.shape_cast %612 : vector<64xf32> to vector<1x64xf32>
    %614 = vector.broadcast %613 : vector<1x64xf32> to vector<8x64xf32>
    %615 = arith.cmpf ole, %611, %614 : vector<8x64xf32>
    %cst_195 = arith.constant 8.000000e+00 : f32
    %616 = vector.broadcast %cst_195 : f32 to vector<8x64xf32>
    %617 = arith.select %615, %3, %616 : vector<8x64xi1>, vector<8x64xf32>
    %cst_196 = arith.constant dense<0x7F800000> : vector<64xf32>
    %618 = vector.multi_reduction <minimumf>, %617, %cst_196 [0] : vector<8x64xf32> to vector<64xf32>
    %619 = vector.shape_cast %618 : vector<64xf32> to vector<1x64xf32>
    %620 = vector.broadcast %619 : vector<1x64xf32> to vector<8x64xf32>
    %621 = arith.cmpf oeq, %3, %620 : vector<8x64xf32>
    %622 = arith.extui %621 : vector<8x64xi1> to vector<8x64xi32>
    %623 = arith.sitofp %622 : vector<8x64xi32> to vector<8x64xf32>
    %cst_197 = arith.constant dense<0.000000e+00> : vector<8xf32>
    %624 = vector.multi_reduction <add>, %623, %cst_197 [1] : vector<8x64xf32> to vector<8xf32>
    %625 = vector.shape_cast %624 : vector<8xf32> to vector<8x1xf32>
    %cst_198 = arith.constant dense<0.000000e+00> : vector<8x32xf32>
    %626 = tpu.matmul %623, %0, %cst_198 {dimension_numbers = #tpu.dot_dimension_numbers<[1], [0], [0], [1], [0, 0, 1, 1], [], []>} : vector<8x64xf32>, vector<64x32xf32>, vector<8x32xf32> -> vector<8x32xf32>
    %cst_199 = arith.constant 1.000000e+00 : f32
    %627 = vector.broadcast %cst_199 : f32 to vector<8x1xf32>
    %628 = arith.maximumf %625, %627 : vector<8x1xf32>
    %629 = tpu.reciprocal %628 {approx = true} : vector<8x1xf32> -> vector<8x1xf32>
    %cst_200 = arith.constant 5.000000e-01 : f32
    %630 = vector.broadcast %cst_200 : f32 to vector<8x1xf32>
    %631 = arith.cmpf ogt, %625, %630 : vector<8x1xf32>
    %632 = vector.broadcast %629 : vector<8x1xf32> to vector<8x32xf32>
    %633 = arith.mulf %626, %632 : vector<8x32xf32>
    %634 = vector.shape_cast %631 : vector<8x1xi1> to vector<8x1xi1>
    %635 = vector.broadcast %634 : vector<8x1xi1> to vector<8x32xi1>
    %636 = arith.select %635, %633, %601 : vector<8x32xi1>, vector<8x32xf32>
    %c18_i32 = arith.constant 18 : i32
    %637 = arith.mulf %636, %636 : vector<8x32xf32>
    %cst_201 = arith.constant dense<0.000000e+00> : vector<8xf32>
    %638 = vector.multi_reduction <add>, %637, %cst_201 [1] : vector<8x32xf32> to vector<8xf32>
    %639 = vector.shape_cast %638 : vector<8xf32> to vector<8x1xf32>
    %cst_202 = arith.constant dense<0.000000e+00> : vector<8x64xf32>
    %640 = tpu.matmul %636, %0, %cst_202 {dimension_numbers = #tpu.dot_dimension_numbers<[1], [1], [0], [0], [0, 0, 1, 0], [], []>} : vector<8x32xf32>, vector<64x32xf32>, vector<8x64xf32> -> vector<8x64xf32>
    %cst_203 = arith.constant 2.000000e+00 : f32
    %641 = vector.broadcast %cst_203 : f32 to vector<8x64xf32>
    %642 = arith.mulf %641, %640 : vector<8x64xf32>
    %643 = vector.broadcast %639 : vector<8x1xf32> to vector<8x64xf32>
    %644 = arith.subf %643, %642 : vector<8x64xf32>
    %cst_204 = arith.constant 1.000000e+30 : f32
    %645 = vector.broadcast %cst_204 : f32 to vector<8x64xf32>
    %646 = arith.select %5, %645, %644 : vector<8x64xi1>, vector<8x64xf32>
    %cst_205 = arith.constant dense<0x7F800000> : vector<64xf32>
    %647 = vector.multi_reduction <minimumf>, %646, %cst_205 [0] : vector<8x64xf32> to vector<64xf32>
    %648 = vector.shape_cast %647 : vector<64xf32> to vector<1x64xf32>
    %649 = vector.broadcast %648 : vector<1x64xf32> to vector<8x64xf32>
    %650 = arith.cmpf ole, %646, %649 : vector<8x64xf32>
    %cst_206 = arith.constant 8.000000e+00 : f32
    %651 = vector.broadcast %cst_206 : f32 to vector<8x64xf32>
    %652 = arith.select %650, %3, %651 : vector<8x64xi1>, vector<8x64xf32>
    %cst_207 = arith.constant dense<0x7F800000> : vector<64xf32>
    %653 = vector.multi_reduction <minimumf>, %652, %cst_207 [0] : vector<8x64xf32> to vector<64xf32>
    %654 = vector.shape_cast %653 : vector<64xf32> to vector<1x64xf32>
    %655 = vector.broadcast %654 : vector<1x64xf32> to vector<8x64xf32>
    %656 = arith.cmpf oeq, %3, %655 : vector<8x64xf32>
    %657 = arith.extui %656 : vector<8x64xi1> to vector<8x64xi32>
    %658 = arith.sitofp %657 : vector<8x64xi32> to vector<8x64xf32>
    %cst_208 = arith.constant dense<0.000000e+00> : vector<8xf32>
    %659 = vector.multi_reduction <add>, %658, %cst_208 [1] : vector<8x64xf32> to vector<8xf32>
    %660 = vector.shape_cast %659 : vector<8xf32> to vector<8x1xf32>
    %cst_209 = arith.constant dense<0.000000e+00> : vector<8x32xf32>
    %661 = tpu.matmul %658, %0, %cst_209 {dimension_numbers = #tpu.dot_dimension_numbers<[1], [0], [0], [1], [0, 0, 1, 1], [], []>} : vector<8x64xf32>, vector<64x32xf32>, vector<8x32xf32> -> vector<8x32xf32>
    %cst_210 = arith.constant 1.000000e+00 : f32
    %662 = vector.broadcast %cst_210 : f32 to vector<8x1xf32>
    %663 = arith.maximumf %660, %662 : vector<8x1xf32>
    %664 = tpu.reciprocal %663 {approx = true} : vector<8x1xf32> -> vector<8x1xf32>
    %cst_211 = arith.constant 5.000000e-01 : f32
    %665 = vector.broadcast %cst_211 : f32 to vector<8x1xf32>
    %666 = arith.cmpf ogt, %660, %665 : vector<8x1xf32>
    %667 = vector.broadcast %664 : vector<8x1xf32> to vector<8x32xf32>
    %668 = arith.mulf %661, %667 : vector<8x32xf32>
    %669 = vector.shape_cast %666 : vector<8x1xi1> to vector<8x1xi1>
    %670 = vector.broadcast %669 : vector<8x1xi1> to vector<8x32xi1>
    %671 = arith.select %670, %668, %636 : vector<8x32xi1>, vector<8x32xf32>
    %c19_i32 = arith.constant 19 : i32
    %672 = arith.mulf %671, %671 : vector<8x32xf32>
    %cst_212 = arith.constant dense<0.000000e+00> : vector<8xf32>
    %673 = vector.multi_reduction <add>, %672, %cst_212 [1] : vector<8x32xf32> to vector<8xf32>
    %674 = vector.shape_cast %673 : vector<8xf32> to vector<8x1xf32>
    %cst_213 = arith.constant dense<0.000000e+00> : vector<8x64xf32>
    %675 = tpu.matmul %671, %0, %cst_213 {dimension_numbers = #tpu.dot_dimension_numbers<[1], [1], [0], [0], [0, 0, 1, 0], [], []>} : vector<8x32xf32>, vector<64x32xf32>, vector<8x64xf32> -> vector<8x64xf32>
    %cst_214 = arith.constant 2.000000e+00 : f32
    %676 = vector.broadcast %cst_214 : f32 to vector<8x64xf32>
    %677 = arith.mulf %676, %675 : vector<8x64xf32>
    %678 = vector.broadcast %674 : vector<8x1xf32> to vector<8x64xf32>
    %679 = arith.subf %678, %677 : vector<8x64xf32>
    %cst_215 = arith.constant 1.000000e+30 : f32
    %680 = vector.broadcast %cst_215 : f32 to vector<8x64xf32>
    %681 = arith.select %5, %680, %679 : vector<8x64xi1>, vector<8x64xf32>
    %cst_216 = arith.constant dense<0x7F800000> : vector<64xf32>
    %682 = vector.multi_reduction <minimumf>, %681, %cst_216 [0] : vector<8x64xf32> to vector<64xf32>
    %683 = vector.shape_cast %682 : vector<64xf32> to vector<1x64xf32>
    %684 = vector.broadcast %683 : vector<1x64xf32> to vector<8x64xf32>
    %685 = arith.cmpf ole, %681, %684 : vector<8x64xf32>
    %cst_217 = arith.constant 8.000000e+00 : f32
    %686 = vector.broadcast %cst_217 : f32 to vector<8x64xf32>
    %687 = arith.select %685, %3, %686 : vector<8x64xi1>, vector<8x64xf32>
    %cst_218 = arith.constant dense<0x7F800000> : vector<64xf32>
    %688 = vector.multi_reduction <minimumf>, %687, %cst_218 [0] : vector<8x64xf32> to vector<64xf32>
    %689 = vector.shape_cast %688 : vector<64xf32> to vector<1x64xf32>
    %690 = vector.broadcast %689 : vector<1x64xf32> to vector<8x64xf32>
    %691 = arith.cmpf oeq, %3, %690 : vector<8x64xf32>
    %692 = arith.extui %691 : vector<8x64xi1> to vector<8x64xi32>
    %693 = arith.sitofp %692 : vector<8x64xi32> to vector<8x64xf32>
    %cst_219 = arith.constant dense<0.000000e+00> : vector<8xf32>
    %694 = vector.multi_reduction <add>, %693, %cst_219 [1] : vector<8x64xf32> to vector<8xf32>
    %695 = vector.shape_cast %694 : vector<8xf32> to vector<8x1xf32>
    %cst_220 = arith.constant dense<0.000000e+00> : vector<8x32xf32>
    %696 = tpu.matmul %693, %0, %cst_220 {dimension_numbers = #tpu.dot_dimension_numbers<[1], [0], [0], [1], [0, 0, 1, 1], [], []>} : vector<8x64xf32>, vector<64x32xf32>, vector<8x32xf32> -> vector<8x32xf32>
    %cst_221 = arith.constant 1.000000e+00 : f32
    %697 = vector.broadcast %cst_221 : f32 to vector<8x1xf32>
    %698 = arith.maximumf %695, %697 : vector<8x1xf32>
    %699 = tpu.reciprocal %698 {approx = true} : vector<8x1xf32> -> vector<8x1xf32>
    %cst_222 = arith.constant 5.000000e-01 : f32
    %700 = vector.broadcast %cst_222 : f32 to vector<8x1xf32>
    %701 = arith.cmpf ogt, %695, %700 : vector<8x1xf32>
    %702 = vector.broadcast %699 : vector<8x1xf32> to vector<8x32xf32>
    %703 = arith.mulf %696, %702 : vector<8x32xf32>
    %704 = vector.shape_cast %701 : vector<8x1xi1> to vector<8x1xi1>
    %705 = vector.broadcast %704 : vector<8x1xi1> to vector<8x32xi1>
    %706 = arith.select %705, %703, %671 : vector<8x32xi1>, vector<8x32xf32>
    %707 = arith.mulf %706, %706 : vector<8x32xf32>
    %cst_223 = arith.constant dense<0.000000e+00> : vector<8xf32>
    %708 = vector.multi_reduction <add>, %707, %cst_223 [1] : vector<8x32xf32> to vector<8xf32>
    %709 = vector.shape_cast %708 : vector<8xf32> to vector<8x1xf32>
    %cst_224 = arith.constant dense<0.000000e+00> : vector<8x64xf32>
    %710 = tpu.matmul %706, %0, %cst_224 {dimension_numbers = #tpu.dot_dimension_numbers<[1], [1], [0], [0], [0, 0, 1, 0], [], []>} : vector<8x32xf32>, vector<64x32xf32>, vector<8x64xf32> -> vector<8x64xf32>
    %cst_225 = arith.constant 2.000000e+00 : f32
    %711 = vector.broadcast %cst_225 : f32 to vector<8x64xf32>
    %712 = arith.mulf %711, %710 : vector<8x64xf32>
    %713 = vector.broadcast %709 : vector<8x1xf32> to vector<8x64xf32>
    %714 = arith.subf %713, %712 : vector<8x64xf32>
    %cst_226 = arith.constant 1.000000e+30 : f32
    %715 = vector.broadcast %cst_226 : f32 to vector<8x64xf32>
    %716 = arith.select %5, %715, %714 : vector<8x64xi1>, vector<8x64xf32>
    %cst_227 = arith.constant dense<0x7F800000> : vector<64xf32>
    %717 = vector.multi_reduction <minimumf>, %716, %cst_227 [0] : vector<8x64xf32> to vector<64xf32>
    %718 = vector.shape_cast %717 : vector<64xf32> to vector<1x64xf32>
    %719 = vector.broadcast %718 : vector<1x64xf32> to vector<8x64xf32>
    %720 = arith.cmpf ole, %716, %719 : vector<8x64xf32>
    %cst_228 = arith.constant 8.000000e+00 : f32
    %721 = vector.broadcast %cst_228 : f32 to vector<8x64xf32>
    %722 = arith.select %720, %3, %721 : vector<8x64xi1>, vector<8x64xf32>
    %cst_229 = arith.constant dense<0x7F800000> : vector<64xf32>
    %723 = vector.multi_reduction <minimumf>, %722, %cst_229 [0] : vector<8x64xf32> to vector<64xf32>
    %724 = vector.shape_cast %723 : vector<64xf32> to vector<1x64xf32>
    %725 = vector.broadcast %724 : vector<1x64xf32> to vector<8x64xf32>
    %726 = arith.cmpf oeq, %3, %725 : vector<8x64xf32>
    %727 = arith.extui %726 : vector<8x64xi1> to vector<8x64xi32>
    %728 = arith.sitofp %727 : vector<8x64xi32> to vector<8x64xf32>
    %cst_230 = arith.constant dense<0.000000e+00> : vector<8xf32>
    %729 = vector.multi_reduction <add>, %728, %cst_230 [1] : vector<8x64xf32> to vector<8xf32>
    %730 = vector.shape_cast %729 : vector<8xf32> to vector<8x1xf32>
    %731 = arith.mulf %1, %1 : vector<64x32xf32>
    %cst_231 = arith.constant dense<0.000000e+00> : vector<64xf32>
    %732 = vector.multi_reduction <add>, %731, %cst_231 [1] : vector<64x32xf32> to vector<64xf32>
    %733 = vector.shape_cast %732 : vector<64xf32> to vector<64x1xf32>
    %734 = tpu.transpose %733, [1, 0] : vector<64x1xf32> -> vector<1x64xf32>
    %735 = vector.broadcast %733 : vector<64x1xf32> to vector<64x64xf32>
    %736 = vector.broadcast %734 : vector<1x64xf32> to vector<64x64xf32>
    %737 = arith.addf %735, %736 : vector<64x64xf32>
    %cst_232 = arith.constant dense<0.000000e+00> : vector<64x64xf32>
    %738 = tpu.matmul %1, %1, %cst_232 {dimension_numbers = #tpu.dot_dimension_numbers<[1], [1], [0], [0], [0, 0, 1, 0], [], []>} : vector<64x32xf32>, vector<64x32xf32>, vector<64x64xf32> -> vector<64x64xf32>
    %cst_233 = arith.constant 2.000000e+00 : f32
    %739 = vector.broadcast %cst_233 : f32 to vector<64x64xf32>
    %740 = arith.mulf %739, %738 : vector<64x64xf32>
    %741 = arith.subf %737, %740 : vector<64x64xf32>
    %cst_234 = arith.constant 0.000000e+00 : f32
    %742 = vector.broadcast %cst_234 : f32 to vector<64x64xf32>
    %743 = arith.maximumf %741, %742 : vector<64x64xf32>
    %744 = math.sqrt %743 : vector<64x64xf32>
    %745 = tpu.iota {dimensions = array<i32: 0>} : vector<64x64xi32>
    %746 = tpu.iota {dimensions = array<i32: 1>} : vector<64x64xi32>
    %747 = arith.cmpi eq, %745, %746 : vector<64x64xi32>
    %cst_235 = arith.constant 0.000000e+00 : f32
    %748 = vector.broadcast %cst_235 : f32 to vector<64x64xf32>
    %749 = arith.select %747, %748, %744 : vector<64x64xi1>, vector<64x64xf32>
    %cst_236 = arith.constant dense<0.000000e+00> : vector<8x64xf32>
    %750 = tpu.matmul %728, %749, %cst_236 {dimension_numbers = #tpu.dot_dimension_numbers<[1], [0], [0], [1], [0, 0, 1, 1], [], []>} : vector<8x64xf32>, vector<64x64xf32>, vector<8x64xf32> -> vector<8x64xf32>
    %751 = vector.broadcast %730 : vector<8x1xf32> to vector<8x64xf32>
    %752 = arith.mulf %751, %728 : vector<8x64xf32>
    %cst_237 = arith.constant dense<0.000000e+00> : vector<64xf32>
    %753 = vector.multi_reduction <add>, %752, %cst_237 [0] : vector<8x64xf32> to vector<64xf32>
    %754 = vector.shape_cast %753 : vector<64xf32> to vector<1x64xf32>
    %755 = arith.mulf %750, %728 : vector<8x64xf32>
    %cst_238 = arith.constant dense<0.000000e+00> : vector<64xf32>
    %756 = vector.multi_reduction <add>, %755, %cst_238 [0] : vector<8x64xf32> to vector<64xf32>
    %757 = vector.shape_cast %756 : vector<64xf32> to vector<1x64xf32>
    %cst_239 = arith.constant 1.000000e+00 : f32
    %758 = vector.broadcast %cst_239 : f32 to vector<1x64xf32>
    %759 = arith.subf %754, %758 : vector<1x64xf32>
    %cst_240 = arith.constant 1.000000e+00 : f32
    %760 = vector.broadcast %cst_240 : f32 to vector<1x64xf32>
    %761 = arith.maximumf %759, %760 : vector<1x64xf32>
    %762 = tpu.reciprocal %761 {approx = true} : vector<1x64xf32> -> vector<1x64xf32>
    %763 = arith.mulf %757, %762 : vector<1x64xf32>
    %cst_241 = arith.constant 1.000000e+00 : f32
    %764 = vector.broadcast %cst_241 : f32 to vector<8x1xf32>
    %765 = arith.maximumf %730, %764 : vector<8x1xf32>
    %766 = tpu.reciprocal %765 {approx = true} : vector<8x1xf32> -> vector<8x1xf32>
    %767 = vector.broadcast %766 : vector<8x1xf32> to vector<8x64xf32>
    %768 = arith.mulf %750, %767 : vector<8x64xf32>
    %cst_242 = arith.constant 5.000000e-01 : f32
    %769 = vector.broadcast %cst_242 : f32 to vector<8x64xf32>
    %770 = arith.cmpf ogt, %728, %769 : vector<8x64xf32>
    %cst_243 = arith.constant 5.000000e-01 : f32
    %771 = vector.broadcast %cst_243 : f32 to vector<8x1xf32>
    %772 = arith.cmpf olt, %730, %771 : vector<8x1xf32>
    %773 = vector.broadcast %772 : vector<8x1xi1> to vector<8x64xi1>
    %774 = arith.ori %770, %773 : vector<8x64xi1>
    %cst_244 = arith.constant 1.000000e+30 : f32
    %775 = vector.broadcast %cst_244 : f32 to vector<8x64xf32>
    %776 = arith.select %774, %775, %768 : vector<8x64xi1>, vector<8x64xf32>
    %cst_245 = arith.constant dense<0x7F800000> : vector<64xf32>
    %777 = vector.multi_reduction <minimumf>, %776, %cst_245 [0] : vector<8x64xf32> to vector<64xf32>
    %778 = vector.shape_cast %777 : vector<64xf32> to vector<1x64xf32>
    %779 = arith.subf %778, %763 : vector<1x64xf32>
    %780 = arith.maximumf %763, %778 : vector<1x64xf32>
    %cst_246 = arith.constant 9.99999996E-13 : f32
    %781 = vector.broadcast %cst_246 : f32 to vector<1x64xf32>
    %782 = arith.maximumf %780, %781 : vector<1x64xf32>
    %783 = tpu.reciprocal %782 {approx = true} : vector<1x64xf32> -> vector<1x64xf32>
    %784 = arith.mulf %779, %783 : vector<1x64xf32>
    %cst_247 = arith.constant 1.000000e+00 : f32
    %785 = vector.broadcast %cst_247 : f32 to vector<1x64xf32>
    %786 = arith.cmpf ole, %754, %785 : vector<1x64xf32>
    %cst_248 = arith.constant 0.000000e+00 : f32
    %787 = vector.broadcast %cst_248 : f32 to vector<1x64xf32>
    %788 = arith.select %786, %787, %784 : vector<1x64xi1>, vector<1x64xf32>
    %789 = vector.shape_cast %788 : vector<1x64xf32> to vector<1x1x64xf32>
    %cst_249 = arith.constant dense<0.000000e+00> : vector<1xf32>
    %790 = vector.multi_reduction <add>, %789, %cst_249 [1, 2] : vector<1x1x64xf32> to vector<1xf32>
    %791 = vector.shape_cast %790 : vector<1xf32> to vector<1x1x1xf32>
    %792 = vector.extract %791[0, 0, 0] : f32 from vector<1x1x1xf32>
    %cst_250 = arith.constant 1.562500e-02 : f32
    %793 = arith.mulf %792, %cst_250 : f32
    %cst_251 = arith.constant 1.000000e+00 : f32
    %794 = arith.subf %cst_251, %793 : f32
    %c0_252 = arith.constant 0 : index
    %c0_253 = arith.constant 0 : index
    %795 = memref.load %arg2[%c0_252, %c0_253] : memref<1x1xf32, #tpu.memory_space<smem>>
    memref.store %794, %arg2[%c0_252, %c0_253] : memref<1x1xf32, #tpu.memory_space<smem>>
    return
  }
}

</mosaic_0001>

<bundles_post_ra>
// kernel: _opt_loss.1
= control target key start
LH: loop header
LB: loop body
LE: loop exit
PB: predicated region body
PF: predicated region fallthrough
CT: control target
= control target key end

     0   :  { %vm33_vm0 = vcmask 261120   ;;  %s3539_s0 = inlined_call_operand.vmem [shape: f32[64,32], index: 0, kind: input, shape index: {}]   ;;  %s3540_s1 = inlined_call_operand.vmem [shape: f32[64,32], index: 1, kind: input, shape index: {}]   ;;  %s3541_s2 = inlined_call_operand.hbm [shape: f32[1,1], index: 2, kind: output, shape index: {}]  }
   0x1   :  { %v2506_v0 = vld [vmem:[%s3539_s0 + $0x38] sm:$0xff]  ;;  %v2514_v1 = vld [vmem:[%s3539_s0 + $0x30] sm:$0xff]  ;;  %v2519_v2 = vld [vmem:[%s3539_s0] sm:$0xff] }
   0x2   :  { %2126 = vmatpush.xpose.msk.msra.mxu0 %vm33_vm0, %v2506_v0  ;;  %118 = vmatpush.msra.mxu2 %v2506_v0 }
   0x3   :  { %200 = vmatpush.msra.mxu3 %v2506_v0  ;;  %446 = vmatpush.msra.mxu1 %v2506_v0 }
   0x4   :  { %7 = vsyncpa [#allocation3], 0  ;;  %v32_v3 = vmul.f32 %v2519_v2, %v2519_v2  ;;  %119 = vmatpush.msra.mxu2 %v2514_v1  ;;  %v2529_v4 = vld [vmem:[%s3539_s0 + $0x28] sm:$0xff]  ;;  %v2540_v6 = vld [vmem:[%s3539_s0 + $0x20] sm:$0xff]  ;;  %v28_v10 = vlaneseq  ;;  %vm84_vm2 = vcmask 523264   ;;  %v2486_v33 = vmov 0.0  }
   0x5   :  { %201 = vmatpush.msra.mxu3 %v2514_v1  ;;  %447 = vmatpush.msra.mxu1 %v2514_v1  ;;  %v2548_v7 = vld [vmem:[%s3539_s0 + $0x18] sm:$0xff]  ;;  %v2557_v8 = vld [vmem:[%s3539_s0 + $0x10] sm:$0xff]  ;;  %v2565_v9 = vld [vmem:[%s3539_s0 + $0x8] sm:$0xff]  ;;  %s2116_s30 = sshll.u32 %s3541_s2, 4  ;;  %s2487_s5 = smov [#allocation2]   ;;  %s2117_s30 = int_to_ptr.hbm [resolvable:$true] %s2116_s30 }
   0x6   :  { %2127 = vmatpush.xpose.msk.msra.mxu0 %vm33_vm0, %v2514_v1  ;;  %v34_v5 = vsel %vm33_vm0, %v32_v3, 0.0  ;;  %120 = vmatpush.msra.mxu2 %v2529_v4  ;;  %v2661_v11 = vshrl.u32 %v28_v10, 7 }
   0x7   :  { %35 = vadd.xlane.f32.xlu0 %v34_v5  ;;  %202 = vmatpush.msra.mxu3 %v2529_v4 }
   0x8   :  { %121 = vmatpush.msra.mxu2 %v2540_v6  ;;  %448 = vmatpush.msra.mxu1 %v2529_v4  ;;  %vm31_vm1 = vcmp.ge.s32.totalorder %v2661_v11, 5  ;;  %v2668_v23 = vcvt.s32.f32 %v2661_v11 }
   0x9   :  { %203 = vmatpush.msra.mxu3 %v2540_v6 }
   0xa   :  { %2128 = vmatpush.xpose.msk.msra.mxu0 %vm33_vm0, %v2529_v4  ;;  %122 = vmatpush.msra.mxu2 %v2548_v7 }
   0xb   :  { %204 = vmatpush.msra.mxu3 %v2548_v7  ;;  %449 = vmatpush.msra.mxu1 %v2540_v6 }
   0xc   :  { %123 = vmatpush.msra.mxu2 %v2557_v8 }
   0xd   :  { %205 = vmatpush.msra.mxu3 %v2557_v8  ;;  %450 = vmatpush.msra.mxu1 %v2548_v7 }
   0xe   :  { %2129 = vmatpush.xpose.msk.msra.mxu0 %vm33_vm0, %v2540_v6  ;;  %124 = vmatpush.msra.mxu2 %v2565_v9 }
   0xf   :  { %206 = vmatpush.msra.mxu3 %v2565_v9  ;;  %451 = vmatpush.msra.mxu1 %v2557_v8 }
  0x10   :  { %125 = vmatpush.msra.mxu2 %v2519_v2 }
  0x11   :  { %207 = vmatpush.msra.mxu3 %v2519_v2  ;;  %452 = vmatpush.msra.mxu1 %v2565_v9 }
  0x12   :  { %2137 = vmatpush.xpose.msk.msrb.mxu2 %vm33_vm0, %v2506_v0  ;;  %2130 = vmatpush.xpose.msk.msra.mxu0 %vm33_vm0, %v2548_v7 }
  0x13   :  { %282 = vmatpush.msrb.mxu3 %v2506_v0  ;;  %453 = vmatpush.msra.mxu1 %v2519_v2 }
  0x15   :  { %283 = vmatpush.msrb.mxu3 %v2514_v1  ;;  %2192 = vmatpush.xpose.msk.msrb.mxu1 %vm33_vm0, %v2506_v0 }
  0x16   :  { %2138 = vmatpush.xpose.msk.msrb.mxu2 %vm33_vm0, %v2514_v1  ;;  %2131 = vmatpush.xpose.msk.msra.mxu0 %vm33_vm0, %v2557_v8 }
  0x17   :  { %284 = vmatpush.msrb.mxu3 %v2529_v4 }
  0x19   :  { %285 = vmatpush.msrb.mxu3 %v2540_v6  ;;  %2193 = vmatpush.xpose.msk.msrb.mxu1 %vm33_vm0, %v2514_v1 }
  0x1a   :  { %2139 = vmatpush.xpose.msk.msrb.mxu2 %vm33_vm0, %v2529_v4  ;;  %2132 = vmatpush.xpose.msk.msra.mxu0 %vm33_vm0, %v2565_v9 }
  0x1b   :  { %286 = vmatpush.msrb.mxu3 %v2548_v7 }
  0x1d   :  { %287 = vmatpush.msrb.mxu3 %v2557_v8  ;;  %2194 = vmatpush.xpose.msk.msrb.mxu1 %vm33_vm0, %v2529_v4 }
  0x1e   :  { %2140 = vmatpush.xpose.msk.msrb.mxu2 %vm33_vm0, %v2540_v6  ;;  %2133 = vmatpush.xpose.msk.msra.mxu0 %vm33_vm0, %v2519_v2 }
  0x1f   :  { %288 = vmatpush.msrb.mxu3 %v2565_v9 }
  0x21   :  { %289 = vmatpush.msrb.mxu3 %v2519_v2  ;;  %2134 = vmatmul.msk.f32.vlgmr.msra.gmra.mxu0 %vm33_vm0, %v2519_v2 }
  0x22   :  { %2148 = vmatpush.xpose.msk.msrb.mxu0 %vm33_vm0, %v2506_v0  ;;  %2141 = vmatpush.xpose.msk.msrb.mxu2 %vm33_vm0, %v2548_v7 }
  0x23   :  { %2195 = vmatpush.xpose.msk.msrb.mxu1 %vm33_vm0, %v2540_v6 }
  0x26   :  { %2149 = vmatpush.xpose.msk.msrb.mxu0 %vm33_vm0, %v2514_v1  ;;  %2142 = vmatpush.xpose.msk.msrb.mxu2 %vm33_vm0, %v2557_v8 }
  0x27   :  { %2196 = vmatpush.xpose.msk.msrb.mxu1 %vm33_vm0, %v2548_v7 }
  0x2a   :  { %2150 = vmatpush.xpose.msk.msrb.mxu0 %vm33_vm0, %v2529_v4  ;;  %2143 = vmatpush.xpose.msk.msrb.mxu2 %vm33_vm0, %v2565_v9 }
  0x2b   :  { %2197 = vmatpush.xpose.msk.msrb.mxu1 %vm33_vm0, %v2557_v8 }
  0x2e   :  { %2151 = vmatpush.xpose.msk.msrb.mxu0 %vm33_vm0, %v2540_v6  ;;  %2144 = vmatpush.xpose.msk.msrb.mxu2 %vm33_vm0, %v2519_v2 }
  0x2f   :  { %2198 = vmatpush.xpose.msk.msrb.mxu1 %vm33_vm0, %v2565_v9 }
  0x32   :  { %2152 = vmatpush.xpose.msk.msrb.mxu0 %vm33_vm0, %v2548_v7 }
  0x33   :  { %2199 = vmatpush.xpose.msk.msrb.mxu1 %vm33_vm0, %v2519_v2 }
  0x36   :  { %2153 = vmatpush.xpose.msk.msrb.mxu0 %vm33_vm0, %v2557_v8 }
  0x3a   :  { %2154 = vmatpush.xpose.msk.msrb.mxu0 %vm33_vm0, %v2565_v9 }
  0x3e   :  { %2155 = vmatpush.xpose.msk.msrb.mxu0 %vm33_vm0, %v2519_v2 }
  0x42   :  { %2159 = vmatpush.xpose.msk.msra.mxu0 %vm33_vm0, %v2506_v0 }
  0x46   :  { %2160 = vmatpush.xpose.msk.msra.mxu0 %vm33_vm0, %v2514_v1 }
  0x4a   :  { %2161 = vmatpush.xpose.msk.msra.mxu0 %vm33_vm0, %v2529_v4 }
  0x4e   :  { %2162 = vmatpush.xpose.msk.msra.mxu0 %vm33_vm0, %v2540_v6 }
  0x52   :  { %2163 = vmatpush.xpose.msk.msra.mxu0 %vm33_vm0, %v2548_v7 }
  0x56   :  { %2164 = vmatpush.xpose.msk.msra.mxu0 %vm33_vm0, %v2557_v8 }
  0x5a   :  { %2165 = vmatpush.xpose.msk.msra.mxu0 %vm33_vm0, %v2565_v9 }
  0x5e   :  { %2166 = vmatpush.xpose.msk.msra.mxu0 %vm33_vm0, %v2519_v2 }
  0x7a   :  { %v36_v13 = vpop.xlane.xlu0 %35 }
  0x9e   :  { %v78_v12 = vpop.f32.mrf.mxu0 }
  0x9f   :  { %v81_v14 = vmul.f32 2.0, %v78_v12 }
  0xa1   :  { %v82_v15 = vsub.f32 %v36_v13, %v81_v14 }
  0xa3   :  { %v83_v16 = vsel %vm31_vm1, 1e+30, %v82_v15 }
  0xa4   :  { %v85_v17 = vsel %vm84_vm2, %v83_v16, inf }
  0xa5   :  { %v86_v18 = vrot.slane %v85_v17, 4 }
  0xa7   :  { %v87_v19 = vmin.f32 %v85_v17, %v86_v18 }
  0xa9   :  { %v88_v20 = vrot.slane %v87_v19, 2 }
  0xab   :  { %v89_v21 = vmin.f32 %v87_v19, %v88_v20 }
  0xad   :  { %v90_v22 = vrot.slane %v89_v21, 1 }
  0xaf   :  { %v91_v24 = vmin.f32 %v89_v21, %v90_v22 }
  0xb1   :  { %vm92_vm3 = vcmp.le.f32.partialorder %v83_v16, %v91_v24 }
  0xb2   :  { %v93_v25 = vsel %vm92_vm3, %v2668_v23, 8.0 }
  0xb3   :  { %v94_v26 = vsel %vm84_vm2, %v93_v25, inf }
  0xb4   :  { %v95_v27 = vrot.slane %v94_v26, 4 }
  0xb6   :  { %v96_v28 = vmin.f32 %v94_v26, %v95_v27 }
  0xb8   :  { %v97_v29 = vrot.slane %v96_v28, 2 }
  0xba   :  { %v98_v30 = vmin.f32 %v96_v28, %v97_v29 }
  0xbc   :  { %v99_v31 = vrot.slane %v98_v30, 1 }
  0xbe   :  { %v100_v32 = vmin.f32 %v98_v30, %v99_v31 }
  0xc0   :  { %vm101_vm4 = vcmp.eq.f32.partialorder %v2668_v23, %v100_v32 }
  0xc1   :  { %v2135_v34 = vsel %vm101_vm4, 1.0, %v2486_v33 }
  0xc2   :  { %2136 = vmatmul.msk.f32.vlgmr.msra.gmra.mxu2 %vm84_vm2, %v2135_v34  ;;  %v104_v35 = vsel %vm84_vm2, %v2135_v34, 0.0 }
  0xc3   :  { %105 = vadd.xlane.f32.xlu0 %v104_v35  ;;  %364 = vmatpush.msra.mxu2 %v2506_v0 }
  0xc5   :  { %365 = vmatpush.msra.mxu2 %v2514_v1 }
  0xc7   :  { %366 = vmatpush.msra.mxu2 %v2529_v4 }
  0xc9   :  { %367 = vmatpush.msra.mxu2 %v2540_v6 }
  0xcb   :  { %368 = vmatpush.msra.mxu2 %v2548_v7 }
  0xcd   :  { %369 = vmatpush.msra.mxu2 %v2557_v8 }
  0xcf   :  { %370 = vmatpush.msra.mxu2 %v2565_v9 }
  0xd1   :  { %371 = vmatpush.msra.mxu2 %v2519_v2 }
 0x136   :  { %v106_v36 = vpop.xlane.xlu0 %105 }
 0x137   :  { %v130_v37 = vmax.f32 %v106_v36, 1.0  ;;  %vm132_vm5 = vcmp.gt.f32.partialorder %v106_v36, 0.5 }
 0x139   :  { %2402 = vrcp.f32 %v130_v37 }
 0x13f   :  { %v2403_v38 = vpop.eup %2402 }
 0x145   :  { %v127_v39 = vpop.f32.mrf.mxu2 }
 0x146   :  { %v133_v40 = vmul.f32 %v2403_v38, %v127_v39 }
 0x148   :  { %v136_v41 = vsel %vm132_vm5, %v133_v40, %v2519_v2 }
 0x149   :  { %2145 = vmatmul.msk.f32.vlgmr.msrb.gmra.mxu2 %vm33_vm0, %v136_v41  ;;  %v137_v42 = vmul.f32 %v136_v41, %v136_v41 }
 0x14a   :  { %2181 = vmatpush.xpose.msk.msrb.mxu2 %vm33_vm0, %v2506_v0 }
 0x14b   :  { %v138_v43 = vsel %vm33_vm0, %v137_v42, 0.0 }
 0x14c   :  { %139 = vadd.xlane.f32.xlu1 %v138_v43 }
 0x14e   :  { %2182 = vmatpush.xpose.msk.msrb.mxu2 %vm33_vm0, %v2514_v1 }
 0x152   :  { %2183 = vmatpush.xpose.msk.msrb.mxu2 %vm33_vm0, %v2529_v4 }
 0x156   :  { %2184 = vmatpush.xpose.msk.msrb.mxu2 %vm33_vm0, %v2540_v6 }
 0x15a   :  { %2185 = vmatpush.xpose.msk.msrb.mxu2 %vm33_vm0, %v2548_v7 }
 0x15e   :  { %2186 = vmatpush.xpose.msk.msrb.mxu2 %vm33_vm0, %v2557_v8 }
 0x162   :  { %2187 = vmatpush.xpose.msk.msrb.mxu2 %vm33_vm0, %v2565_v9 }
 0x166   :  { %2188 = vmatpush.xpose.msk.msrb.mxu2 %vm33_vm0, %v2519_v2 }
 0x1bf   :  { %v140_v46 = vpop.xlane.xlu1 %139 }
 0x1cc   :  { %v161_v44 = vpop.f32.mrf.mxu2 }
 0x1cd   :  { %v164_v45 = vmul.f32 2.0, %v161_v44 }
 0x1cf   :  { %v165_v47 = vsub.f32 %v140_v46, %v164_v45 }
 0x1d1   :  { %v166_v48 = vsel %vm31_vm1, 1e+30, %v165_v47 }
 0x1d2   :  { %v167_v49 = vsel %vm84_vm2, %v166_v48, inf }
 0x1d3   :  { %v168_v50 = vrot.slane %v167_v49, 4 }
 0x1d5   :  { %v169_v51 = vmin.f32 %v167_v49, %v168_v50 }
 0x1d7   :  { %v170_v52 = vrot.slane %v169_v51, 2 }
 0x1d9   :  { %v171_v53 = vmin.f32 %v169_v51, %v170_v52 }
 0x1db   :  { %v172_v54 = vrot.slane %v171_v53, 1 }
 0x1dd   :  { %v173_v55 = vmin.f32 %v171_v53, %v172_v54 }
 0x1df   :  { %vm174_vm6 = vcmp.le.f32.partialorder %v166_v48, %v173_v55 }
 0x1e0   :  { %v175_v56 = vsel %vm174_vm6, %v2668_v23, 8.0 }
 0x1e1   :  { %v176_v57 = vsel %vm84_vm2, %v175_v56, inf }
 0x1e2   :  { %v177_v58 = vrot.slane %v176_v57, 4 }
 0x1e4   :  { %v178_v59 = vmin.f32 %v176_v57, %v177_v58 }
 0x1e6   :  { %v179_v60 = vrot.slane %v178_v59, 2 }
 0x1e8   :  { %v180_v61 = vmin.f32 %v178_v59, %v179_v60 }
 0x1ea   :  { %v181_v62 = vrot.slane %v180_v61, 1 }
 0x1ec   :  { %v182_v63 = vmin.f32 %v180_v61, %v181_v62 }
 0x1ee   :  { %vm183_vm7 = vcmp.eq.f32.partialorder %v2668_v23, %v182_v63 }
 0x1ef   :  { %v2146_v3 = vsel %vm183_vm7, 1.0, %v2486_v33 }
 0x1f0   :  { %2147 = vmatmul.msk.f32.vlgmr.msra.gmra.mxu3 %vm84_vm2, %v2146_v3  ;;  %v186_v5 = vsel %vm84_vm2, %v2146_v3, 0.0 }
 0x1f1   :  { %187 = vadd.xlane.f32.xlu1 %v186_v5  ;;  %2170 = vmatpush.xpose.msk.msra.mxu3 %vm33_vm0, %v2506_v0 }
 0x1f5   :  { %2171 = vmatpush.xpose.msk.msra.mxu3 %vm33_vm0, %v2514_v1 }
 0x1f9   :  { %2172 = vmatpush.xpose.msk.msra.mxu3 %vm33_vm0, %v2529_v4 }
 0x1fd   :  { %2173 = vmatpush.xpose.msk.msra.mxu3 %vm33_vm0, %v2540_v6 }
 0x201   :  { %2174 = vmatpush.xpose.msk.msra.mxu3 %vm33_vm0, %v2548_v7 }
 0x205   :  { %2175 = vmatpush.xpose.msk.msra.mxu3 %vm33_vm0, %v2557_v8 }
 0x209   :  { %2176 = vmatpush.xpose.msk.msra.mxu3 %vm33_vm0, %v2565_v9 }
 0x20d   :  { %2177 = vmatpush.xpose.msk.msra.mxu3 %vm33_vm0, %v2519_v2 }
 0x264   :  { %v188_v12 = vpop.xlane.xlu1 %187 }
 0x265   :  { %v212_v13 = vmax.f32 %v188_v12, 1.0  ;;  %vm214_vm8 = vcmp.gt.f32.partialorder %v188_v12, 0.5 }
 0x267   :  { %2404 = vrcp.f32 %v212_v13 }
 0x26d   :  { %v2405_v14 = vpop.eup %2404 }
 0x273   :  { %v209_v15 = vpop.f32.mrf.mxu3 }
 0x274   :  { %v215_v16 = vmul.f32 %v2405_v14, %v209_v15 }
 0x276   :  { %v218_v17 = vsel %vm214_vm8, %v215_v16, %v136_v41 }
 0x277   :  { %2156 = vmatmul.msk.f32.vlgmr.msrb.gmra.mxu0 %vm33_vm0, %v218_v17  ;;  %v219_v18 = vmul.f32 %v218_v17, %v218_v17 }
 0x278   :  { %2203 = vmatpush.xpose.msk.msrb.mxu0 %vm33_vm0, %v2506_v0 }
 0x279   :  { %v220_v19 = vsel %vm33_vm0, %v219_v18, 0.0 }
 0x27a   :  { %221 = vadd.xlane.f32.xlu2 %v220_v19 }
 0x27c   :  { %2204 = vmatpush.xpose.msk.msrb.mxu0 %vm33_vm0, %v2514_v1 }
 0x280   :  { %2205 = vmatpush.xpose.msk.msrb.mxu0 %vm33_vm0, %v2529_v4 }
 0x284   :  { %2206 = vmatpush.xpose.msk.msrb.mxu0 %vm33_vm0, %v2540_v6 }
 0x288   :  { %2207 = vmatpush.xpose.msk.msrb.mxu0 %vm33_vm0, %v2548_v7 }
 0x28c   :  { %2208 = vmatpush.xpose.msk.msrb.mxu0 %vm33_vm0, %v2557_v8 }
 0x290   :  { %2209 = vmatpush.xpose.msk.msrb.mxu0 %vm33_vm0, %v2565_v9 }
 0x294   :  { %2210 = vmatpush.xpose.msk.msrb.mxu0 %vm33_vm0, %v2519_v2 }
 0x2ed   :  { %v222_v22 = vpop.xlane.xlu2 %221 }
 0x2f4   :  { %v243_v20 = vpop.f32.mrf.mxu0 }
 0x2f5   :  { %v246_v21 = vmul.f32 2.0, %v243_v20 }
 0x2f7   :  { %v247_v24 = vsub.f32 %v222_v22, %v246_v21 }
 0x2f9   :  { %v248_v25 = vsel %vm31_vm1, 1e+30, %v247_v24 }
 0x2fa   :  { %v249_v26 = vsel %vm84_vm2, %v248_v25, inf }
 0x2fb   :  { %v250_v27 = vrot.slane %v249_v26, 4 }
 0x2fd   :  { %v251_v28 = vmin.f32 %v249_v26, %v250_v27 }
 0x2ff   :  { %v252_v29 = vrot.slane %v251_v28, 2 }
 0x301   :  { %v253_v30 = vmin.f32 %v251_v28, %v252_v29 }
 0x303   :  { %v254_v31 = vrot.slane %v253_v30, 1 }
 0x305   :  { %v255_v32 = vmin.f32 %v253_v30, %v254_v31 }
 0x307   :  { %vm256_vm9 = vcmp.le.f32.partialorder %v248_v25, %v255_v32 }
 0x308   :  { %v257_v34 = vsel %vm256_vm9, %v2668_v23, 8.0 }
 0x309   :  { %v258_v35 = vsel %vm84_vm2, %v257_v34, inf }
 0x30a   :  { %v259_v36 = vrot.slane %v258_v35, 4 }
 0x30c   :  { %v260_v37 = vmin.f32 %v258_v35, %v259_v36 }
 0x30e   :  { %v261_v38 = vrot.slane %v260_v37, 2 }
 0x310   :  { %v262_v39 = vmin.f32 %v260_v37, %v261_v38 }
 0x312   :  { %v263_v40 = vrot.slane %v262_v39, 1 }
 0x314   :  { %v264_v41 = vmin.f32 %v262_v39, %v263_v40 }
 0x316   :  { %vm265_vm10 = vcmp.eq.f32.partialorder %v2668_v23, %v264_v41 }
 0x317   :  { %v2157_v42 = vsel %vm265_vm10, 1.0, %v2486_v33 }
 0x318   :  { %2158 = vmatmul.msk.f32.vlgmr.msrb.gmra.mxu3 %vm84_vm2, %v2157_v42  ;;  %v268_v43 = vsel %vm84_vm2, %v2157_v42, 0.0 }
 0x319   :  { %269 = vadd.xlane.f32.xlu2 %v268_v43  ;;  %528 = vmatpush.msrb.mxu3 %v2506_v0 }
 0x31b   :  { %529 = vmatpush.msrb.mxu3 %v2514_v1 }
 0x31d   :  { %530 = vmatpush.msrb.mxu3 %v2529_v4 }
 0x31f   :  { %531 = vmatpush.msrb.mxu3 %v2540_v6 }
 0x321   :  { %532 = vmatpush.msrb.mxu3 %v2548_v7 }
 0x323   :  { %533 = vmatpush.msrb.mxu3 %v2557_v8 }
 0x325   :  { %534 = vmatpush.msrb.mxu3 %v2565_v9 }
 0x327   :  { %535 = vmatpush.msrb.mxu3 %v2519_v2 }
 0x38c   :  { %v270_v44 = vpop.xlane.xlu2 %269 }
 0x38d   :  { %v294_v45 = vmax.f32 %v270_v44, 1.0  ;;  %vm296_vm11 = vcmp.gt.f32.partialorder %v270_v44, 0.5 }
 0x38f   :  { %2406 = vrcp.f32 %v294_v45 }
 0x395   :  { %v2407_v46 = vpop.eup %2406 }
 0x39b   :  { %v291_v47 = vpop.f32.mrf.mxu3 }
 0x39c   :  { %v297_v48 = vmul.f32 %v2407_v46, %v291_v47 }
 0x39e   :  { %v300_v49 = vsel %vm296_vm11, %v297_v48, %v218_v17 }
 0x39f   :  { %2167 = vmatmul.msk.f32.vlgmr.msra.gmra.mxu0 %vm33_vm0, %v300_v49  ;;  %v301_v50 = vmul.f32 %v300_v49, %v300_v49 }
 0x3a0   :  { %856 = vmatpush.msra.mxu0 %v2506_v0 }
 0x3a1   :  { %v302_v51 = vsel %vm33_vm0, %v301_v50, 0.0 }
 0x3a2   :  { %303 = vadd.xlane.f32.xlu0 %v302_v51  ;;  %857 = vmatpush.msra.mxu0 %v2514_v1 }
 0x3a4   :  { %858 = vmatpush.msra.mxu0 %v2529_v4 }
 0x3a6   :  { %859 = vmatpush.msra.mxu0 %v2540_v6 }
 0x3a8   :  { %860 = vmatpush.msra.mxu0 %v2548_v7 }
 0x3aa   :  { %861 = vmatpush.msra.mxu0 %v2557_v8 }
 0x3ac   :  { %862 = vmatpush.msra.mxu0 %v2565_v9 }
 0x3ae   :  { %863 = vmatpush.msra.mxu0 %v2519_v2 }
 0x415   :  { %v304_v54 = vpop.xlane.xlu0 %303 }
 0x41c   :  { %v325_v52 = vpop.f32.mrf.mxu0 }
 0x41d   :  { %v328_v53 = vmul.f32 2.0, %v325_v52 }
 0x41f   :  { %v329_v55 = vsub.f32 %v304_v54, %v328_v53 }
 0x421   :  { %v330_v56 = vsel %vm31_vm1, 1e+30, %v329_v55 }
 0x422   :  { %v331_v57 = vsel %vm84_vm2, %v330_v56, inf }
 0x423   :  { %v332_v58 = vrot.slane %v331_v57, 4 }
 0x425   :  { %v333_v59 = vmin.f32 %v331_v57, %v332_v58 }
 0x427   :  { %v334_v60 = vrot.slane %v333_v59, 2 }
 0x429   :  { %v335_v61 = vmin.f32 %v333_v59, %v334_v60 }
 0x42b   :  { %v336_v62 = vrot.slane %v335_v61, 1 }
 0x42d   :  { %v337_v63 = vmin.f32 %v335_v61, %v336_v62 }
 0x42f   :  { %vm338_vm12 = vcmp.le.f32.partialorder %v330_v56, %v337_v63 }
 0x430   :  { %v339_v3 = vsel %vm338_vm12, %v2668_v23, 8.0 }
 0x431   :  { %v340_v5 = vsel %vm84_vm2, %v339_v3, inf }
 0x432   :  { %v341_v12 = vrot.slane %v340_v5, 4 }
 0x434   :  { %v342_v13 = vmin.f32 %v340_v5, %v341_v12 }
 0x436   :  { %v343_v14 = vrot.slane %v342_v13, 2 }
 0x438   :  { %v344_v15 = vmin.f32 %v342_v13, %v343_v14 }
 0x43a   :  { %v345_v16 = vrot.slane %v344_v15, 1 }
 0x43c   :  { %v346_v17 = vmin.f32 %v344_v15, %v345_v16 }
 0x43e   :  { %vm347_vm13 = vcmp.eq.f32.partialorder %v2668_v23, %v346_v17 }
 0x43f   :  { %v2168_v18 = vsel %vm347_vm13, 1.0, %v2486_v33 }
 0x440   :  { %2169 = vmatmul.msk.f32.vlgmr.msra.gmra.mxu2 %vm84_vm2, %v2168_v18  ;;  %v350_v19 = vsel %vm84_vm2, %v2168_v18, 0.0 }
 0x441   :  { %351 = vadd.xlane.f32.xlu1 %v350_v19  ;;  %692 = vmatpush.msra.mxu2 %v2506_v0 }
 0x443   :  { %693 = vmatpush.msra.mxu2 %v2514_v1 }
 0x445   :  { %694 = vmatpush.msra.mxu2 %v2529_v4 }
 0x447   :  { %695 = vmatpush.msra.mxu2 %v2540_v6 }
 0x449   :  { %696 = vmatpush.msra.mxu2 %v2548_v7 }
 0x44b   :  { %697 = vmatpush.msra.mxu2 %v2557_v8 }
 0x44d   :  { %698 = vmatpush.msra.mxu2 %v2565_v9 }
 0x44f   :  { %699 = vmatpush.msra.mxu2 %v2519_v2 }
 0x4b4   :  { %v352_v20 = vpop.xlane.xlu1 %351 }
 0x4b5   :  { %v376_v21 = vmax.f32 %v352_v20, 1.0  ;;  %vm378_vm14 = vcmp.gt.f32.partialorder %v352_v20, 0.5 }
 0x4b7   :  { %2408 = vrcp.f32 %v376_v21 }
 0x4bd   :  { %v2409_v22 = vpop.eup %2408 }
 0x4c3   :  { %v373_v24 = vpop.f32.mrf.mxu2 }
 0x4c4   :  { %v379_v25 = vmul.f32 %v2409_v22, %v373_v24 }
 0x4c6   :  { %v382_v26 = vsel %vm378_vm14, %v379_v25, %v300_v49 }
 0x4c7   :  { %2178 = vmatmul.msk.f32.vlgmr.msra.gmra.mxu3 %vm33_vm0, %v382_v26  ;;  %v383_v27 = vmul.f32 %v382_v26, %v382_v26 }
 0x4c8   :  { %610 = vmatpush.msra.mxu3 %v2506_v0 }
 0x4c9   :  { %v384_v28 = vsel %vm33_vm0, %v383_v27, 0.0 }
 0x4ca   :  { %385 = vadd.xlane.f32.xlu2 %v384_v28  ;;  %611 = vmatpush.msra.mxu3 %v2514_v1 }
 0x4cc   :  { %612 = vmatpush.msra.mxu3 %v2529_v4 }
 0x4ce   :  { %613 = vmatpush.msra.mxu3 %v2540_v6 }
 0x4d0   :  { %614 = vmatpush.msra.mxu3 %v2548_v7 }
 0x4d2   :  { %615 = vmatpush.msra.mxu3 %v2557_v8 }
 0x4d4   :  { %616 = vmatpush.msra.mxu3 %v2565_v9 }
 0x4d6   :  { %617 = vmatpush.msra.mxu3 %v2519_v2 }
 0x53d   :  { %v386_v31 = vpop.xlane.xlu2 %385 }
 0x54a   :  { %v407_v29 = vpop.f32.mrf.mxu3 }
 0x54b   :  { %v410_v30 = vmul.f32 2.0, %v407_v29 }
 0x54d   :  { %v411_v32 = vsub.f32 %v386_v31, %v410_v30 }
 0x54f   :  { %v412_v34 = vsel %vm31_vm1, 1e+30, %v411_v32 }
 0x550   :  { %v413_v35 = vsel %vm84_vm2, %v412_v34, inf }
 0x551   :  { %v414_v36 = vrot.slane %v413_v35, 4 }
 0x553   :  { %v415_v37 = vmin.f32 %v413_v35, %v414_v36 }
 0x555   :  { %v416_v38 = vrot.slane %v415_v37, 2 }
 0x557   :  { %v417_v39 = vmin.f32 %v415_v37, %v416_v38 }
 0x559   :  { %v418_v40 = vrot.slane %v417_v39, 1 }
 0x55b   :  { %v419_v41 = vmin.f32 %v417_v39, %v418_v40 }
 0x55d   :  { %vm420_vm15 = vcmp.le.f32.partialorder %v412_v34, %v419_v41 }
 0x55e   :  { %v421_v42 = vsel %vm420_vm15, %v2668_v23, 8.0 }
 0x55f   :  { %v422_v43 = vsel %vm84_vm2, %v421_v42, inf }
 0x560   :  { %v423_v44 = vrot.slane %v422_v43, 4 }
 0x562   :  { %v424_v45 = vmin.f32 %v422_v43, %v423_v44 }
 0x564   :  { %v425_v46 = vrot.slane %v424_v45, 2 }
 0x566   :  { %v426_v47 = vmin.f32 %v424_v45, %v425_v46 }
 0x568   :  { %v427_v48 = vrot.slane %v426_v47, 1 }
 0x56a   :  { %v428_v49 = vmin.f32 %v426_v47, %v427_v48 }
 0x56c   :  { %vm429_vm3 = vcmp.eq.f32.partialorder %v2668_v23, %v428_v49 }
 0x56d   :  { %v2179_v50 = vsel %vm429_vm3, 1.0, %v2486_v33 }
 0x56e   :  { %2180 = vmatmul.msk.f32.vlgmr.msra.gmra.mxu1 %vm84_vm2, %v2179_v50  ;;  %v432_v51 = vsel %vm84_vm2, %v2179_v50, 0.0 }
 0x56f   :  { %433 = vadd.xlane.f32.xlu0 %v432_v51  ;;  %774 = vmatpush.msra.mxu1 %v2506_v0 }
 0x571   :  { %775 = vmatpush.msra.mxu1 %v2514_v1 }
 0x573   :  { %776 = vmatpush.msra.mxu1 %v2529_v4 }
 0x575   :  { %777 = vmatpush.msra.mxu1 %v2540_v6 }
 0x577   :  { %778 = vmatpush.msra.mxu1 %v2548_v7 }
 0x579   :  { %779 = vmatpush.msra.mxu1 %v2557_v8 }
 0x57b   :  { %780 = vmatpush.msra.mxu1 %v2565_v9 }
 0x57d   :  { %781 = vmatpush.msra.mxu1 %v2519_v2 }
 0x5e2   :  { %v434_v52 = vpop.xlane.xlu0 %433 }
 0x5e3   :  { %v458_v53 = vmax.f32 %v434_v52, 1.0  ;;  %vm460_vm4 = vcmp.gt.f32.partialorder %v434_v52, 0.5 }
 0x5e5   :  { %2410 = vrcp.f32 %v458_v53 }
 0x5eb   :  { %v2411_v54 = vpop.eup %2410  ;;  %v455_v55 = vpop.f32.mrf.mxu1 }
 0x5ec   :  { %v461_v56 = vmul.f32 %v2411_v54, %v455_v55 }
 0x5ee   :  { %v464_v57 = vsel %vm460_vm4, %v461_v56, %v382_v26 }
 0x5ef   :  { %2189 = vmatmul.msk.f32.vlgmr.msrb.gmra.mxu2 %vm33_vm0, %v464_v57  ;;  %v465_v58 = vmul.f32 %v464_v57, %v464_v57 }
 0x5f0   :  { %2225 = vmatpush.xpose.msk.msrb.mxu2 %vm33_vm0, %v2506_v0 }
 0x5f1   :  { %v466_v59 = vsel %vm33_vm0, %v465_v58, 0.0 }
 0x5f2   :  { %467 = vadd.xlane.f32.xlu1 %v466_v59 }
 0x5f4   :  { %2226 = vmatpush.xpose.msk.msrb.mxu2 %vm33_vm0, %v2514_v1 }
 0x5f8   :  { %2227 = vmatpush.xpose.msk.msrb.mxu2 %vm33_vm0, %v2529_v4 }
 0x5fc   :  { %2228 = vmatpush.xpose.msk.msrb.mxu2 %vm33_vm0, %v2540_v6 }
 0x600   :  { %2229 = vmatpush.xpose.msk.msrb.mxu2 %vm33_vm0, %v2548_v7 }
 0x604   :  { %2230 = vmatpush.xpose.msk.msrb.mxu2 %vm33_vm0, %v2557_v8 }
 0x608   :  { %2231 = vmatpush.xpose.msk.msrb.mxu2 %vm33_vm0, %v2565_v9 }
 0x60c   :  { %2232 = vmatpush.xpose.msk.msrb.mxu2 %vm33_vm0, %v2519_v2 }
 0x665   :  { %v468_v62 = vpop.xlane.xlu1 %467 }
 0x672   :  { %v489_v60 = vpop.f32.mrf.mxu2 }
 0x673   :  { %v492_v61 = vmul.f32 2.0, %v489_v60 }
 0x675   :  { %v493_v63 = vsub.f32 %v468_v62, %v492_v61 }
 0x677   :  { %v494_v3 = vsel %vm31_vm1, 1e+30, %v493_v63 }
 0x678   :  { %v495_v5 = vsel %vm84_vm2, %v494_v3, inf }
 0x679   :  { %v496_v12 = vrot.slane %v495_v5, 4 }
 0x67b   :  { %v497_v13 = vmin.f32 %v495_v5, %v496_v12 }
 0x67d   :  { %v498_v14 = vrot.slane %v497_v13, 2 }
 0x67f   :  { %v499_v15 = vmin.f32 %v497_v13, %v498_v14 }
 0x681   :  { %v500_v16 = vrot.slane %v499_v15, 1 }
 0x683   :  { %v501_v17 = vmin.f32 %v499_v15, %v500_v16 }
 0x685   :  { %vm502_vm5 = vcmp.le.f32.partialorder %v494_v3, %v501_v17 }
 0x686   :  { %v503_v18 = vsel %vm502_vm5, %v2668_v23, 8.0 }
 0x687   :  { %v504_v19 = vsel %vm84_vm2, %v503_v18, inf }
 0x688   :  { %v505_v20 = vrot.slane %v504_v19, 4 }
 0x68a   :  { %v506_v21 = vmin.f32 %v504_v19, %v505_v20 }
 0x68c   :  { %v507_v22 = vrot.slane %v506_v21, 2 }
 0x68e   :  { %v508_v24 = vmin.f32 %v506_v21, %v507_v22 }
 0x690   :  { %v509_v25 = vrot.slane %v508_v24, 1 }
 0x692   :  { %v510_v26 = vmin.f32 %v508_v24, %v509_v25 }
 0x694   :  { %vm511_vm6 = vcmp.eq.f32.partialorder %v2668_v23, %v510_v26 }
 0x695   :  { %v2190_v27 = vsel %vm511_vm6, 1.0, %v2486_v33 }
 0x696   :  { %2191 = vmatmul.msk.f32.vlgmr.msrb.gmra.mxu3 %vm84_vm2, %v2190_v27  ;;  %v514_v28 = vsel %vm84_vm2, %v2190_v27, 0.0 }
 0x697   :  { %515 = vadd.xlane.f32.xlu2 %v514_v28  ;;  %2214 = vmatpush.xpose.msk.msrb.mxu3 %vm33_vm0, %v2506_v0 }
 0x69b   :  { %2215 = vmatpush.xpose.msk.msrb.mxu3 %vm33_vm0, %v2514_v1 }
 0x69f   :  { %2216 = vmatpush.xpose.msk.msrb.mxu3 %vm33_vm0, %v2529_v4 }
 0x6a3   :  { %2217 = vmatpush.xpose.msk.msrb.mxu3 %vm33_vm0, %v2540_v6 }
 0x6a7   :  { %2218 = vmatpush.xpose.msk.msrb.mxu3 %vm33_vm0, %v2548_v7 }
 0x6ab   :  { %2219 = vmatpush.xpose.msk.msrb.mxu3 %vm33_vm0, %v2557_v8 }
 0x6af   :  { %2220 = vmatpush.xpose.msk.msrb.mxu3 %vm33_vm0, %v2565_v9 }
 0x6b3   :  { %2221 = vmatpush.xpose.msk.msrb.mxu3 %vm33_vm0, %v2519_v2 }
 0x70a   :  { %v516_v29 = vpop.xlane.xlu2 %515 }
 0x70b   :  { %v540_v30 = vmax.f32 %v516_v29, 1.0  ;;  %vm542_vm7 = vcmp.gt.f32.partialorder %v516_v29, 0.5 }
 0x70d   :  { %2412 = vrcp.f32 %v540_v30 }
 0x713   :  { %v2413_v31 = vpop.eup %2412 }
 0x719   :  { %v537_v32 = vpop.f32.mrf.mxu3 }
 0x71a   :  { %v543_v34 = vmul.f32 %v2413_v31, %v537_v32 }
 0x71c   :  { %v546_v35 = vsel %vm542_vm7, %v543_v34, %v464_v57 }
 0x71d   :  { %2200 = vmatmul.msk.f32.vlgmr.msrb.gmra.mxu1 %vm33_vm0, %v546_v35  ;;  %v547_v36 = vmul.f32 %v546_v35, %v546_v35 }
 0x71e   :  { %2236 = vmatpush.xpose.msk.msrb.mxu1 %vm33_vm0, %v2506_v0 }
 0x71f   :  { %v548_v37 = vsel %vm33_vm0, %v547_v36, 0.0 }
 0x720   :  { %549 = vadd.xlane.f32.xlu0 %v548_v37 }
 0x722   :  { %2237 = vmatpush.xpose.msk.msrb.mxu1 %vm33_vm0, %v2514_v1 }
 0x726   :  { %2238 = vmatpush.xpose.msk.msrb.mxu1 %vm33_vm0, %v2529_v4 }
 0x72a   :  { %2239 = vmatpush.xpose.msk.msrb.mxu1 %vm33_vm0, %v2540_v6 }
 0x72e   :  { %2240 = vmatpush.xpose.msk.msrb.mxu1 %vm33_vm0, %v2548_v7 }
 0x732   :  { %2241 = vmatpush.xpose.msk.msrb.mxu1 %vm33_vm0, %v2557_v8 }
 0x736   :  { %2242 = vmatpush.xpose.msk.msrb.mxu1 %vm33_vm0, %v2565_v9 }
 0x73a   :  { %2243 = vmatpush.xpose.msk.msrb.mxu1 %vm33_vm0, %v2519_v2 }
 0x793   :  { %v550_v40 = vpop.xlane.xlu0 %549 }
 0x79a   :  { %v571_v38 = vpop.f32.mrf.mxu1 }
 0x79b   :  { %v574_v39 = vmul.f32 2.0, %v571_v38 }
 0x79d   :  { %v575_v41 = vsub.f32 %v550_v40, %v574_v39 }
 0x79f   :  { %v576_v42 = vsel %vm31_vm1, 1e+30, %v575_v41 }
 0x7a0   :  { %v577_v43 = vsel %vm84_vm2, %v576_v42, inf }
 0x7a1   :  { %v578_v44 = vrot.slane %v577_v43, 4 }
 0x7a3   :  { %v579_v45 = vmin.f32 %v577_v43, %v578_v44  ;;  %v2939_v43 = vld [vmem:[%s3539_s0 + $0x38] sm:$0xff]  ;;  %v2947_v44 = vld [vmem:[%s3539_s0 + $0x30] sm:$0xff] }
 0x7a5   :  { %v580_v46 = vrot.slane %v579_v45, 2 }
 0x7a7   :  { %v581_v47 = vmin.f32 %v579_v45, %v580_v46  ;;  %v2964_v45 = vld [vmem:[%s3539_s0] sm:$0xff] }
 0x7a9   :  { %v582_v48 = vrot.slane %v581_v47, 1 }
 0x7ab   :  { %v583_v49 = vmin.f32 %v581_v47, %v582_v48 }
 0x7ad   :  { %vm584_vm8 = vcmp.le.f32.partialorder %v576_v42, %v583_v49 }
 0x7ae   :  { %v585_v50 = vsel %vm584_vm8, %v2668_v23, 8.0 }
 0x7af   :  { %v586_v51 = vsel %vm84_vm2, %v585_v50, inf }
 0x7b0   :  { %v587_v52 = vrot.slane %v586_v51, 4 }
 0x7b2   :  { %v588_v53 = vmin.f32 %v586_v51, %v587_v52 }
 0x7b4   :  { %v589_v54 = vrot.slane %v588_v53, 2 }
 0x7b6   :  { %v590_v55 = vmin.f32 %v588_v53, %v589_v54 }
 0x7b8   :  { %v591_v56 = vrot.slane %v590_v55, 1 }
 0x7ba   :  { %v592_v57 = vmin.f32 %v590_v55, %v591_v56 }
 0x7bc   :  { %vm593_vm9 = vcmp.eq.f32.partialorder %v2668_v23, %v592_v57 }
 0x7bd   :  { %v2201_v58 = vsel %vm593_vm9, 1.0, %v2486_v33 }
 0x7be   :  { %2202 = vmatmul.msk.f32.vlgmr.msra.gmra.mxu3 %vm84_vm2, %v2201_v58  ;;  %v596_v59 = vsel %vm84_vm2, %v2201_v58, 0.0 }
 0x7bf   :  { %597 = vadd.xlane.f32.xlu1 %v596_v59  ;;  %938 = vmatpush.msra.mxu3 %v2506_v0 }
 0x7c1   :  { %939 = vmatpush.msra.mxu3 %v2514_v1 }
 0x7c3   :  { %940 = vmatpush.msra.mxu3 %v2529_v4 }
 0x7c5   :  { %941 = vmatpush.msra.mxu3 %v2540_v6 }
 0x7c7   :  { %942 = vmatpush.msra.mxu3 %v2548_v7 }
 0x7c9   :  { %943 = vmatpush.msra.mxu3 %v2557_v8 }
 0x7cb   :  { %944 = vmatpush.msra.mxu3 %v2565_v9 }
 0x7cd   :  { %945 = vmatpush.msra.mxu3 %v2519_v2 }
 0x832   :  { %v598_v60 = vpop.xlane.xlu1 %597 }
 0x833   :  { %v622_v61 = vmax.f32 %v598_v60, 1.0  ;;  %vm624_vm10 = vcmp.gt.f32.partialorder %v598_v60, 0.5 }
 0x835   :  { %2414 = vrcp.f32 %v622_v61 }
 0x83b   :  { %v2415_v62 = vpop.eup %2414 }
 0x841   :  { %v619_v63 = vpop.f32.mrf.mxu3 }
 0x842   :  { %v625_v3 = vmul.f32 %v2415_v62, %v619_v63  ;;  %v2982_v63 = vld [vmem:[%s3539_s0 + $0x28] sm:$0xff] }
 0x844   :  { %v628_v5 = vsel %vm624_vm10, %v625_v3, %v546_v35  ;;  %v2988_v3 = vld [vmem:[%s3539_s0 + $0x20] sm:$0xff] }
 0x845   :  { %2211 = vmatmul.msk.f32.vlgmr.msrb.gmra.mxu0 %vm33_vm0, %v628_v5  ;;  %v629_v12 = vmul.f32 %v628_v5, %v628_v5 }
 0x846   :  { %2247 = vmatpush.xpose.msk.msrb.mxu0 %vm33_vm0, %v2506_v0 }
 0x847   :  { %v630_v13 = vsel %vm33_vm0, %v629_v12, 0.0  ;;  %v3000_v12 = vld [vmem:[%s3539_s0 + $0x10] sm:$0xff] }
 0x848   :  { %631 = vadd.xlane.f32.xlu2 %v630_v13  ;;  %v3006_v13 = vld [vmem:[%s3539_s0 + $0x8] sm:$0xff] }
 0x84a   :  { %2248 = vmatpush.xpose.msk.msrb.mxu0 %vm33_vm0, %v2514_v1 }
 0x84e   :  { %2249 = vmatpush.xpose.msk.msrb.mxu0 %vm33_vm0, %v2529_v4 }
 0x852   :  { %2250 = vmatpush.xpose.msk.msrb.mxu0 %vm33_vm0, %v2540_v6 }
 0x856   :  { %2251 = vmatpush.xpose.msk.msrb.mxu0 %vm33_vm0, %v2548_v7 }
 0x85a   :  { %2252 = vmatpush.xpose.msk.msrb.mxu0 %vm33_vm0, %v2557_v8 }
 0x85e   :  { %2253 = vmatpush.xpose.msk.msrb.mxu0 %vm33_vm0, %v2565_v9 }
 0x862   :  { %2254 = vmatpush.xpose.msk.msrb.mxu0 %vm33_vm0, %v2519_v2 }
 0x8bb   :  { %v632_v16 = vpop.xlane.xlu2 %631 }
 0x8c2   :  { %v653_v14 = vpop.f32.mrf.mxu0 }
 0x8c3   :  { %v656_v15 = vmul.f32 2.0, %v653_v14 }
 0x8c5   :  { %v657_v17 = vsub.f32 %v632_v16, %v656_v15 }
 0x8c7   :  { %v658_v18 = vsel %vm31_vm1, 1e+30, %v657_v17 }
 0x8c8   :  { %v659_v19 = vsel %vm84_vm2, %v658_v18, inf }
 0x8c9   :  { %v660_v20 = vrot.slane %v659_v19, 4 }
 0x8cb   :  { %v661_v21 = vmin.f32 %v659_v19, %v660_v20 }
 0x8cd   :  { %v662_v22 = vrot.slane %v661_v21, 2 }
 0x8cf   :  { %v663_v24 = vmin.f32 %v661_v21, %v662_v22 }
 0x8d1   :  { %v664_v25 = vrot.slane %v663_v24, 1 }
 0x8d3   :  { %v665_v26 = vmin.f32 %v663_v24, %v664_v25 }
 0x8d5   :  { %vm666_vm11 = vcmp.le.f32.partialorder %v658_v18, %v665_v26 }
 0x8d6   :  { %v667_v27 = vsel %vm666_vm11, %v2668_v23, 8.0 }
 0x8d7   :  { %v668_v28 = vsel %vm84_vm2, %v667_v27, inf }
 0x8d8   :  { %v669_v29 = vrot.slane %v668_v28, 4 }
 0x8da   :  { %v670_v30 = vmin.f32 %v668_v28, %v669_v29 }
 0x8dc   :  { %v671_v31 = vrot.slane %v670_v30, 2 }
 0x8de   :  { %v672_v32 = vmin.f32 %v670_v30, %v671_v31 }
 0x8e0   :  { %v673_v34 = vrot.slane %v672_v32, 1 }
 0x8e2   :  { %v674_v35 = vmin.f32 %v672_v32, %v673_v34 }
 0x8e4   :  { %vm675_vm12 = vcmp.eq.f32.partialorder %v2668_v23, %v674_v35 }
 0x8e5   :  { %v2212_v36 = vsel %vm675_vm12, 1.0, %v2486_v33 }
 0x8e6   :  { %2213 = vmatmul.msk.f32.vlgmr.msra.gmra.mxu2 %vm84_vm2, %v2212_v36  ;;  %v678_v37 = vsel %vm84_vm2, %v2212_v36, 0.0 }
 0x8e7   :  { %679 = vadd.xlane.f32.xlu0 %v678_v37  ;;  %1020 = vmatpush.msra.mxu2 %v2506_v0 }
 0x8e9   :  { %1021 = vmatpush.msra.mxu2 %v2514_v1 }
 0x8eb   :  { %1022 = vmatpush.msra.mxu2 %v2529_v4 }
 0x8ed   :  { %1023 = vmatpush.msra.mxu2 %v2540_v6 }
 0x8ef   :  { %1024 = vmatpush.msra.mxu2 %v2548_v7 }
 0x8f1   :  { %1025 = vmatpush.msra.mxu2 %v2557_v8 }
 0x8f3   :  { %1026 = vmatpush.msra.mxu2 %v2565_v9 }
 0x8f5   :  { %1027 = vmatpush.msra.mxu2 %v2519_v2 }
 0x95a   :  { %v680_v38 = vpop.xlane.xlu0 %679 }
 0x95b   :  { %v704_v39 = vmax.f32 %v680_v38, 1.0  ;;  %vm706_vm13 = vcmp.gt.f32.partialorder %v680_v38, 0.5 }
 0x95d   :  { %2416 = vrcp.f32 %v704_v39 }
 0x963   :  { %v2417_v40 = vpop.eup %2416 }
 0x969   :  { %v701_v41 = vpop.f32.mrf.mxu2 }
 0x96a   :  { %v707_v0 = vmul.f32 %v2417_v40, %v701_v41 }
 0x96c   :  { %v2930_v1 = vsel %vm706_vm13, %v707_v0, %v628_v5  ;;  %v2994_v5 = vld [vmem:[%s3539_s0 + $0x18] sm:$0xff] }
 0x96d   :  { %2222 = vmatmul.msk.f32.vlgmr.msrb.gmra.mxu3 %vm33_vm0, %v2930_v1  ;;  %v711_v42 = vmul.f32 %v2930_v1, %v2930_v1 }
 0x96e   :  { %2258 = vmatpush.xpose.msk.msrb.mxu3 %vm33_vm0, %v2939_v43 }
 0x96f   :  { %v712_v2 = vsel %vm33_vm0, %v711_v42, 0.0 }
 0x970   :  { %713 = vadd.xlane.f32.xlu1 %v712_v2 }
 0x972   :  { %2259 = vmatpush.xpose.msk.msrb.mxu3 %vm33_vm0, %v2947_v44 }
 0x976   :  { %2260 = vmatpush.xpose.msk.msrb.mxu3 %vm33_vm0, %v2529_v4 }
 0x97a   :  { %2261 = vmatpush.xpose.msk.msrb.mxu3 %vm33_vm0, %v2540_v6 }
 0x97e   :  { %2262 = vmatpush.xpose.msk.msrb.mxu3 %vm33_vm0, %v2548_v7 }
 0x982   :  { %2263 = vmatpush.xpose.msk.msrb.mxu3 %vm33_vm0, %v2557_v8 }
 0x986   :  { %2264 = vmatpush.xpose.msk.msrb.mxu3 %vm33_vm0, %v2565_v9 }
 0x98a   :  { %2265 = vmatpush.xpose.msk.msrb.mxu3 %vm33_vm0, %v2964_v45 }
 0x9e3   :  { %v714_v6 = vpop.xlane.xlu1 %713 }
 0x9f0   :  { %v735_v4 = vpop.f32.mrf.mxu3 }
 0x9f1   :  { %v738_v46 = vmul.f32 2.0, %v735_v4 }
 0x9f3   :  { %v739_v47 = vsub.f32 %v714_v6, %v738_v46 }
 0x9f5   :  { %v740_v7 = vsel %vm31_vm1, 1e+30, %v739_v47 }
 0x9f6   :  { %v741_v8 = vsel %vm84_vm2, %v740_v7, inf }
 0x9f7   :  { %v742_v48 = vrot.slane %v741_v8, 4 }
 0x9f9   :  { %v743_v49 = vmin.f32 %v741_v8, %v742_v48 }
 0x9fb   :  { %v744_v9 = vrot.slane %v743_v49, 2 }
 0x9fd   :  { %v745_v50 = vmin.f32 %v743_v49, %v744_v9 }
 0x9ff   :  { %v746_v51 = vrot.slane %v745_v50, 1 }
 0xa01   :  { %v747_v52 = vmin.f32 %v745_v50, %v746_v51 }
 0xa03   :  { %vm748_vm14 = vcmp.le.f32.partialorder %v740_v7, %v747_v52 }
 0xa04   :  { %v749_v53 = vsel %vm748_vm14, %v2668_v23, 8.0 }
 0xa05   :  { %v750_v54 = vsel %vm84_vm2, %v749_v53, inf }
 0xa06   :  { %v751_v55 = vrot.slane %v750_v54, 4 }
 0xa08   :  { %v752_v56 = vmin.f32 %v750_v54, %v751_v55 }
 0xa0a   :  { %v753_v57 = vrot.slane %v752_v56, 2 }
 0xa0c   :  { %v754_v58 = vmin.f32 %v752_v56, %v753_v57 }
 0xa0e   :  { %v755_v59 = vrot.slane %v754_v58, 1 }
 0xa10   :  { %v756_v60 = vmin.f32 %v754_v58, %v755_v59 }
 0xa12   :  { %vm757_vm15 = vcmp.eq.f32.partialorder %v2668_v23, %v756_v60 }
 0xa13   :  { %v2223_v61 = vsel %vm757_vm15, 1.0, %v2486_v33 }
 0xa14   :  { %2224 = vmatmul.msk.f32.vlgmr.msra.gmra.mxu1 %vm84_vm2, %v2223_v61  ;;  %v760_v62 = vsel %vm84_vm2, %v2223_v61, 0.0 }
 0xa15   :  { %761 = vadd.xlane.f32.xlu2 %v760_v62  ;;  %1102 = vmatpush.msra.mxu1 %v2939_v43 }
 0xa17   :  { %1103 = vmatpush.msra.mxu1 %v2947_v44 }
 0xa19   :  { %1104 = vmatpush.msra.mxu1 %v2982_v63 }
 0xa1b   :  { %1105 = vmatpush.msra.mxu1 %v2988_v3 }
 0xa1d   :  { %1106 = vmatpush.msra.mxu1 %v2994_v5 }
 0xa1f   :  { %1107 = vmatpush.msra.mxu1 %v3000_v12 }
 0xa21   :  { %1108 = vmatpush.msra.mxu1 %v3006_v13 }
 0xa23   :  { %1109 = vmatpush.msra.mxu1 %v2964_v45 }
 0xa88   :  { %v762_v14 = vpop.xlane.xlu2 %761 }
 0xa89   :  { %v786_v15 = vmax.f32 %v762_v14, 1.0  ;;  %vm788_vm3 = vcmp.gt.f32.partialorder %v762_v14, 0.5 }
 0xa8b   :  { %2418 = vrcp.f32 %v786_v15 }
 0xa91   :  { %v2419_v16 = vpop.eup %2418  ;;  %v783_v17 = vpop.f32.mrf.mxu1 }
 0xa92   :  { %v789_v18 = vmul.f32 %v2419_v16, %v783_v17 }
 0xa94   :  { %v792_v19 = vsel %vm788_vm3, %v789_v18, %v2930_v1 }
 0xa95   :  { %2233 = vmatmul.msk.f32.vlgmr.msrb.gmra.mxu2 %vm33_vm0, %v792_v19  ;;  %v793_v20 = vmul.f32 %v792_v19, %v792_v19 }
 0xa96   :  { %2269 = vmatpush.xpose.msk.msrb.mxu2 %vm33_vm0, %v2939_v43 }
 0xa97   :  { %v794_v21 = vsel %vm33_vm0, %v793_v20, 0.0 }
 0xa98   :  { %795 = vadd.xlane.f32.xlu0 %v794_v21 }
 0xa9a   :  { %2270 = vmatpush.xpose.msk.msrb.mxu2 %vm33_vm0, %v2947_v44 }
 0xa9e   :  { %2271 = vmatpush.xpose.msk.msrb.mxu2 %vm33_vm0, %v2982_v63 }
 0xaa2   :  { %2272 = vmatpush.xpose.msk.msrb.mxu2 %vm33_vm0, %v2988_v3 }
 0xaa6   :  { %2273 = vmatpush.xpose.msk.msrb.mxu2 %vm33_vm0, %v2994_v5 }
 0xaaa   :  { %2274 = vmatpush.xpose.msk.msrb.mxu2 %vm33_vm0, %v3000_v12 }
 0xaae   :  { %2275 = vmatpush.xpose.msk.msrb.mxu2 %vm33_vm0, %v3006_v13 }
 0xab2   :  { %2276 = vmatpush.xpose.msk.msrb.mxu2 %vm33_vm0, %v2964_v45 }
 0xb0b   :  { %v796_v25 = vpop.xlane.xlu0 %795 }
 0xb18   :  { %v817_v22 = vpop.f32.mrf.mxu2 }
 0xb19   :  { %v820_v24 = vmul.f32 2.0, %v817_v22 }
 0xb1b   :  { %v821_v26 = vsub.f32 %v796_v25, %v820_v24 }
 0xb1d   :  { %v822_v27 = vsel %vm31_vm1, 1e+30, %v821_v26 }
 0xb1e   :  { %v823_v28 = vsel %vm84_vm2, %v822_v27, inf }
 0xb1f   :  { %v824_v29 = vrot.slane %v823_v28, 4 }
 0xb21   :  { %v825_v30 = vmin.f32 %v823_v28, %v824_v29 }
 0xb23   :  { %v826_v31 = vrot.slane %v825_v30, 2 }
 0xb25   :  { %v827_v32 = vmin.f32 %v825_v30, %v826_v31 }
 0xb27   :  { %v828_v34 = vrot.slane %v827_v32, 1 }
 0xb29   :  { %v829_v35 = vmin.f32 %v827_v32, %v828_v34 }
 0xb2b   :  { %vm830_vm4 = vcmp.le.f32.partialorder %v822_v27, %v829_v35 }
 0xb2c   :  { %v831_v36 = vsel %vm830_vm4, %v2668_v23, 8.0 }
 0xb2d   :  { %v832_v37 = vsel %vm84_vm2, %v831_v36, inf }
 0xb2e   :  { %v833_v38 = vrot.slane %v832_v37, 4 }
 0xb30   :  { %v834_v39 = vmin.f32 %v832_v37, %v833_v38 }
 0xb32   :  { %v835_v40 = vrot.slane %v834_v39, 2 }
 0xb34   :  { %v836_v41 = vmin.f32 %v834_v39, %v835_v40 }
 0xb36   :  { %v837_v0 = vrot.slane %v836_v41, 1 }
 0xb38   :  { %v838_v1 = vmin.f32 %v836_v41, %v837_v0 }
 0xb3a   :  { %vm839_vm5 = vcmp.eq.f32.partialorder %v2668_v23, %v838_v1 }
 0xb3b   :  { %v2234_v42 = vsel %vm839_vm5, 1.0, %v2486_v33 }
 0xb3c   :  { %2235 = vmatmul.msk.f32.vlgmr.msra.gmra.mxu0 %vm84_vm2, %v2234_v42  ;;  %v842_v2 = vsel %vm84_vm2, %v2234_v42, 0.0 }
 0xb3d   :  { %843 = vadd.xlane.f32.xlu1 %v842_v2  ;;  %1184 = vmatpush.msra.mxu0 %v2939_v43 }
 0xb3f   :  { %1185 = vmatpush.msra.mxu0 %v2947_v44 }
 0xb41   :  { %1186 = vmatpush.msra.mxu0 %v2982_v63 }
 0xb43   :  { %1187 = vmatpush.msra.mxu0 %v2988_v3 }
 0xb45   :  { %1188 = vmatpush.msra.mxu0 %v2994_v5 }
 0xb47   :  { %1189 = vmatpush.msra.mxu0 %v3000_v12 }
 0xb49   :  { %1190 = vmatpush.msra.mxu0 %v3006_v13 }
 0xb4b   :  { %1191 = vmatpush.msra.mxu0 %v2964_v45 }
 0xbb0   :  { %v844_v4 = vpop.xlane.xlu1 %843 }
 0xbb1   :  { %v868_v46 = vmax.f32 %v844_v4, 1.0  ;;  %vm870_vm6 = vcmp.gt.f32.partialorder %v844_v4, 0.5 }
 0xbb3   :  { %2420 = vrcp.f32 %v868_v46 }
 0xbb9   :  { %v2421_v6 = vpop.eup %2420  ;;  %v865_v47 = vpop.f32.mrf.mxu0 }
 0xbba   :  { %v871_v7 = vmul.f32 %v2421_v6, %v865_v47 }
 0xbbc   :  { %v874_v8 = vsel %vm870_vm6, %v871_v7, %v792_v19 }
 0xbbd   :  { %2244 = vmatmul.msk.f32.vlgmr.msrb.gmra.mxu1 %vm33_vm0, %v874_v8  ;;  %v875_v48 = vmul.f32 %v874_v8, %v874_v8 }
 0xbbe   :  { %2280 = vmatpush.xpose.msk.msrb.mxu1 %vm33_vm0, %v2939_v43 }
 0xbbf   :  { %v876_v49 = vsel %vm33_vm0, %v875_v48, 0.0 }
 0xbc0   :  { %877 = vadd.xlane.f32.xlu2 %v876_v49 }
 0xbc2   :  { %2281 = vmatpush.xpose.msk.msrb.mxu1 %vm33_vm0, %v2947_v44 }
 0xbc6   :  { %2282 = vmatpush.xpose.msk.msrb.mxu1 %vm33_vm0, %v2982_v63 }
 0xbca   :  { %2283 = vmatpush.xpose.msk.msrb.mxu1 %vm33_vm0, %v2988_v3 }
 0xbce   :  { %2284 = vmatpush.xpose.msk.msrb.mxu1 %vm33_vm0, %v2994_v5 }
 0xbd2   :  { %2285 = vmatpush.xpose.msk.msrb.mxu1 %vm33_vm0, %v3000_v12 }
 0xbd6   :  { %2286 = vmatpush.xpose.msk.msrb.mxu1 %vm33_vm0, %v3006_v13 }
 0xbda   :  { %2287 = vmatpush.xpose.msk.msrb.mxu1 %vm33_vm0, %v2964_v45 }
 0xc33   :  { %v878_v51 = vpop.xlane.xlu2 %877 }
 0xc3a   :  { %v899_v9 = vpop.f32.mrf.mxu1 }
 0xc3b   :  { %v902_v50 = vmul.f32 2.0, %v899_v9 }
 0xc3d   :  { %v903_v52 = vsub.f32 %v878_v51, %v902_v50 }
 0xc3f   :  { %v904_v53 = vsel %vm31_vm1, 1e+30, %v903_v52 }
 0xc40   :  { %v905_v54 = vsel %vm84_vm2, %v904_v53, inf }
 0xc41   :  { %v906_v55 = vrot.slane %v905_v54, 4 }
 0xc43   :  { %v907_v56 = vmin.f32 %v905_v54, %v906_v55 }
 0xc45   :  { %v908_v57 = vrot.slane %v907_v56, 2 }
 0xc47   :  { %v909_v58 = vmin.f32 %v907_v56, %v908_v57 }
 0xc49   :  { %v910_v59 = vrot.slane %v909_v58, 1 }
 0xc4b   :  { %v911_v60 = vmin.f32 %v909_v58, %v910_v59 }
 0xc4d   :  { %vm912_vm7 = vcmp.le.f32.partialorder %v904_v53, %v911_v60 }
 0xc4e   :  { %v913_v61 = vsel %vm912_vm7, %v2668_v23, 8.0 }
 0xc4f   :  { %v914_v62 = vsel %vm84_vm2, %v913_v61, inf }
 0xc50   :  { %v915_v14 = vrot.slane %v914_v62, 4 }
 0xc52   :  { %v916_v15 = vmin.f32 %v914_v62, %v915_v14 }
 0xc54   :  { %v917_v16 = vrot.slane %v916_v15, 2 }
 0xc56   :  { %v918_v17 = vmin.f32 %v916_v15, %v917_v16 }
 0xc58   :  { %v919_v18 = vrot.slane %v918_v17, 1 }
 0xc5a   :  { %v920_v19 = vmin.f32 %v918_v17, %v919_v18 }
 0xc5c   :  { %vm921_vm8 = vcmp.eq.f32.partialorder %v2668_v23, %v920_v19 }
 0xc5d   :  { %v2245_v20 = vsel %vm921_vm8, 1.0, %v2486_v33 }
 0xc5e   :  { %2246 = vmatmul.msk.f32.vlgmr.msra.gmra.mxu3 %vm84_vm2, %v2245_v20  ;;  %v924_v21 = vsel %vm84_vm2, %v2245_v20, 0.0 }
 0xc5f   :  { %925 = vadd.xlane.f32.xlu0 %v924_v21  ;;  %1266 = vmatpush.msra.mxu3 %v2939_v43 }
 0xc61   :  { %1267 = vmatpush.msra.mxu3 %v2947_v44 }
 0xc63   :  { %1268 = vmatpush.msra.mxu3 %v2982_v63 }
 0xc65   :  { %1269 = vmatpush.msra.mxu3 %v2988_v3 }
 0xc67   :  { %1270 = vmatpush.msra.mxu3 %v2994_v5 }
 0xc69   :  { %1271 = vmatpush.msra.mxu3 %v3000_v12 }
 0xc6b   :  { %1272 = vmatpush.msra.mxu3 %v3006_v13 }
 0xc6d   :  { %1273 = vmatpush.msra.mxu3 %v2964_v45 }
 0xcd2   :  { %v926_v22 = vpop.xlane.xlu0 %925 }
 0xcd3   :  { %v950_v24 = vmax.f32 %v926_v22, 1.0  ;;  %vm952_vm9 = vcmp.gt.f32.partialorder %v926_v22, 0.5 }
 0xcd5   :  { %2422 = vrcp.f32 %v950_v24 }
 0xcdb   :  { %v2423_v25 = vpop.eup %2422 }
 0xce1   :  { %v947_v26 = vpop.f32.mrf.mxu3 }
 0xce2   :  { %v953_v27 = vmul.f32 %v2423_v25, %v947_v26 }
 0xce4   :  { %v956_v28 = vsel %vm952_vm9, %v953_v27, %v874_v8 }
 0xce5   :  { %2255 = vmatmul.msk.f32.vlgmr.msrb.gmra.mxu0 %vm33_vm0, %v956_v28  ;;  %v957_v29 = vmul.f32 %v956_v28, %v956_v28 }
 0xce6   :  { %2291 = vmatpush.xpose.msk.msrb.mxu0 %vm33_vm0, %v2939_v43 }
 0xce7   :  { %v958_v30 = vsel %vm33_vm0, %v957_v29, 0.0 }
 0xce8   :  { %959 = vadd.xlane.f32.xlu1 %v958_v30 }
 0xcea   :  { %2292 = vmatpush.xpose.msk.msrb.mxu0 %vm33_vm0, %v2947_v44 }
 0xcee   :  { %2293 = vmatpush.xpose.msk.msrb.mxu0 %vm33_vm0, %v2982_v63 }
 0xcf2   :  { %2294 = vmatpush.xpose.msk.msrb.mxu0 %vm33_vm0, %v2988_v3 }
 0xcf6   :  { %2295 = vmatpush.xpose.msk.msrb.mxu0 %vm33_vm0, %v2994_v5 }
 0xcfa   :  { %2296 = vmatpush.xpose.msk.msrb.mxu0 %vm33_vm0, %v3000_v12 }
 0xcfe   :  { %2297 = vmatpush.xpose.msk.msrb.mxu0 %vm33_vm0, %v3006_v13 }
 0xd02   :  { %2298 = vmatpush.xpose.msk.msrb.mxu0 %vm33_vm0, %v2964_v45 }
 0xd5b   :  { %v960_v34 = vpop.xlane.xlu1 %959 }
 0xd62   :  { %v981_v31 = vpop.f32.mrf.mxu0 }
 0xd63   :  { %v984_v32 = vmul.f32 2.0, %v981_v31 }
 0xd65   :  { %v985_v35 = vsub.f32 %v960_v34, %v984_v32 }
 0xd67   :  { %v986_v36 = vsel %vm31_vm1, 1e+30, %v985_v35 }
 0xd68   :  { %v987_v37 = vsel %vm84_vm2, %v986_v36, inf }
 0xd69   :  { %v988_v38 = vrot.slane %v987_v37, 4 }
 0xd6b   :  { %v989_v39 = vmin.f32 %v987_v37, %v988_v38 }
 0xd6d   :  { %v990_v40 = vrot.slane %v989_v39, 2 }
 0xd6f   :  { %v991_v41 = vmin.f32 %v989_v39, %v990_v40 }
 0xd71   :  { %v992_v0 = vrot.slane %v991_v41, 1 }
 0xd73   :  { %v993_v1 = vmin.f32 %v991_v41, %v992_v0 }
 0xd75   :  { %vm994_vm10 = vcmp.le.f32.partialorder %v986_v36, %v993_v1 }
 0xd76   :  { %v995_v42 = vsel %vm994_vm10, %v2668_v23, 8.0 }
 0xd77   :  { %v996_v2 = vsel %vm84_vm2, %v995_v42, inf }
 0xd78   :  { %v997_v4 = vrot.slane %v996_v2, 4 }
 0xd7a   :  { %v998_v46 = vmin.f32 %v996_v2, %v997_v4 }
 0xd7c   :  { %v999_v6 = vrot.slane %v998_v46, 2 }
 0xd7e   :  { %v1000_v47 = vmin.f32 %v998_v46, %v999_v6 }
 0xd80   :  { %v1001_v7 = vrot.slane %v1000_v47, 1 }
 0xd82   :  { %v1002_v8 = vmin.f32 %v1000_v47, %v1001_v7 }
 0xd84   :  { %vm1003_vm11 = vcmp.eq.f32.partialorder %v2668_v23, %v1002_v8 }
 0xd85   :  { %v2256_v48 = vsel %vm1003_vm11, 1.0, %v2486_v33 }
 0xd86   :  { %2257 = vmatmul.msk.f32.vlgmr.msra.gmra.mxu2 %vm84_vm2, %v2256_v48  ;;  %v1006_v49 = vsel %vm84_vm2, %v2256_v48, 0.0 }
 0xd87   :  { %1007 = vadd.xlane.f32.xlu2 %v1006_v49  ;;  %1348 = vmatpush.msra.mxu2 %v2939_v43 }
 0xd89   :  { %1349 = vmatpush.msra.mxu2 %v2947_v44 }
 0xd8b   :  { %1350 = vmatpush.msra.mxu2 %v2982_v63 }
 0xd8d   :  { %1351 = vmatpush.msra.mxu2 %v2988_v3 }
 0xd8f   :  { %1352 = vmatpush.msra.mxu2 %v2994_v5 }
 0xd91   :  { %1353 = vmatpush.msra.mxu2 %v3000_v12 }
 0xd93   :  { %1354 = vmatpush.msra.mxu2 %v3006_v13 }
 0xd95   :  { %1355 = vmatpush.msra.mxu2 %v2964_v45 }
 0xdfa   :  { %v1008_v9 = vpop.xlane.xlu2 %1007 }
 0xdfb   :  { %v1032_v50 = vmax.f32 %v1008_v9, 1.0  ;;  %vm1034_vm12 = vcmp.gt.f32.partialorder %v1008_v9, 0.5 }
 0xdfd   :  { %2424 = vrcp.f32 %v1032_v50 }
 0xe03   :  { %v2425_v51 = vpop.eup %2424 }
 0xe09   :  { %v1029_v52 = vpop.f32.mrf.mxu2 }
 0xe0a   :  { %v1035_v53 = vmul.f32 %v2425_v51, %v1029_v52 }
 0xe0c   :  { %v1038_v54 = vsel %vm1034_vm12, %v1035_v53, %v956_v28 }
 0xe0d   :  { %2266 = vmatmul.msk.f32.vlgmr.msrb.gmra.mxu3 %vm33_vm0, %v1038_v54  ;;  %v1039_v55 = vmul.f32 %v1038_v54, %v1038_v54 }
 0xe0e   :  { %2302 = vmatpush.xpose.msk.msrb.mxu3 %vm33_vm0, %v2939_v43 }
 0xe0f   :  { %v1040_v56 = vsel %vm33_vm0, %v1039_v55, 0.0 }
 0xe10   :  { %1041 = vadd.xlane.f32.xlu0 %v1040_v56 }
 0xe12   :  { %2303 = vmatpush.xpose.msk.msrb.mxu3 %vm33_vm0, %v2947_v44 }
 0xe16   :  { %2304 = vmatpush.xpose.msk.msrb.mxu3 %vm33_vm0, %v2982_v63 }
 0xe1a   :  { %2305 = vmatpush.xpose.msk.msrb.mxu3 %vm33_vm0, %v2988_v3 }
 0xe1e   :  { %2306 = vmatpush.xpose.msk.msrb.mxu3 %vm33_vm0, %v2994_v5 }
 0xe22   :  { %2307 = vmatpush.xpose.msk.msrb.mxu3 %vm33_vm0, %v3000_v12 }
 0xe26   :  { %2308 = vmatpush.xpose.msk.msrb.mxu3 %vm33_vm0, %v3006_v13 }
 0xe2a   :  { %2309 = vmatpush.xpose.msk.msrb.mxu3 %vm33_vm0, %v2964_v45 }
 0xe83   :  { %v1042_v59 = vpop.xlane.xlu0 %1041 }
 0xe90   :  { %v1063_v57 = vpop.f32.mrf.mxu3 }
 0xe91   :  { %v1066_v58 = vmul.f32 2.0, %v1063_v57 }
 0xe93   :  { %v1067_v60 = vsub.f32 %v1042_v59, %v1066_v58 }
 0xe95   :  { %v1068_v61 = vsel %vm31_vm1, 1e+30, %v1067_v60 }
 0xe96   :  { %v1069_v62 = vsel %vm84_vm2, %v1068_v61, inf }
 0xe97   :  { %v1070_v14 = vrot.slane %v1069_v62, 4 }
 0xe99   :  { %v1071_v15 = vmin.f32 %v1069_v62, %v1070_v14 }
 0xe9b   :  { %v1072_v16 = vrot.slane %v1071_v15, 2 }
 0xe9d   :  { %v1073_v17 = vmin.f32 %v1071_v15, %v1072_v16 }
 0xe9f   :  { %v1074_v18 = vrot.slane %v1073_v17, 1 }
 0xea1   :  { %v1075_v19 = vmin.f32 %v1073_v17, %v1074_v18 }
 0xea3   :  { %vm1076_vm13 = vcmp.le.f32.partialorder %v1068_v61, %v1075_v19 }
 0xea4   :  { %v1077_v20 = vsel %vm1076_vm13, %v2668_v23, 8.0 }
 0xea5   :  { %v1078_v21 = vsel %vm84_vm2, %v1077_v20, inf }
 0xea6   :  { %v1079_v22 = vrot.slane %v1078_v21, 4 }
 0xea8   :  { %v1080_v24 = vmin.f32 %v1078_v21, %v1079_v22 }
 0xeaa   :  { %v1081_v25 = vrot.slane %v1080_v24, 2 }
 0xeac   :  { %v1082_v26 = vmin.f32 %v1080_v24, %v1081_v25 }
 0xeae   :  { %v1083_v27 = vrot.slane %v1082_v26, 1 }
 0xeb0   :  { %v1084_v28 = vmin.f32 %v1082_v26, %v1083_v27 }
 0xeb2   :  { %vm1085_vm14 = vcmp.eq.f32.partialorder %v2668_v23, %v1084_v28 }
 0xeb3   :  { %v2267_v29 = vsel %vm1085_vm14, 1.0, %v2486_v33 }
 0xeb4   :  { %2268 = vmatmul.msk.f32.vlgmr.msra.gmra.mxu1 %vm84_vm2, %v2267_v29  ;;  %v1088_v30 = vsel %vm84_vm2, %v2267_v29, 0.0 }
 0xeb5   :  { %1089 = vadd.xlane.f32.xlu1 %v1088_v30  ;;  %1430 = vmatpush.msra.mxu1 %v2939_v43 }
 0xeb7   :  { %1431 = vmatpush.msra.mxu1 %v2947_v44 }
 0xeb9   :  { %1432 = vmatpush.msra.mxu1 %v2982_v63 }
 0xebb   :  { %1433 = vmatpush.msra.mxu1 %v2988_v3 }
 0xebd   :  { %1434 = vmatpush.msra.mxu1 %v2994_v5 }
 0xebf   :  { %1435 = vmatpush.msra.mxu1 %v3000_v12 }
 0xec1   :  { %1436 = vmatpush.msra.mxu1 %v3006_v13 }
 0xec3   :  { %1437 = vmatpush.msra.mxu1 %v2964_v45 }
 0xf28   :  { %v1090_v31 = vpop.xlane.xlu1 %1089 }
 0xf29   :  { %v1114_v32 = vmax.f32 %v1090_v31, 1.0  ;;  %vm1116_vm15 = vcmp.gt.f32.partialorder %v1090_v31, 0.5 }
 0xf2b   :  { %2426 = vrcp.f32 %v1114_v32 }
 0xf31   :  { %v2427_v34 = vpop.eup %2426  ;;  %v1111_v35 = vpop.f32.mrf.mxu1 }
 0xf32   :  { %v1117_v36 = vmul.f32 %v2427_v34, %v1111_v35 }
 0xf34   :  { %v1120_v37 = vsel %vm1116_vm15, %v1117_v36, %v1038_v54 }
 0xf35   :  { %2277 = vmatmul.msk.f32.vlgmr.msrb.gmra.mxu2 %vm33_vm0, %v1120_v37  ;;  %v1121_v38 = vmul.f32 %v1120_v37, %v1120_v37 }
 0xf36   :  { %2313 = vmatpush.xpose.msk.msrb.mxu2 %vm33_vm0, %v2939_v43 }
 0xf37   :  { %v1122_v39 = vsel %vm33_vm0, %v1121_v38, 0.0 }
 0xf38   :  { %1123 = vadd.xlane.f32.xlu2 %v1122_v39 }
 0xf3a   :  { %2314 = vmatpush.xpose.msk.msrb.mxu2 %vm33_vm0, %v2947_v44 }
 0xf3e   :  { %2315 = vmatpush.xpose.msk.msrb.mxu2 %vm33_vm0, %v2982_v63 }
 0xf42   :  { %2316 = vmatpush.xpose.msk.msrb.mxu2 %vm33_vm0, %v2988_v3 }
 0xf46   :  { %2317 = vmatpush.xpose.msk.msrb.mxu2 %vm33_vm0, %v2994_v5 }
 0xf4a   :  { %2318 = vmatpush.xpose.msk.msrb.mxu2 %vm33_vm0, %v3000_v12 }
 0xf4e   :  { %2319 = vmatpush.xpose.msk.msrb.mxu2 %vm33_vm0, %v3006_v13 }
 0xf52   :  { %2320 = vmatpush.xpose.msk.msrb.mxu2 %vm33_vm0, %v2964_v45 }
 0xfab   :  { %v1124_v0 = vpop.xlane.xlu2 %1123 }
 0xfb8   :  { %v1145_v40 = vpop.f32.mrf.mxu2 }
 0xfb9   :  { %v1148_v41 = vmul.f32 2.0, %v1145_v40 }
 0xfbb   :  { %v1149_v1 = vsub.f32 %v1124_v0, %v1148_v41 }
 0xfbd   :  { %v1150_v42 = vsel %vm31_vm1, 1e+30, %v1149_v1 }
 0xfbe   :  { %v1151_v2 = vsel %vm84_vm2, %v1150_v42, inf }
 0xfbf   :  { %v1152_v4 = vrot.slane %v1151_v2, 4 }
 0xfc1   :  { %v1153_v46 = vmin.f32 %v1151_v2, %v1152_v4 }
 0xfc3   :  { %v1154_v6 = vrot.slane %v1153_v46, 2 }
 0xfc5   :  { %v1155_v47 = vmin.f32 %v1153_v46, %v1154_v6 }
 0xfc7   :  { %v1156_v7 = vrot.slane %v1155_v47, 1 }
 0xfc9   :  { %v1157_v8 = vmin.f32 %v1155_v47, %v1156_v7 }
 0xfcb   :  { %vm1158_vm3 = vcmp.le.f32.partialorder %v1150_v42, %v1157_v8 }
 0xfcc   :  { %v1159_v48 = vsel %vm1158_vm3, %v2668_v23, 8.0 }
 0xfcd   :  { %v1160_v49 = vsel %vm84_vm2, %v1159_v48, inf }
 0xfce   :  { %v1161_v9 = vrot.slane %v1160_v49, 4 }
 0xfd0   :  { %v1162_v50 = vmin.f32 %v1160_v49, %v1161_v9 }
 0xfd2   :  { %v1163_v51 = vrot.slane %v1162_v50, 2 }
 0xfd4   :  { %v1164_v52 = vmin.f32 %v1162_v50, %v1163_v51 }
 0xfd6   :  { %v1165_v53 = vrot.slane %v1164_v52, 1 }
 0xfd8   :  { %v1166_v54 = vmin.f32 %v1164_v52, %v1165_v53 }
 0xfda   :  { %vm1167_vm4 = vcmp.eq.f32.partialorder %v2668_v23, %v1166_v54 }
 0xfdb   :  { %v2278_v55 = vsel %vm1167_vm4, 1.0, %v2486_v33 }
 0xfdc   :  { %2279 = vmatmul.msk.f32.vlgmr.msra.gmra.mxu0 %vm84_vm2, %v2278_v55  ;;  %v1170_v56 = vsel %vm84_vm2, %v2278_v55, 0.0 }
 0xfdd   :  { %1171 = vadd.xlane.f32.xlu0 %v1170_v56  ;;  %1512 = vmatpush.msra.mxu0 %v2939_v43 }
 0xfdf   :  { %1513 = vmatpush.msra.mxu0 %v2947_v44 }
 0xfe1   :  { %1514 = vmatpush.msra.mxu0 %v2982_v63 }
 0xfe3   :  { %1515 = vmatpush.msra.mxu0 %v2988_v3 }
 0xfe5   :  { %1516 = vmatpush.msra.mxu0 %v2994_v5 }
 0xfe7   :  { %1517 = vmatpush.msra.mxu0 %v3000_v12 }
 0xfe9   :  { %1518 = vmatpush.msra.mxu0 %v3006_v13 }
 0xfeb   :  { %1519 = vmatpush.msra.mxu0 %v2964_v45 }
0x1050   :  { %v1172_v57 = vpop.xlane.xlu0 %1171 }
0x1051   :  { %v1196_v58 = vmax.f32 %v1172_v57, 1.0  ;;  %vm1198_vm5 = vcmp.gt.f32.partialorder %v1172_v57, 0.5 }
0x1053   :  { %2428 = vrcp.f32 %v1196_v58 }
0x1059   :  { %v2429_v59 = vpop.eup %2428  ;;  %v1193_v60 = vpop.f32.mrf.mxu0 }
0x105a   :  { %v1199_v61 = vmul.f32 %v2429_v59, %v1193_v60 }
0x105c   :  { %v1202_v62 = vsel %vm1198_vm5, %v1199_v61, %v1120_v37 }
0x105d   :  { %2288 = vmatmul.msk.f32.vlgmr.msrb.gmra.mxu1 %vm33_vm0, %v1202_v62  ;;  %v1203_v14 = vmul.f32 %v1202_v62, %v1202_v62 }
0x105e   :  { %2324 = vmatpush.xpose.msk.msrb.mxu1 %vm33_vm0, %v2939_v43 }
0x105f   :  { %v1204_v15 = vsel %vm33_vm0, %v1203_v14, 0.0 }
0x1060   :  { %1205 = vadd.xlane.f32.xlu1 %v1204_v15 }
0x1062   :  { %2325 = vmatpush.xpose.msk.msrb.mxu1 %vm33_vm0, %v2947_v44 }
0x1066   :  { %2326 = vmatpush.xpose.msk.msrb.mxu1 %vm33_vm0, %v2982_v63 }
0x106a   :  { %2327 = vmatpush.xpose.msk.msrb.mxu1 %vm33_vm0, %v2988_v3 }
0x106e   :  { %2328 = vmatpush.xpose.msk.msrb.mxu1 %vm33_vm0, %v2994_v5 }
0x1072   :  { %2329 = vmatpush.xpose.msk.msrb.mxu1 %vm33_vm0, %v3000_v12 }
0x1076   :  { %2330 = vmatpush.xpose.msk.msrb.mxu1 %vm33_vm0, %v3006_v13 }
0x107a   :  { %2331 = vmatpush.xpose.msk.msrb.mxu1 %vm33_vm0, %v2964_v45 }
0x10d3   :  { %v1206_v18 = vpop.xlane.xlu1 %1205 }
0x10da   :  { %v1227_v16 = vpop.f32.mrf.mxu1 }
0x10db   :  { %v1230_v17 = vmul.f32 2.0, %v1227_v16 }
0x10dd   :  { %v1231_v19 = vsub.f32 %v1206_v18, %v1230_v17 }
0x10df   :  { %v1232_v20 = vsel %vm31_vm1, 1e+30, %v1231_v19 }
0x10e0   :  { %v1233_v21 = vsel %vm84_vm2, %v1232_v20, inf }
0x10e1   :  { %v1234_v22 = vrot.slane %v1233_v21, 4 }
0x10e3   :  { %v1235_v24 = vmin.f32 %v1233_v21, %v1234_v22 }
0x10e5   :  { %v1236_v25 = vrot.slane %v1235_v24, 2 }
0x10e7   :  { %v1237_v26 = vmin.f32 %v1235_v24, %v1236_v25 }
0x10e9   :  { %v1238_v27 = vrot.slane %v1237_v26, 1 }
0x10eb   :  { %v1239_v28 = vmin.f32 %v1237_v26, %v1238_v27 }
0x10ed   :  { %vm1240_vm6 = vcmp.le.f32.partialorder %v1232_v20, %v1239_v28 }
0x10ee   :  { %v1241_v29 = vsel %vm1240_vm6, %v2668_v23, 8.0 }
0x10ef   :  { %v1242_v30 = vsel %vm84_vm2, %v1241_v29, inf }
0x10f0   :  { %v1243_v31 = vrot.slane %v1242_v30, 4 }
0x10f2   :  { %v1244_v32 = vmin.f32 %v1242_v30, %v1243_v31 }
0x10f4   :  { %v1245_v34 = vrot.slane %v1244_v32, 2 }
0x10f6   :  { %v1246_v35 = vmin.f32 %v1244_v32, %v1245_v34 }
0x10f8   :  { %v1247_v36 = vrot.slane %v1246_v35, 1 }
0x10fa   :  { %v1248_v37 = vmin.f32 %v1246_v35, %v1247_v36 }
0x10fc   :  { %vm1249_vm7 = vcmp.eq.f32.partialorder %v2668_v23, %v1248_v37 }
0x10fd   :  { %v2289_v38 = vsel %vm1249_vm7, 1.0, %v2486_v33 }
0x10fe   :  { %2290 = vmatmul.msk.f32.vlgmr.msra.gmra.mxu3 %vm84_vm2, %v2289_v38  ;;  %v1252_v39 = vsel %vm84_vm2, %v2289_v38, 0.0 }
0x10ff   :  { %1253 = vadd.xlane.f32.xlu2 %v1252_v39  ;;  %1594 = vmatpush.msra.mxu3 %v2939_v43 }
0x1101   :  { %1595 = vmatpush.msra.mxu3 %v2947_v44 }
0x1103   :  { %1596 = vmatpush.msra.mxu3 %v2982_v63 }
0x1105   :  { %1597 = vmatpush.msra.mxu3 %v2988_v3 }
0x1107   :  { %1598 = vmatpush.msra.mxu3 %v2994_v5 }
0x1109   :  { %1599 = vmatpush.msra.mxu3 %v3000_v12 }
0x110b   :  { %1600 = vmatpush.msra.mxu3 %v3006_v13 }
0x110d   :  { %1601 = vmatpush.msra.mxu3 %v2964_v45 }
0x1172   :  { %v1254_v40 = vpop.xlane.xlu2 %1253 }
0x1173   :  { %v1278_v41 = vmax.f32 %v1254_v40, 1.0  ;;  %vm1280_vm8 = vcmp.gt.f32.partialorder %v1254_v40, 0.5 }
0x1175   :  { %2430 = vrcp.f32 %v1278_v41 }
0x117b   :  { %v2431_v0 = vpop.eup %2430 }
0x1181   :  { %v1275_v1 = vpop.f32.mrf.mxu3 }
0x1182   :  { %v1281_v42 = vmul.f32 %v2431_v0, %v1275_v1 }
0x1184   :  { %v1284_v2 = vsel %vm1280_vm8, %v1281_v42, %v1202_v62 }
0x1185   :  { %2299 = vmatmul.msk.f32.vlgmr.msrb.gmra.mxu0 %vm33_vm0, %v1284_v2  ;;  %v1285_v4 = vmul.f32 %v1284_v2, %v1284_v2 }
0x1186   :  { %2335 = vmatpush.xpose.msk.msrb.mxu0 %vm33_vm0, %v2939_v43 }
0x1187   :  { %v1286_v46 = vsel %vm33_vm0, %v1285_v4, 0.0 }
0x1188   :  { %1287 = vadd.xlane.f32.xlu0 %v1286_v46 }
0x118a   :  { %2336 = vmatpush.xpose.msk.msrb.mxu0 %vm33_vm0, %v2947_v44 }
0x118e   :  { %2337 = vmatpush.xpose.msk.msrb.mxu0 %vm33_vm0, %v2982_v63 }
0x1192   :  { %2338 = vmatpush.xpose.msk.msrb.mxu0 %vm33_vm0, %v2988_v3 }
0x1196   :  { %2339 = vmatpush.xpose.msk.msrb.mxu0 %vm33_vm0, %v2994_v5 }
0x119a   :  { %2340 = vmatpush.xpose.msk.msrb.mxu0 %vm33_vm0, %v3000_v12 }
0x119e   :  { %2341 = vmatpush.xpose.msk.msrb.mxu0 %vm33_vm0, %v3006_v13 }
0x11a2   :  { %2342 = vmatpush.xpose.msk.msrb.mxu0 %vm33_vm0, %v2964_v45 }
0x11fb   :  { %v1288_v7 = vpop.xlane.xlu0 %1287 }
0x1202   :  { %v1309_v6 = vpop.f32.mrf.mxu0 }
0x1203   :  { %v1312_v47 = vmul.f32 2.0, %v1309_v6 }
0x1205   :  { %v1313_v8 = vsub.f32 %v1288_v7, %v1312_v47 }
0x1207   :  { %v1314_v48 = vsel %vm31_vm1, 1e+30, %v1313_v8 }
0x1208   :  { %v1315_v49 = vsel %vm84_vm2, %v1314_v48, inf }
0x1209   :  { %v1316_v9 = vrot.slane %v1315_v49, 4 }
0x120b   :  { %v1317_v50 = vmin.f32 %v1315_v49, %v1316_v9 }
0x120d   :  { %v1318_v51 = vrot.slane %v1317_v50, 2 }
0x120f   :  { %v1319_v52 = vmin.f32 %v1317_v50, %v1318_v51 }
0x1211   :  { %v1320_v53 = vrot.slane %v1319_v52, 1 }
0x1213   :  { %v1321_v54 = vmin.f32 %v1319_v52, %v1320_v53 }
0x1215   :  { %vm1322_vm9 = vcmp.le.f32.partialorder %v1314_v48, %v1321_v54 }
0x1216   :  { %v1323_v55 = vsel %vm1322_vm9, %v2668_v23, 8.0 }
0x1217   :  { %v1324_v56 = vsel %vm84_vm2, %v1323_v55, inf }
0x1218   :  { %v1325_v57 = vrot.slane %v1324_v56, 4 }
0x121a   :  { %v1326_v58 = vmin.f32 %v1324_v56, %v1325_v57 }
0x121c   :  { %v1327_v59 = vrot.slane %v1326_v58, 2 }
0x121e   :  { %v1328_v60 = vmin.f32 %v1326_v58, %v1327_v59 }
0x1220   :  { %v1329_v61 = vrot.slane %v1328_v60, 1 }
0x1222   :  { %v1330_v62 = vmin.f32 %v1328_v60, %v1329_v61 }
0x1224   :  { %vm1331_vm10 = vcmp.eq.f32.partialorder %v2668_v23, %v1330_v62 }
0x1225   :  { %v2300_v14 = vsel %vm1331_vm10, 1.0, %v2486_v33 }
0x1226   :  { %2301 = vmatmul.msk.f32.vlgmr.msra.gmra.mxu2 %vm84_vm2, %v2300_v14  ;;  %v1334_v15 = vsel %vm84_vm2, %v2300_v14, 0.0 }
0x1227   :  { %1335 = vadd.xlane.f32.xlu1 %v1334_v15  ;;  %1676 = vmatpush.msra.mxu2 %v2939_v43 }
0x1229   :  { %1677 = vmatpush.msra.mxu2 %v2947_v44 }
0x122b   :  { %1678 = vmatpush.msra.mxu2 %v2982_v63 }
0x122d   :  { %1679 = vmatpush.msra.mxu2 %v2988_v3 }
0x122f   :  { %1680 = vmatpush.msra.mxu2 %v2994_v5 }
0x1231   :  { %1681 = vmatpush.msra.mxu2 %v3000_v12 }
0x1233   :  { %1682 = vmatpush.msra.mxu2 %v3006_v13 }
0x1235   :  { %1683 = vmatpush.msra.mxu2 %v2964_v45 }
0x129a   :  { %v1336_v16 = vpop.xlane.xlu1 %1335 }
0x129b   :  { %v1360_v17 = vmax.f32 %v1336_v16, 1.0  ;;  %vm1362_vm11 = vcmp.gt.f32.partialorder %v1336_v16, 0.5 }
0x129d   :  { %2432 = vrcp.f32 %v1360_v17 }
0x12a3   :  { %v2433_v18 = vpop.eup %2432 }
0x12a9   :  { %v1357_v19 = vpop.f32.mrf.mxu2 }
0x12aa   :  { %v1363_v20 = vmul.f32 %v2433_v18, %v1357_v19 }
0x12ac   :  { %v1366_v21 = vsel %vm1362_vm11, %v1363_v20, %v1284_v2 }
0x12ad   :  { %2310 = vmatmul.msk.f32.vlgmr.msrb.gmra.mxu3 %vm33_vm0, %v1366_v21  ;;  %v1367_v22 = vmul.f32 %v1366_v21, %v1366_v21 }
0x12ae   :  { %2346 = vmatpush.xpose.msk.msrb.mxu3 %vm33_vm0, %v2939_v43 }
0x12af   :  { %v1368_v24 = vsel %vm33_vm0, %v1367_v22, 0.0 }
0x12b0   :  { %1369 = vadd.xlane.f32.xlu2 %v1368_v24 }
0x12b2   :  { %2347 = vmatpush.xpose.msk.msrb.mxu3 %vm33_vm0, %v2947_v44 }
0x12b6   :  { %2348 = vmatpush.xpose.msk.msrb.mxu3 %vm33_vm0, %v2982_v63 }
0x12ba   :  { %2349 = vmatpush.xpose.msk.msrb.mxu3 %vm33_vm0, %v2988_v3 }
0x12be   :  { %2350 = vmatpush.xpose.msk.msrb.mxu3 %vm33_vm0, %v2994_v5 }
0x12c2   :  { %2351 = vmatpush.xpose.msk.msrb.mxu3 %vm33_vm0, %v3000_v12 }
0x12c6   :  { %2352 = vmatpush.xpose.msk.msrb.mxu3 %vm33_vm0, %v3006_v13 }
0x12ca   :  { %2353 = vmatpush.xpose.msk.msrb.mxu3 %vm33_vm0, %v2964_v45 }
0x1323   :  { %v1370_v25 = vpop.xlane.xlu2 %1369 }
0x1330   :  { %v1391_v43 = vpop.f32.mrf.mxu3 }
0x1331   :  { %v1394_v44 = vmul.f32 2.0, %v1391_v43 }
0x1333   :  { %v1395_v26 = vsub.f32 %v1370_v25, %v1394_v44 }
0x1335   :  { %v1396_v63 = vsel %vm31_vm1, 1e+30, %v1395_v26 }
0x1336   :  { %v1397_v3 = vsel %vm84_vm2, %v1396_v63, inf }
0x1337   :  { %v1398_v27 = vrot.slane %v1397_v3, 4 }
0x1339   :  { %v1399_v5 = vmin.f32 %v1397_v3, %v1398_v27 }
0x133b   :  { %v1400_v28 = vrot.slane %v1399_v5, 2 }
0x133d   :  { %v1401_v29 = vmin.f32 %v1399_v5, %v1400_v28 }
0x133f   :  { %v1402_v12 = vrot.slane %v1401_v29, 1 }
0x1341   :  { %v1403_v30 = vmin.f32 %v1401_v29, %v1402_v12 }
0x1343   :  { %vm1404_vm12 = vcmp.le.f32.partialorder %v1396_v63, %v1403_v30 }
0x1344   :  { %v1405_v13 = vsel %vm1404_vm12, %v2668_v23, 8.0 }
0x1345   :  { %v1406_v45 = vsel %vm84_vm2, %v1405_v13, inf }
0x1346   :  { %v1407_v31 = vrot.slane %v1406_v45, 4 }
0x1348   :  { %v1408_v32 = vmin.f32 %v1406_v45, %v1407_v31 }
0x134a   :  { %v1409_v34 = vrot.slane %v1408_v32, 2 }
0x134c   :  { %v1410_v35 = vmin.f32 %v1408_v32, %v1409_v34 }
0x134e   :  { %v1411_v36 = vrot.slane %v1410_v35, 1 }
0x1350   :  { %v1412_v37 = vmin.f32 %v1410_v35, %v1411_v36 }
0x1352   :  { %vm1413_vm13 = vcmp.eq.f32.partialorder %v2668_v23, %v1412_v37 }
0x1353   :  { %v2311_v38 = vsel %vm1413_vm13, 1.0, %v2486_v33 }
0x1354   :  { %2312 = vmatmul.msk.f32.vlgmr.msra.gmra.mxu1 %vm84_vm2, %v2311_v38  ;;  %v1416_v39 = vsel %vm84_vm2, %v2311_v38, 0.0 }
0x1355   :  { %1417 = vadd.xlane.f32.xlu0 %v1416_v39 }
0x13c8   :  { %v1418_v40 = vpop.xlane.xlu0 %1417 }
0x13c9   :  { %v1442_v41 = vmax.f32 %v1418_v40, 1.0  ;;  %vm1444_vm14 = vcmp.gt.f32.partialorder %v1418_v40, 0.5 }
0x13cb   :  { %2434 = vrcp.f32 %v1442_v41 }
0x13d1   :  { %v2435_v0 = vpop.eup %2434  ;;  %v1439_v1 = vpop.f32.mrf.mxu1 }
0x13d2   :  { %v1445_v42 = vmul.f32 %v2435_v0, %v1439_v1 }
0x13d4   :  { %v1448_v2 = vsel %vm1444_vm14, %v1445_v42, %v1366_v21 }
0x13d5   :  { %2321 = vmatmul.msk.f32.vlgmr.msrb.gmra.mxu2 %vm33_vm0, %v1448_v2  ;;  %v1449_v4 = vmul.f32 %v1448_v2, %v1448_v2 }
0x13d7   :  { %v1450_v46 = vsel %vm33_vm0, %v1449_v4, 0.0 }
0x13d8   :  { %1451 = vadd.xlane.f32.xlu1 %v1450_v46 }
0x144b   :  { %v1452_v7 = vpop.xlane.xlu1 %1451 }
0x1458   :  { %v1473_v6 = vpop.f32.mrf.mxu2 }
0x1459   :  { %v1476_v47 = vmul.f32 2.0, %v1473_v6  ;;  %v3315_v6 = vld [vmem:[%s3540_s1] sm:$0xff] }
0x145b   :  { %v1477_v8 = vsub.f32 %v1452_v7, %v1476_v47  ;;  %v1747_v47 = vmul.f32 %v3315_v6, %v3315_v6 }
0x145d   :  { %v1478_v48 = vsel %vm31_vm1, 1e+30, %v1477_v8  ;;  %v1755_v7 = vsel %vm33_vm0, %v1747_v47, 0.0 }
0x145e   :  { %v1479_v49 = vsel %vm84_vm2, %v1478_v48, inf }
0x145f   :  { %v1480_v9 = vrot.slane %v1479_v49, 4 }
0x1461   :  { %v1481_v50 = vmin.f32 %v1479_v49, %v1480_v9  ;;  %v21_v49 = vld [vmem:[%s3540_s1 + $0x8] sm:$0xff] }
0x1463   :  { %v1482_v51 = vrot.slane %v1481_v50, 2 }
0x1465   :  { %v1483_v52 = vmin.f32 %v1481_v50, %v1482_v51  ;;  %v1748_v50 = vmul.f32 %v21_v49, %v21_v49 }
0x1467   :  { %v1484_v53 = vrot.slane %v1483_v52, 1 }
0x1469   :  { %v1485_v54 = vmin.f32 %v1483_v52, %v1484_v53  ;;  %v1758_v52 = vsel %vm33_vm0, %v1748_v50, 0.0 }
0x146b   :  { %vm1486_vm15 = vcmp.le.f32.partialorder %v1478_v48, %v1485_v54 }
0x146c   :  { %v1487_v55 = vsel %vm1486_vm15, %v2668_v23, 8.0 }
0x146d   :  { %v1488_v56 = vsel %vm84_vm2, %v1487_v55, inf }
0x146e   :  { %v1489_v57 = vrot.slane %v1488_v56, 4 }
0x1470   :  { %v1490_v58 = vmin.f32 %v1488_v56, %v1489_v57 }
0x1472   :  { %v1491_v59 = vrot.slane %v1490_v58, 2 }
0x1474   :  { %v1492_v60 = vmin.f32 %v1490_v58, %v1491_v59  ;;  %v23_v59 = vld [vmem:[%s3540_s1 + $0x18] sm:$0xff] }
0x1476   :  { %v1493_v61 = vrot.slane %v1492_v60, 1 }
0x1478   :  { %v1494_v62 = vmin.f32 %v1492_v60, %v1493_v61  ;;  %v24_v60 = vld [vmem:[%s3540_s1 + $0x20] sm:$0xff]  ;;  %v1750_v61 = vmul.f32 %v23_v59, %v23_v59 }
0x147a   :  { %vm1495_vm3 = vcmp.eq.f32.partialorder %v2668_v23, %v1494_v62  ;;  %v1751_v62 = vmul.f32 %v24_v60, %v24_v60 }
0x147b   :  { %v2322_v14 = vsel %vm1495_vm3, 1.0, %v2486_v33 }
0x147c   :  { %2323 = vmatmul.msk.f32.vlgmr.msra.gmra.mxu0 %vm84_vm2, %v2322_v14  ;;  %v1498_v15 = vsel %vm84_vm2, %v2322_v14, 0.0 }
0x147d   :  { %1499 = vadd.xlane.f32.xlu2 %v1498_v15  ;;  %v1764_v15 = vsel %vm33_vm0, %v1750_v61, 0.0 }
0x14f0   :  { %v1500_v16 = vpop.xlane.xlu2 %1499 }
0x14f1   :  { %v1524_v17 = vmax.f32 %v1500_v16, 1.0  ;;  %vm1526_vm4 = vcmp.gt.f32.partialorder %v1500_v16, 0.5  ;;  %v1767_v16 = vsel %vm33_vm0, %v1751_v62, 0.0 }
0x14f3   :  { %2436 = vrcp.f32 %v1524_v17 }
0x14f9   :  { %v2437_v18 = vpop.eup %2436  ;;  %v1521_v19 = vpop.f32.mrf.mxu0 }
0x14fa   :  { %v1527_v20 = vmul.f32 %v2437_v18, %v1521_v19 }
0x14fc   :  { %v1530_v21 = vsel %vm1526_vm4, %v1527_v20, %v1448_v2  ;;  %v26_v20 = vld [vmem:[%s3540_s1 + $0x30] sm:$0xff] }
0x14fd   :  { %2332 = vmatmul.msk.f32.vlgmr.msrb.gmra.mxu1 %vm33_vm0, %v1530_v21  ;;  %v1531_v22 = vmul.f32 %v1530_v21, %v1530_v21 }
0x14ff   :  { %v1532_v24 = vsel %vm33_vm0, %v1531_v22, 0.0 }
0x1500   :  { %1533 = vadd.xlane.f32.xlu0 %v1532_v24  ;;  %v1753_v24 = vmul.f32 %v26_v20, %v26_v20 }
0x1573   :  { %v1534_v25 = vpop.xlane.xlu0 %1533 }
0x157a   :  { %v1555_v43 = vpop.f32.mrf.mxu1 }
0x157b   :  { %v1558_v44 = vmul.f32 2.0, %v1555_v43 }
0x157d   :  { %v1559_v26 = vsub.f32 %v1534_v25, %v1558_v44  ;;  %v1773_v25 = vsel %vm33_vm0, %v1753_v24, 0.0 }
0x157f   :  { %v1560_v63 = vsel %vm31_vm1, 1e+30, %v1559_v26 }
0x1580   :  { %v1561_v3 = vsel %vm84_vm2, %v1560_v63, inf }
0x1581   :  { %v1562_v27 = vrot.slane %v1561_v3, 4 }
0x1583   :  { %v1563_v5 = vmin.f32 %v1561_v3, %v1562_v27  ;;  %v25_v27 = vld [vmem:[%s3540_s1 + $0x28] sm:$0xff] }
0x1585   :  { %v1564_v28 = vrot.slane %v1563_v5, 2 }
0x1587   :  { %v1565_v29 = vmin.f32 %v1563_v5, %v1564_v28 }
0x1589   :  { %v1566_v12 = vrot.slane %v1565_v29, 1 }
0x158b   :  { %v1567_v30 = vmin.f32 %v1565_v29, %v1566_v12  ;;  %v22_v12 = vld [vmem:[%s3540_s1 + $0x10] sm:$0xff] }
0x158d   :  { %vm1568_vm5 = vcmp.le.f32.partialorder %v1560_v63, %v1567_v30 }
0x158e   :  { %v1569_v13 = vsel %vm1568_vm5, %v2668_v23, 8.0 }
0x158f   :  { %v1570_v45 = vsel %vm84_vm2, %v1569_v13, inf  ;;  %v1749_v13 = vmul.f32 %v22_v12, %v22_v12 }
0x1590   :  { %v1571_v31 = vrot.slane %v1570_v45, 4 }
0x1592   :  { %v1572_v32 = vmin.f32 %v1570_v45, %v1571_v31  ;;  %v1761_v45 = vsel %vm33_vm0, %v1749_v13, 0.0  ;;  %v1752_v31 = vmul.f32 %v25_v27, %v25_v27 }
0x1594   :  { %v1573_v34 = vrot.slane %v1572_v32, 2 }
0x1596   :  { %v1574_v35 = vmin.f32 %v1572_v32, %v1573_v34  ;;  %v1770_v32 = vsel %vm33_vm0, %v1752_v31, 0.0 }
0x1598   :  { %v1575_v36 = vrot.slane %v1574_v35, 1 }
0x159a   :  { %v1576_v37 = vmin.f32 %v1574_v35, %v1575_v36 }
0x159c   :  { %vm1577_vm6 = vcmp.eq.f32.partialorder %v2668_v23, %v1576_v37 }
0x159d   :  { %v2333_v38 = vsel %vm1577_vm6, 1.0, %v2486_v33 }
0x159e   :  { %2334 = vmatmul.msk.f32.vlgmr.msra.gmra.mxu3 %vm84_vm2, %v2333_v38  ;;  %v1580_v39 = vsel %vm84_vm2, %v2333_v38, 0.0 }
0x159f   :  { %1581 = vadd.xlane.f32.xlu1 %v1580_v39 }
0x15a7   :  { %1756 = vadd.xlane.f32.xlu1 %v1755_v7 }
0x15af   :  { %1765 = vadd.xlane.f32.xlu1 %v1764_v15 }
0x15b7   :  { %1774 = vadd.xlane.f32.xlu1 %v1773_v25 }
0x1612   :  { %v1582_v40 = vpop.xlane.xlu1 %1581 }
0x1613   :  { %v1606_v41 = vmax.f32 %v1582_v40, 1.0  ;;  %vm1608_vm7 = vcmp.gt.f32.partialorder %v1582_v40, 0.5 }
0x1615   :  { %2438 = vrcp.f32 %v1606_v41 }
0x161a   :  { %v3375_v34 = vpop.xlane.xlu1 %1756 }
0x161b   :  { %v2439_v0 = vpop.eup %2438  ;;  %1779 = vxpose.xlu1.b32.start [1/8] (short) (narrow) %v3375_v34, 8 }
0x1621   :  { %v1603_v1 = vpop.f32.mrf.mxu3 }
0x1622   :  { %v1609_v42 = vmul.f32 %v2439_v0, %v1603_v1  ;;  %v1766_v39 = vpop.xlane.xlu1 %1765 }
0x1624   :  { %v3305_v2 = vsel %vm1608_vm7, %v1609_v42, %v1530_v21  ;;  %v27_v21 = vld [vmem:[%s3540_s1 + $0x38] sm:$0xff] }
0x1625   :  { %2343 = vmatmul.msk.f32.vlgmr.msrb.gmra.mxu0 %vm33_vm0, %v3305_v2  ;;  %v1613_v4 = vmul.f32 %v3305_v2, %v3305_v2  ;;  %v1754_v43 = vmul.f32 %v27_v21, %v27_v21  ;;  %2356 = vmatpush.xpose.msk.msra.mxu1 %vm33_vm0, %v27_v21 }
0x1627   :  { %v1614_v46 = vsel %vm33_vm0, %v1613_v4, 0.0  ;;  %v1776_v26 = vsel %vm33_vm0, %v1754_v43, 0.0 }
0x1628   :  { %1615 = vadd.xlane.f32.xlu2 %v1614_v46 }
0x1629   :  { %2357 = vmatpush.xpose.msk.msra.mxu1 %vm33_vm0, %v26_v20 }
0x162a   :  { %v1775_v47 = vpop.xlane.xlu1 %1774 }
0x162d   :  { %2358 = vmatpush.xpose.msk.msra.mxu1 %vm33_vm0, %v25_v27 }
0x1630   :  { %1759 = vadd.xlane.f32.xlu2 %v1758_v52 }
0x1631   :  { %2359 = vmatpush.xpose.msk.msra.mxu1 %vm33_vm0, %v24_v60 }
0x1635   :  { %2360 = vmatpush.xpose.msk.msra.mxu1 %vm33_vm0, %v23_v59 }
0x1638   :  { %1768 = vadd.xlane.f32.xlu2 %v1767_v16 }
0x1639   :  { %2361 = vmatpush.xpose.msk.msra.mxu1 %vm33_vm0, %v22_v12 }
0x163d   :  { %2362 = vmatpush.xpose.msk.msra.mxu1 %vm33_vm0, %v21_v49 }
0x1640   :  { %1777 = vadd.xlane.f32.xlu2 %v1776_v26 }
0x1641   :  { %2363 = vmatpush.xpose.msk.msra.mxu1 %vm33_vm0, %v3315_v6 }
0x1644   :  { %2364 = vmatmul.msk.f32.vlgmr.msra.gmra.mxu1 %vm33_vm0, %v3315_v6 }
0x164c   :  { %2365 = vmatmul.msk.f32.gmra.mxu1 %vm33_vm0, %v21_v49 }
0x1654   :  { %2366 = vmatmul.msk.f32.gmra.mxu1 %vm33_vm0, %v22_v12 }
0x165c   :  { %2367 = vmatmul.msk.f32.gmra.mxu1 %vm33_vm0, %v23_v59 }
0x1664   :  { %2368 = vmatmul.msk.f32.gmra.mxu1 %vm33_vm0, %v24_v60 }
0x166c   :  { %2369 = vmatmul.msk.f32.gmra.mxu1 %vm33_vm0, %v25_v27 }
0x1674   :  { %2370 = vmatmul.msk.f32.gmra.mxu1 %vm33_vm0, %v26_v20 }
0x167c   :  { %2371 = vmatmul.msk.f32.gmra.mxu1 %vm33_vm0, %v27_v21 }
0x169b   :  { %v1616_v9 = vpop.xlane.xlu2 %1615 }
0x16a2   :  { %v1637_v8 = vpop.f32.mrf.mxu0 }
0x16a3   :  { %v1640_v48 = vmul.f32 2.0, %v1637_v8  ;;  %v3378_v35 = vpop.xlane.xlu2 %1759 }
0x16a4   :  { %1780 = vxpose.xlu1.b32.cont [2/8] (short) (narrow) %v3378_v35, 8 }
0x16a5   :  { %v1641_v51 = vsub.f32 %v1616_v9, %v1640_v48 }
0x16a7   :  { %v1642_v53 = vsel %vm31_vm1, 1e+30, %v1641_v51 }
0x16a8   :  { %v1643_v54 = vsel %vm84_vm2, %v1642_v53, inf }
0x16a9   :  { %v1644_v55 = vrot.slane %v1643_v54, 4 }
0x16ab   :  { %v1645_v56 = vmin.f32 %v1643_v54, %v1644_v55  ;;  %v1769_v46 = vpop.xlane.xlu2 %1768 }
0x16ad   :  { %v1646_v57 = vrot.slane %v1645_v56, 2 }
0x16af   :  { %v1647_v58 = vmin.f32 %v1645_v56, %v1646_v57 }
0x16b1   :  { %v1648_v14 = vrot.slane %v1647_v58, 1 }
0x16b3   :  { %v1649_v17 = vmin.f32 %v1647_v58, %v1648_v14  ;;  %v1778_v7 = vpop.xlane.xlu2 %1777 }
0x16b5   :  { %vm1650_vm8 = vcmp.le.f32.partialorder %v1642_v53, %v1649_v17 }
0x16b6   :  { %v1651_v18 = vsel %vm1650_vm8, %v2668_v23, 8.0 }
0x16b7   :  { %v1652_v19 = vsel %vm84_vm2, %v1651_v18, inf }
0x16b8   :  { %v1653_v22 = vrot.slane %v1652_v19, 4 }
0x16ba   :  { %v1654_v44 = vmin.f32 %v1652_v19, %v1653_v22 }
0x16bc   :  { %v1655_v63 = vrot.slane %v1654_v44, 2 }
0x16be   :  { %v1656_v3 = vmin.f32 %v1654_v44, %v1655_v63 }
0x16c0   :  { %v1657_v5 = vrot.slane %v1656_v3, 1 }
0x16c1   :  { %v1861_v8 = vpop.f32.mrf.mxu1 }
0x16c2   :  { %v1658_v28 = vmin.f32 %v1656_v3, %v1657_v5 }
0x16c4   :  { %vm1659_vm9 = vcmp.eq.f32.partialorder %v2668_v23, %v1658_v28 }
0x16c5   :  { %v2344_v29 = vsel %vm1659_vm9, 1.0, %v2486_v33 }
0x16c6   :  { %2345 = vmatmul.msk.f32.vlgmr.msra.gmra.mxu2 %vm84_vm2, %v2344_v29  ;;  %v1662_v30 = vsel %vm84_vm2, %v2344_v29, 0.0 }
0x16c7   :  { %1663 = vadd.xlane.f32.xlu0 %v1662_v30 }
0x16c9   :  { %v1864_v48 = vpop.f32.mrf.mxu1 }
0x16cf   :  { %1762 = vadd.xlane.f32.xlu0 %v1761_v45 }
0x16d1   :  { %v1867_v49 = vpop.f32.mrf.mxu1 }
0x16d7   :  { %1771 = vadd.xlane.f32.xlu0 %v1770_v32 }
0x16d9   :  { %v1870_v9 = vpop.f32.mrf.mxu1 }
0x16da   :  { %v1888_v62 = vmul.f32 2.0, %v1870_v9 }
0x16e1   :  { %v1873_v50 = vpop.f32.mrf.mxu1 }
0x16e2   :  { %v1889_v14 = vmul.f32 2.0, %v1873_v50 }
0x173a   :  { %v1664_v36 = vpop.xlane.xlu0 %1663 }
0x173b   :  { %v1688_v37 = vmax.f32 %v1664_v36, 1.0  ;;  %vm1690_vm10 = vcmp.gt.f32.partialorder %v1664_v36, 0.5  ;;  %v1887_v36 = vmul.f32 2.0, %v1867_v49 }
0x173d   :  { %2440 = vrcp.f32 %v1688_v37 }
0x1742   :  { %v3381_v38 = vpop.xlane.xlu0 %1762 }
0x1743   :  { %1781 = vxpose.xlu1.b32.cont [3/8] (short) (narrow) %v3381_v38, 8  ;;  %v2441_v40 = vpop.eup %2440 }
0x1749   :  { %v1685_v41 = vpop.f32.mrf.mxu2 }
0x174a   :  { %v1691_v0 = vmul.f32 %v2441_v40, %v1685_v41  ;;  %v1772_v6 = vpop.xlane.xlu0 %1771 }
0x174b   :  { %1782 = vxpose.xlu1.b32.cont [4/8] (short) (narrow) %v1766_v39, 8 }
0x174c   :  { %v1694_v1 = vsel %vm1690_vm10, %v1691_v0, %v3305_v2  ;;  %v1876_v2 = vpop.f32.mrf.mxu1  ;;  %v3411_v0 = vmul.f32 2.0, %v1861_v8  ;;  %v3423_v8 = vadd.s32 48, %v2661_v11 }
0x174d   :  { %2354 = vmatmul.msk.f32.vlgmr.msrb.gmra.mxu3 %vm33_vm0, %v1694_v1  ;;  %v1695_v42 = vmul.f32 %v1694_v1, %v1694_v1  ;;  %v1890_v16 = vmul.f32 2.0, %v1876_v2  ;;  %v3429_v2 = vadd.s32 40, %v2661_v11 }
0x174f   :  { %v1696_v4 = vsel %vm33_vm0, %v1695_v42, 0.0 }
0x1750   :  { %1697 = vadd.xlane.f32.xlu0 %v1696_v4  ;;  %v3414_v4 = vadd.s32 56, %v2661_v11 }
0x1753   :  { %1783 = vxpose.xlu1.b32.cont [5/8] (short) (narrow) %v1769_v46, 8 }
0x1754   :  { %v1879_v51 = vpop.f32.mrf.mxu1 }
0x1755   :  { %v1891_v17 = vmul.f32 2.0, %v1879_v51 }
0x175b   :  { %1784 = vxpose.xlu1.b32.cont [6/8] (short) (narrow) %v1772_v6, 8 }
0x175c   :  { %v1882_v60 = vpop.f32.mrf.mxu1 }
0x175d   :  { %v1892_v19 = vmul.f32 2.0, %v1882_v60 }
0x1763   :  { %1785 = vxpose.xlu1.b32.cont [7/8] (short) (narrow) %v1775_v47, 8 }
0x176b   :  { %1786 = vxpose.xlu1.b32.end [8/8] (short) (narrow) %v1778_v7, 8 }
0x17c3   :  { %v1698_v54 = vpop.xlane.xlu0 %1697 }
0x17d0   :  { %v1719_v52 = vpop.f32.mrf.mxu3 }
0x17d1   :  { %v1722_v53 = vmul.f32 2.0, %v1719_v52 }
0x17d3   :  { %v1723_v55 = vsub.f32 %v1698_v54, %v1722_v53 }
0x17d5   :  { %v1724_v56 = vsel %vm31_vm1, 1e+30, %v1723_v55 }
0x17d6   :  { %v1725_v57 = vsel %vm84_vm2, %v1724_v56, inf }
0x17d7   :  { %v1726_v58 = vrot.slane %v1725_v57, 4  ;;  %v1795_v59 = vpop.trf.xlu1 }
0x17d8   :  { %v1811_v61 = vperm.slane %v1795_v59, 0 }
0x17d9   :  { %v1727_v15 = vmin.f32 %v1725_v57, %v1726_v58 }
0x17da   :  { %v1815_v18 = vadd.f32 %v1811_v61, %v1766_v39  ;;  %v1816_v21 = vadd.f32 %v1811_v61, %v1769_v46  ;;  %v1817_v22 = vadd.f32 %v1811_v61, %v1772_v6  ;;  %v1818_v24 = vadd.f32 %v1811_v61, %v1775_v47 }
0x17db   :  { %v1728_v20 = vrot.slane %v1727_v15, 2  ;;  %v1819_v43 = vadd.f32 %v1811_v61, %v1778_v7  ;;  %v1814_v31 = vadd.f32 %v1811_v61, %v3381_v38  ;;  %v1813_v32 = vadd.f32 %v1811_v61, %v3378_v35 }
0x17dc   :  { %v1896_v44 = vsub.f32 %v1815_v18, %v1888_v62  ;;  %v1899_v26 = vsub.f32 %v1818_v24, %v1891_v17  ;;  %v1898_v63 = vsub.f32 %v1817_v22, %v1890_v16  ;;  %v1897_v3 = vsub.f32 %v1816_v21, %v1889_v14 }
0x17dd   :  { %v1729_v25 = vmin.f32 %v1727_v15, %v1728_v20  ;;  %v1900_v27 = vsub.f32 %v1819_v43, %v1892_v19  ;;  %v1886_v39 = vmul.f32 2.0, %v1864_v48  ;;  %v1895_v1 = vsub.f32 %v1814_v31, %v1887_v36 }
0x17de   :  { %v3390_v5 = vmax.f32 %v1896_v44, 0.0  ;;  %v3392_v29 = vmax.f32 %v1899_v26, 0.0  ;;  %v3394_v12 = vmax.f32 %v1898_v63, 0.0  ;;  %v3398_v13 = vmax.f32 %v1897_v3, 0.0 }
0x17df   :  { %v1730_v28 = vrot.slane %v1729_v25, 1  ;;  %v3396_v30 = vmax.f32 %v1900_v27, 0.0  ;;  %v3417_v35 = vand.u32 127, %v28_v10  ;;  %v1894_v6 = vsub.f32 %v1813_v32, %v1886_v39 }
0x17e0   :  { %2442 = vrsqrt.f32 %v3390_v5  ;;  %v3425_v49 = vmax.f32 %v1895_v1, 0.0  ;;  %v3441_v15 = vadd.s32 32, %v2661_v11  ;;  %vm1988_vm11 = vcmp.eq.f32.partialorder %v3392_v29, inf }
0x17e1   :  { %v1731_v45 = vmin.f32 %v1729_v25, %v1730_v28  ;;  %2444 = vrsqrt.f32 %v3392_v29  ;;  %v3432_v51 = vmax.f32 %v1894_v6, 0.0  ;;  %vm2390_vm1 = vcmp.ne.s32.totalorder %v3414_v4, %v3417_v35 }
0x17e2   :  { %2446 = vrsqrt.f32 %v3396_v30  ;;  %v3445_v18 = vadd.s32 24, %v2661_v11  ;;  %vm2391_vm12 = vcmp.ne.s32.totalorder %v3423_v8, %v3417_v35  ;;  %vm1990_vm13 = vcmp.eq.f32.partialorder %v3392_v29, 0.0 }
0x17e3   :  { %vm1732_vm0 = vcmp.le.f32.partialorder %v1724_v56, %v1731_v45  ;;  %2448 = vrsqrt.f32 %v3394_v12  ;;  %v1812_v56 = vadd.f32 %v1811_v61, %v3375_v34  ;;  %vm2000_vm14 = vcmp.eq.f32.partialorder %v3396_v30, inf }
0x17e4   :  { %v1733_v37 = vsel %vm1732_vm0, %v2668_v23, 8.0  ;;  %2450 = vrsqrt.f32 %v3398_v13  ;;  %vm2392_vm15 = vcmp.ne.s32.totalorder %v3429_v2, %v3417_v35  ;;  %vm2002_vm3 = vcmp.eq.f32.partialorder %v3396_v30, 0.0 }
0x17e5   :  { %v1734_v40 = vsel %vm84_vm2, %v1733_v37, inf  ;;  %2452 = vrsqrt.f32 %v3425_v49  ;;  %vm2393_vm5 = vcmp.ne.s32.totalorder %v3441_v15, %v3417_v35  ;;  %v1893_v45 = vsub.f32 %v1812_v56, %v3411_v0 }
0x17e6   :  { %v3409_v41 = vpop.eup %2442  ;;  %v1735_v38 = vrot.slane %v1734_v40, 4  ;;  %2454 = vrsqrt.f32 %v3432_v51  ;;  %vm1976_vm6 = vcmp.eq.f32.partialorder %v3394_v12, inf  ;;  %vm1978_vm7 = vcmp.eq.f32.partialorder %v3394_v12, 0.0 }
0x17e7   :  { %v2445_v42 = vpop.eup %2444  ;;  %v1946_v46 = vmul.f32 %v3409_v41, %v3390_v5  ;;  %vm1964_vm8 = vcmp.eq.f32.partialorder %v3398_v13, inf  ;;  %vm1952_vm9 = vcmp.eq.f32.partialorder %v3390_v5, inf  ;;  %vm1966_vm10 = vcmp.eq.f32.partialorder %v3398_v13, 0.0 }
0x17e8   :  { %v2447_v47 = vpop.eup %2446  ;;  %v1736_v7 = vmin.f32 %v1734_v40, %v1735_v38  ;;  %v1982_v48 = vmul.f32 %v2445_v42, %v3392_v29  ;;  %v2003_v40 = vand.u32 2147483648, %v3396_v30  ;;  %v1991_v38 = vand.u32 2147483648, %v3392_v29 }
0x17e9   :  { %v2449_v9 = vpop.eup %2448  ;;  %v1994_v50 = vmul.f32 %v2447_v47, %v3396_v30  ;;  %v1947_v10 = vmul.f32 %v3409_v41, %v1946_v46  ;;  %vm2394_vm0 = vcmp.ne.s32.totalorder %v3445_v18, %v3417_v35  ;;  %v1931_v18 = vand.u32 2147483648, %v3432_v51 }
0x17ea   :  { %v2451_v52 = vpop.eup %2450  ;;  %v1737_v53 = vrot.slane %v1736_v7, 2  ;;  %v1983_v54 = vmul.f32 %v2445_v42, %v1982_v48  ;;  %v1970_v55 = vmul.f32 %v2449_v9, %v3394_v12 }
0x17eb   :  { %v1995_v57 = vmul.f32 %v2447_v47, %v1994_v50  ;;  %v1958_v58 = vmul.f32 %v2451_v52, %v3398_v13  ;;  %v1948_v59 = vmul.f32 0.5, %v1947_v10  ;;  %v2453_v24 = vpop.eup %2452  ;;  %v1979_v50 = vand.u32 2147483648, %v3394_v12 }
0x17ec   :  { %v1738_v60 = vmin.f32 %v1736_v7, %v1737_v53  ;;  %v1984_v62 = vmul.f32 0.5, %v1983_v54  ;;  %v1971_v14 = vmul.f32 %v2449_v9, %v1970_v55  ;;  %v1934_v3 = vmul.f32 %v2453_v24, %v3425_v49  ;;  %v2455_v39 = vpop.eup %2454 }
0x17ed   :  { %v1996_v16 = vmul.f32 0.5, %v1995_v57  ;;  %v1959_v17 = vmul.f32 %v2451_v52, %v1958_v58  ;;  %v1949_v22 = vsub.f32 1.5, %v1948_v59  ;;  %v1922_v6 = vmul.f32 %v2455_v39, %v3432_v51 }
0x17ee   :  { %v1739_v34 = vrot.slane %v1738_v60, 1  ;;  %v1985_v61 = vsub.f32 1.5, %v1984_v62  ;;  %v1972_v19 = vmul.f32 0.5, %v1971_v14  ;;  %v2006_v53 = vadd.s32 16, %v2661_v11 }
0x17ef   :  { %v1997_v20 = vsub.f32 1.5, %v1996_v16  ;;  %v1960_v21 = vmul.f32 0.5, %v1959_v17  ;;  %v1950_v37 = vmul.f32 %v3409_v41, %v1949_v22  ;;  %v1923_v10 = vmul.f32 %v2455_v39, %v1922_v6 }
0x17f0   :  { %v1740_v43 = vmin.f32 %v1738_v60, %v1739_v34  ;;  %v1986_v44 = vmul.f32 %v2445_v42, %v1985_v61  ;;  %v1973_v25 = vsub.f32 1.5, %v1972_v19  ;;  %v1935_v42 = vmul.f32 %v2453_v24, %v1934_v3 }
0x17f1   :  { %v1998_v26 = vmul.f32 %v2447_v47, %v1997_v20  ;;  %v1961_v63 = vsub.f32 1.5, %v1960_v21  ;;  %v1951_v7 = vmul.f32 %v1950_v37, %v3390_v5  ;;  %v1924_v55 = vmul.f32 0.5, %v1923_v10 }
0x17f2   :  { %vm1741_vm4 = vcmp.eq.f32.partialorder %v2668_v23, %v1740_v43  ;;  %v1987_v27 = vmul.f32 %v1986_v44, %v3392_v29  ;;  %v1974_v28 = vmul.f32 %v2449_v9, %v1973_v25  ;;  %v1936_v48 = vmul.f32 0.5, %v1935_v42 }
0x17f3   :  { %v3462_v31 = vsel %vm1741_vm4, 1.0, %v2486_v33  ;;  %v1999_v32 = vmul.f32 %v1998_v26, %v3396_v30  ;;  %v1962_v36 = vmul.f32 %v2451_v52, %v1961_v63  ;;  %v1901_v9 = vmax.f32 %v1893_v45, 0.0 }
0x17f4   :  { %v1744_v23 = vsel %vm84_vm2, %v3462_v31, 0.0  ;;  %v1975_v1 = vmul.f32 %v1974_v28, %v3394_v12  ;;  %v1989_v0 = vsel %vm1988_vm11, %v3392_v29, %v1987_v27  ;;  %v1937_v52 = vsub.f32 1.5, %v1936_v48 }
0x17f5   :  { %1745 = vadd.xlane.f32.xlu2 %v1744_v23  ;;  %v2001_v33 = vsel %vm2000_vm14, %v3396_v30, %v1999_v32  ;;  %v1963_v41 = vmul.f32 %v1962_v36, %v3398_v13  ;;  %v1992_v30 = vsel %vm1990_vm13, %v1991_v38, %v1989_v0  ;;  %2456 = vrsqrt.f32 %v1901_v9 }
0x17f6   :  { %v2004_v46 = vsel %vm2002_vm3, %v2003_v40, %v2001_v33  ;;  %v1977_v47 = vsel %vm1976_vm6, %v3394_v12, %v1975_v1  ;;  %v1967_v29 = vand.u32 2147483648, %v3398_v13  ;;  %v1953_v8 = vsel %vm1952_vm9, %v3390_v5, %v1951_v7 }
0x17f7   :  { %2373 = vmatpush.msk.msrb.mxu2 %vm2390_vm1, %v2004_v46  ;;  %v1965_v4 = vsel %vm1964_vm8, %v3398_v13, %v1963_v41  ;;  %v1980_v54 = vsel %vm1978_vm7, %v1979_v50, %v1977_v47  ;;  %v1938_v56 = vmul.f32 %v2453_v24, %v1937_v52  ;;  %v1955_v58 = vand.u32 2147483648, %v3390_v5 }
0x17f8   :  { %v1968_v57 = vsel %vm1966_vm10, %v1967_v29, %v1965_v4  ;;  %v1925_v12 = vsub.f32 1.5, %v1924_v55  ;;  %vm1954_vm1 = vcmp.eq.f32.partialorder %v3390_v5, 0.0  ;;  %vm2395_vm11 = vcmp.ne.s32.totalorder %v2006_v53, %v3417_v35 }
0x17f9   :  { %2375 = vmatpush.msk.msrb.mxu2 %vm2391_vm12, %v1992_v30  ;;  %v1939_v2 = vmul.f32 %v1938_v56, %v3425_v49  ;;  %v2005_v13 = vadd.s32 8, %v2661_v11  ;;  %v1956_v59 = vsel %vm1954_vm1, %v1955_v58, %v1953_v8  ;;  %vm1940_vm12 = vcmp.eq.f32.partialorder %v3425_v49, inf }
0x17fa   :  { %v1943_v60 = vand.u32 2147483648, %v3425_v49  ;;  %v1926_v62 = vmul.f32 %v2455_v39, %v1925_v12  ;;  %vm1942_vm13 = vcmp.eq.f32.partialorder %v3425_v49, 0.0  ;;  %vm1928_vm14 = vcmp.eq.f32.partialorder %v3432_v51, inf }
0x17fb   :  { %2377 = vmatpush.msk.msrb.mxu2 %vm2392_vm15, %v1980_v54  ;;  %v2457_v14 = vpop.eup %2456  ;;  %v1941_v16 = vsel %vm1940_vm12, %v3425_v49, %v1939_v2  ;;  %vm2396_vm15 = vcmp.ne.s32.totalorder %v2005_v13, %v3417_v35  ;;  %vm1930_vm3 = vcmp.eq.f32.partialorder %v3432_v51, 0.0  ;;  %vm1916_vm4 = vcmp.eq.f32.partialorder %v1901_v9, inf }
0x17fc   :  { %v1944_v15 = vsel %vm1942_vm13, %v1943_v60, %v1941_v16  ;;  %v1927_v5 = vmul.f32 %v1926_v62, %v3432_v51  ;;  %v1910_v17 = vmul.f32 %v2457_v14, %v1901_v9  ;;  %v1919_v24 = vand.u32 2147483648, %v1901_v9 }
0x17fd   :  { %2379 = vmatpush.msk.msrb.mxu2 %vm2393_vm5, %v1968_v57  ;;  %vm2397_vm5 = vcmp.ne.s32.totalorder %v2661_v11, %v3417_v35  ;;  %vm1918_vm6 = vcmp.eq.f32.partialorder %v1901_v9, 0.0  ;;  %vm2076_vm8 = vcmp.gt.f32.partialorder %v3462_v31, 0.5 }
0x17fe   :  { %v1929_v34 = vsel %vm1928_vm14, %v3432_v51, %v1927_v5  ;;  %v1911_v61 = vmul.f32 %v2457_v14, %v1910_v17 }
0x17ff   :  { %2381 = vmatpush.msk.msrb.mxu2 %vm2394_vm0, %v1956_v59  ;;  %v1932_v19 = vsel %vm1930_vm3, %v1931_v18, %v1929_v34 }
0x1800   :  { %v1912_v20 = vmul.f32 0.5, %v1911_v61 }
0x1801   :  { %2383 = vmatpush.msk.msrb.mxu2 %vm2395_vm11, %v1944_v15 }
0x1802   :  { %v1913_v49 = vsub.f32 1.5, %v1912_v20 }
0x1803   :  { %2385 = vmatpush.msk.msrb.mxu2 %vm2396_vm15, %v1932_v19 }
0x1804   :  { %v1914_v21 = vmul.f32 %v2457_v14, %v1913_v49 }
0x1806   :  { %v1915_v22 = vmul.f32 %v1914_v21, %v1901_v9 }
0x1808   :  { %v1917_v43 = vsel %vm1916_vm4, %v1901_v9, %v1915_v22 }
0x1809   :  { %v1920_v44 = vsel %vm1918_vm6, %v1919_v24, %v1917_v43 }
0x180a   :  { %2387 = vmatpush.msk.msrb.mxu2 %vm2397_vm5, %v1920_v44 }
0x180b   :  { %2388 = vmatmul.msk.f32.vlgmr.msrb.gmra.mxu2 %vm84_vm2, %v3462_v31 }
0x1868   :  { %v1746_v51 = vpop.xlane.xlu2 %1745 }
0x1869   :  { %v2053_v25 = vmul.f32 %v3462_v31, %v1746_v51  ;;  %v2073_v45 = vmax.f32 %v1746_v51, 1.0  ;;  %vm2077_vm7 = vcmp.lt.f32.partialorder %v1746_v51, 0.5 }
0x186a   :  { %vm2080_vm9 = vmor %vm2076_vm8, %vm2077_vm7 }
0x186b   :  { %v2054_v26 = vsel %vm84_vm2, %v2053_v25, 0.0  ;;  %2458 = vrcp.f32 %v2073_v45 }
0x186c   :  { %v2055_v63 = vrot.slane %v2054_v26, 4 }
0x186e   :  { %v2056_v3 = vadd.f32 %v2055_v63, %v2054_v26 }
0x1870   :  { %v2057_v27 = vrot.slane %v2056_v3, 2 }
0x1871   :  { %v2459_v35 = vpop.eup %2458 }
0x1872   :  { %v2058_v28 = vadd.f32 %v2057_v27, %v2056_v3 }
0x1874   :  { %v2059_v32 = vrot.slane %v2058_v28, 1 }
0x1876   :  { %v2060_v11 = vadd.f32 %v2059_v32, %v2058_v28 }
0x1878   :  { %v2389_v23 = vadd.f32 -1.0, %v2060_v11  ;;  %vm2094_vm10 = vcmp.le.f32.partialorder %v2060_v11, 1.0 }
0x187a   :  { %v2070_v41 = vmax.f32 %v2389_v23, 1.0 }
0x187c   :  { %2460 = vrcp.f32 %v2070_v41 }
0x1882   :  { %v2461_v50 = vpop.eup %2460 }
0x188e   :  { %v2050_v36 = vpop.f32.mrf.mxu2 }
0x188f   :  { %v2061_v37 = vmul.f32 %v3462_v31, %v2050_v36  ;;  %v2075_v39 = vmul.f32 %v2459_v35, %v2050_v36 }
0x1891   :  { %v2062_v40 = vsel %vm84_vm2, %v2061_v37, 0.0  ;;  %v2081_v38 = vsel %vm2080_vm9, 1e+30, %v2075_v39 }
0x1892   :  { %v2063_v1 = vrot.slane %v2062_v40, 4  ;;  %v2082_v33 = vsel %vm84_vm2, %v2081_v38, inf  ;;  %vm2096_vm2 = vcmask 516096  }
0x1893   :  { %v2083_v0 = vrot.slane %v2082_v33, 4 }
0x1894   :  { %v2064_v42 = vadd.f32 %v2063_v1, %v2062_v40 }
0x1895   :  { %v2084_v46 = vmin.f32 %v2082_v33, %v2083_v0 }
0x1896   :  { %v2065_v6 = vrot.slane %v2064_v42, 2 }
0x1897   :  { %v2085_v47 = vrot.slane %v2084_v46, 2 }
0x1898   :  { %v2066_v7 = vadd.f32 %v2065_v6, %v2064_v42 }
0x1899   :  { %v2086_v48 = vmin.f32 %v2084_v46, %v2085_v47 }
0x189a   :  { %v2067_v9 = vrot.slane %v2066_v7, 1 }
0x189b   :  { %v2087_v31 = vrot.slane %v2086_v48, 1 }
0x189c   :  { %v2068_v30 = vadd.f32 %v2067_v9, %v2066_v7 }
0x189d   :  { %v2088_v10 = vmin.f32 %v2086_v48, %v2087_v31 }
0x189e   :  { %v2072_v4 = vmul.f32 %v2461_v50, %v2068_v30 }
0x18a0   :  { %v2090_v52 = vmax.f32 %v2072_v4, %v2088_v10  ;;  %v2089_v54 = vsub.f32 %v2088_v10, %v2072_v4 }
0x18a2   :  { %v2091_v53 = vmax.f32 %v2090_v52, 1e-12 }
0x18a4   :  { %2462 = vrcp.f32 %v2091_v53 }
0x18aa   :  { %v2463_v29 = vpop.eup %2462 }
0x18ab   :  { %v2093_v55 = vmul.f32 %v2463_v29, %v2089_v54 }
0x18ad   :  { %v2095_v8 = vsel %vm2094_vm10, 0.0, %v2093_v55 }
0x18ae   :  { %v2097_v56 = vsel %vm2096_vm2, %v2095_v8, 0.0 }
0x18af   :  { %2098 = vadd.xlane.f32.xlu0 %v2097_v56 }
0x1922   :  { %v2099_v57 = vpop.xlane.xlu0 %2098 }
0x1923   :  { %v2100_v58 = vrot.slane %v2099_v57, 4 }
0x1925   :  { %v2101_v12 = vadd.f32 %v2100_v58, %v2099_v57 }
0x1927   :  { %v2102_v2 = vrot.slane %v2101_v12, 2 }
0x1929   :  { %v2103_v13 = vadd.f32 %v2102_v2, %v2101_v12 }
0x192b   :  { %v2104_v59 = vrot.slane %v2103_v13, 1 }
0x192d   :  { %v2105_v60 = vadd.f32 %v2104_v59, %v2103_v13 }
0x192f   :  { %2398 = vpush %v2105_v60 }
0x1960   :  { %s2399_s1 = spop %2398 }
0x1961   :  { %s2107_s3 = smul.f32 0.015625, %s2399_s1 }
0x1963   :  { %s2108_s4 = ssub.f32 1.0, %s2107_s3 }
0x1965   :  { %2110 = sst [smem:[#allocation2]] %s2108_s4 }
0x1966   :  { %2119 = dma.smem_to_hbm %s2487_s5, 16, %s2117_s30, [#allocation3]  }
0x1967   :  { %2484 = dma.done.wait [#allocation3], 16  }
0x1968   :  { %2485 = vsyncadd [#allocation3], 4294967280 }
0x1969   :  { %2124 = sfence }
0x196a   :  { %2125 = vsyncpa [#allocation3], 1 }

</bundles_post_ra>
